<compile_context>
chip_gen: v5e
topology: v5e:2x2
jax: 0.10.0
libtpu: 0.0.40
codegen_flags: <defaults>
</compile_context>

<pallas_src>
import functools

import jax
import jax.numpy as jnp
from jax import lax
from jax.experimental import pallas as pl
from jax.experimental.pallas import tpu as pltpu


def selfuse_kernel(x_ref, df_ref, o_ref, at_ref, *, H, W, scale, shift_n, nb):
    """x_ref: (nb, C, H*W), df_ref: (nb, 2, H*W), o_ref: (nb, C, H*W).

    at_ref: (H*W, H*W) f32 VMEM scratch holding the bilinear sampling operator
    (rebuilt per batch element, reused across the shift_n applications).
    """
    HW = H * W
    f32 = jnp.float32

    # ---- batch-invariant index helpers (hoisted out of the batch loop) -------------------
    # Per-output-pixel flat index p = h*W + w, recovered without integer div/rem.
    p_f = lax.broadcasted_iota(jnp.int32, (1, HW), 1).astype(f32)
    h = jnp.floor((p_f + 0.5) * (1.0 / W))          # exact for these small integers
    w = p_f - h * W
    # Column-index iota for the (W, HW) column-weight matrix (small; no (HW,HW) iota needed).
    c_f = lax.broadcasted_iota(jnp.int32, (W, HW), 0).astype(f32)

    for b in range(nb):
        dfb = df_ref[b]                              # (2, HW)
        df0 = dfb[0:1, :].astype(f32)                # original df channel 0 -> (1, HW)
        df1 = dfb[1:2, :].astype(f32)                # original df channel 1 -> (1, HW)

        # Module's grid math + grid_sample(align_corners=True) unnormalization, fused:
        #   ix (width coord)  = (h + scale*df1) * (W-1)/(H-1)
        #   iy (height coord) = (w + scale*df0) * (H-1)/(W-1)
        ix = (h + scale * df1) * (float(W - 1) / float(H - 1))
        iy = (w + scale * df0) * (float(H - 1) / float(W - 1))

        # padding_mode='border' -> clamp coordinates to the valid range.
        ix = jnp.clip(ix, 0.0, float(W - 1))
        iy = jnp.clip(iy, 0.0, float(H - 1))

        ix0 = jnp.floor(ix)
        iy0 = jnp.floor(iy)
        tx = ix - ix0
        ty = iy - iy0
        ix1 = jnp.minimum(ix0 + 1.0, float(W - 1))   # weight is 0 whenever this clamps
        iy1 = jnp.minimum(iy0 + 1.0, float(H - 1))

        # Column-weight matrix X[c, p]: one-hot on ix0/ix1 carrying (1-tx)/tx.  All compares
        # are done in f32 directly (ix0/ix1 hold small exact integers) — no int casts.
        xmat = (jnp.where(c_f == ix0, 1.0 - tx, 0.0)
                + jnp.where(c_f == ix1, tx, 0.0))    # (W, HW)

        # Separable AT build: AT[(r*W + c), p] = yrow_r[p] * X[c, p].  Written into the VMEM
        # scratch in W-row blocks (static, 8-aligned offsets): one elementwise multiply per
        # block over the (HW, HW) volume in total.  Duplicate clamped corners (border pixels)
        # correctly sum their weights inside yrow / xmat.
        for r in range(H):
            rf = float(r)
            yrow = (jnp.where(iy0 == rf, 1.0 - ty, 0.0)
                    + jnp.where(iy1 == rf, ty, 0.0))          # (1, HW)
            at_ref[r * W:(r + 1) * W, :] = yrow * xmat        # (W, HW) lane-dense store

        # Apply the fixed sampling operator shift_n times: deep MXU matmuls (K = HW),
        # lane-dense (C, HW) output layout.  (Left as repeated dots on purpose — MXU idle.)
        xv = x_ref[b].astype(f32)                    # (C, HW)
        at = at_ref[...]
        for _ in range(shift_n):
            xv = jnp.dot(xv, at, preferred_element_type=jnp.float32)
        o_ref[b] = xv.astype(o_ref.dtype)


def _tensorcores_per_chip() -> int:
    """Best-effort TensorCore-per-chip count (v7x has 2). Falls back to 1 (v5e/v6e)."""
    try:
        info = pltpu.get_tpu_info()
    except Exception:
        return 1
    for name in ("tensorcores_per_chip", "num_tensorcores", "num_cores", "core_count"):
        v = getattr(info, name, None)
        try:
            if v and int(v) > 0:
                return int(v)
        except (TypeError, ValueError):
            pass
    return 1


def selfuse_forward(x, df, *, scale=2.0, shift_n=4, batch_in_kernel=None):
    """x: (B, C, H, W), df: (B, 2, H, W) -> (B, C, H, W)."""
    B, C, H, W = x.shape
    assert df.shape == (B, 2, H, W)
    assert H > 1 and W > 1, "align_corners=True normalization requires H > 1 and W > 1"
    HW = H * W

    # AT is (HW, HW) f32; keep it (plus double-buffered I/O blocks) comfortably inside the
    # default scoped-VMEM budget on every generation (v7x physical VMEM is only 64 MiB).
    # TODO(synk): for larger H*W, build/apply AT in 128-lane column strips (extra grid axis
    # reusing a strip-sized scratch) instead of a single (HW, HW) block.
    assert HW * HW * 4 <= 24 * 1024 * 1024, "H*W too large for the single-block AT path"

    if batch_in_kernel is None:
        # Single-TC chips (v5e/v6e): fold the batch into one grid step (no per-step overhead,
        # VPU/MXU overlap across elements).  Multi-TC chips (v7x): keep a parallel batch axis.
        batch_in_kernel = (_tensorcores_per_chip() < 2) and B > 1

    xf = x.reshape(B, C, HW)      # flatten spatial in the wrapper (free XLA reshape)
    dff = df.reshape(B, 2, HW)

    if batch_in_kernel:
        nb, grid, sem = B, (1,), "arbitrary"
        idx = lambda i: (0, 0, 0)
    else:
        nb, grid, sem = 1, (B,), "parallel"
        idx = lambda b: (b, 0, 0)
        # TODO(synk): when B == 1 on a 2-TC chip, add a second parallel axis over AT column
        # halves so the second TensorCore is not idle.

    kernel = functools.partial(selfuse_kernel, H=H, W=W,
                               scale=float(scale), shift_n=int(shift_n), nb=nb)

    out = pl.pallas_call(
        kernel,
        out_shape=jax.ShapeDtypeStruct((B, C, HW), x.dtype),
        grid_spec=pltpu.PrefetchScalarGridSpec(
            num_scalar_prefetch=0,
            grid=grid,
            in_specs=[
                pl.BlockSpec((nb, C, HW), idx),   # x  (batch-chunked)
                pl.BlockSpec((nb, 2, HW), idx),   # df (batch-chunked)
            ],
            out_specs=pl.BlockSpec((nb, C, HW), idx),
            scratch_shapes=[pltpu.VMEM((HW, HW), jnp.float32)],   # AT sampling operator
        ),
        compiler_params=pltpu.CompilerParams(dimension_semantics=(sem,)),
    )(xf, dff)

    return out.reshape(B, C, H, W)


def selfuse_reference(x, df, *, scale=2.0, shift_n=4):
    """Pure-JAX reference: explicit gather-based bilinear grid_sample, border padding,
    align_corners=True, replicating the module's grid construction exactly."""
    B, C, H, W = x.shape
    h_grid = jnp.broadcast_to(jnp.arange(H, dtype=jnp.float32)[:, None], (H, W))
    w_grid = jnp.broadcast_to(jnp.arange(W, dtype=jnp.float32)[None, :], (H, W))
    outs = []
    for b in range(B):
        ix = (h_grid + scale * df[b, 1]) * ((W - 1) / (H - 1))
        iy = (w_grid + scale * df[b, 0]) * ((H - 1) / (W - 1))
        ix = jnp.clip(ix, 0.0, W - 1.0)
        iy = jnp.clip(iy, 0.0, H - 1.0)
        ix0 = jnp.floor(ix)
        iy0 = jnp.floor(iy)
        tx = ix - ix0
        ty = iy - iy0
        ix0i = ix0.astype(jnp.int32)
        iy0i = iy0.astype(jnp.int32)
        ix1i = jnp.minimum(ix0i + 1, W - 1)
        iy1i = jnp.minimum(iy0i + 1, H - 1)
        img = x[b]
        for _ in range(shift_n):
            g00 = img[:, iy0i, ix0i]
            g01 = img[:, iy0i, ix1i]
            g10 = img[:, iy1i, ix0i]
            g11 = img[:, iy1i, ix1i]
            img = (g00 * ((1.0 - ty) * (1.0 - tx))[None]
                   + g01 * ((1.0 - ty) * tx)[None]
                   + g10 * (ty * (1.0 - tx))[None]
                   + g11 * (ty * tx)[None])
        outs.append(img)
    return jnp.stack(outs, axis=0)


if __name__ == "__main__":
    B, C, H, W = 2, 4, 16, 16          # in_channels=4, shift_n=4, scale=2 (module defaults)
    key = jax.random.PRNGKey(0)
    kx, kd = jax.random.split(key)
    x = jax.random.normal(kx, (B, C, H, W), jnp.float32)    # NCHW, like PyTorch
    df = jax.random.normal(kd, (B, 2, H, W), jnp.float32)   # direction field (2 channels)

    out = jax.block_until_ready(selfuse_forward(x, df, scale=2.0, shift_n=4))
    ref = jax.block_until_ready(selfuse_reference(x, df, scale=2.0, shift_n=4))

    assert out.shape == (B, C, H, W)
    max_err = float(jnp.max(jnp.abs(out - ref)))
    assert jnp.allclose(out, ref, atol=5e-4, rtol=5e-4), max_err

    print("KERNEL_OK")
</pallas_src>

<mosaic_0001>
module attributes {stable_mosaic.version = 11 : i64} {
  func.func @selfuse_kernel(%arg0: i32, %arg1: memref<2x4x256xf32, #tpu.memory_space<vmem>>, %arg2: memref<2x2x256xf32, #tpu.memory_space<vmem>>, %arg3: memref<2x4x256xf32, #tpu.memory_space<vmem>>, %arg4: memref<256x256xf32, #tpu.memory_space<vmem>>) attributes {dimension_semantics = [#tpu.dimension_semantics<arbitrary>], iteration_bounds = array<i64: 1>, scalar_prefetch = 0 : i64, scratch_operands = 1 : i64, tpu.core_type = #tpu.core_type<tc>, window_params = [{pipeline_mode = #tpu.pipeline_mode<synchronous>, transform_indices = @transform_0, window_bounds = array<i64: 2, 4, 256>}, {pipeline_mode = #tpu.pipeline_mode<synchronous>, transform_indices = @transform_1, window_bounds = array<i64: 2, 2, 256>}, {pipeline_mode = #tpu.pipeline_mode<synchronous>, transform_indices = @transform_2, window_bounds = array<i64: 2, 4, 256>}]} {
    %0 = tpu.iota {dimensions = array<i32: 1>} : vector<1x256xi32>
    %1 = arith.sitofp %0 : vector<1x256xi32> to vector<1x256xf32>
    %cst = arith.constant 5.000000e-01 : f32
    %2 = vector.broadcast %cst : f32 to vector<1x256xf32>
    %3 = arith.addf %1, %2 : vector<1x256xf32>
    %cst_0 = arith.constant 6.250000e-02 : f32
    %4 = vector.broadcast %cst_0 : f32 to vector<1x256xf32>
    %5 = arith.mulf %3, %4 : vector<1x256xf32>
    %6 = math.floor %5 : vector<1x256xf32>
    %cst_1 = arith.constant 1.600000e+01 : f32
    %7 = vector.broadcast %cst_1 : f32 to vector<1x256xf32>
    %8 = arith.mulf %6, %7 : vector<1x256xf32>
    %9 = arith.subf %1, %8 : vector<1x256xf32>
    %10 = tpu.iota {dimensions = array<i32: 0>} : vector<16x256xi32>
    %11 = arith.sitofp %10 : vector<16x256xi32> to vector<16x256xf32>
    %c0 = arith.constant 0 : index
    %c0_2 = arith.constant 0 : index
    %c0_3 = arith.constant 0 : index
    %12 = vector.load %arg2[%c0, %c0_2, %c0_3] : memref<2x2x256xf32, #tpu.memory_space<vmem>>, vector<1x2x256xf32>
    %13 = vector.shape_cast %12 : vector<1x2x256xf32> to vector<2x256xf32>
    %14 = vector.extract_strided_slice %13 {offsets = [0, 0], sizes = [1, 256], strides = [1, 1]} : vector<2x256xf32> to vector<1x256xf32>
    %15 = vector.extract_strided_slice %13 {offsets = [1, 0], sizes = [1, 256], strides = [1, 1]} : vector<2x256xf32> to vector<1x256xf32>
    %cst_4 = arith.constant 2.000000e+00 : f32
    %16 = vector.broadcast %cst_4 : f32 to vector<1x256xf32>
    %17 = arith.mulf %16, %15 : vector<1x256xf32>
    %18 = arith.addf %6, %17 : vector<1x256xf32>
    %cst_5 = arith.constant 1.000000e+00 : f32
    %19 = vector.broadcast %cst_5 : f32 to vector<1x256xf32>
    %20 = arith.mulf %18, %19 : vector<1x256xf32>
    %cst_6 = arith.constant 2.000000e+00 : f32
    %21 = vector.broadcast %cst_6 : f32 to vector<1x256xf32>
    %22 = arith.mulf %21, %14 : vector<1x256xf32>
    %23 = arith.addf %9, %22 : vector<1x256xf32>
    %cst_7 = arith.constant 1.000000e+00 : f32
    %24 = vector.broadcast %cst_7 : f32 to vector<1x256xf32>
    %25 = arith.mulf %23, %24 : vector<1x256xf32>
    %cst_8 = arith.constant 0.000000e+00 : f32
    %cst_9 = arith.constant 1.500000e+01 : f32
    %26 = vector.broadcast %cst_8 : f32 to vector<1x256xf32>
    %27 = arith.maximumf %26, %20 : vector<1x256xf32>
    %28 = vector.broadcast %cst_9 : f32 to vector<1x256xf32>
    %29 = arith.minimumf %28, %27 : vector<1x256xf32>
    %cst_10 = arith.constant 0.000000e+00 : f32
    %cst_11 = arith.constant 1.500000e+01 : f32
    %30 = vector.broadcast %cst_10 : f32 to vector<1x256xf32>
    %31 = arith.maximumf %30, %25 : vector<1x256xf32>
    %32 = vector.broadcast %cst_11 : f32 to vector<1x256xf32>
    %33 = arith.minimumf %32, %31 : vector<1x256xf32>
    %34 = math.floor %29 : vector<1x256xf32>
    %35 = math.floor %33 : vector<1x256xf32>
    %36 = arith.subf %29, %34 : vector<1x256xf32>
    %37 = arith.subf %33, %35 : vector<1x256xf32>
    %cst_12 = arith.constant 1.000000e+00 : f32
    %38 = vector.broadcast %cst_12 : f32 to vector<1x256xf32>
    %39 = arith.addf %34, %38 : vector<1x256xf32>
    %cst_13 = arith.constant 1.500000e+01 : f32
    %40 = vector.broadcast %cst_13 : f32 to vector<1x256xf32>
    %41 = arith.minimumf %39, %40 : vector<1x256xf32>
    %cst_14 = arith.constant 1.000000e+00 : f32
    %42 = vector.broadcast %cst_14 : f32 to vector<1x256xf32>
    %43 = arith.addf %35, %42 : vector<1x256xf32>
    %cst_15 = arith.constant 1.500000e+01 : f32
    %44 = vector.broadcast %cst_15 : f32 to vector<1x256xf32>
    %45 = arith.minimumf %43, %44 : vector<1x256xf32>
    %46 = vector.broadcast %34 : vector<1x256xf32> to vector<16x256xf32>
    %47 = arith.cmpf oeq, %11, %46 : vector<16x256xf32>
    %cst_16 = arith.constant 1.000000e+00 : f32
    %48 = vector.broadcast %cst_16 : f32 to vector<1x256xf32>
    %49 = arith.subf %48, %36 : vector<1x256xf32>
    %cst_17 = arith.constant 0.000000e+00 : f32
    %50 = vector.shape_cast %49 : vector<1x256xf32> to vector<1x256xf32>
    %51 = vector.broadcast %50 : vector<1x256xf32> to vector<16x256xf32>
    %52 = vector.broadcast %cst_17 : f32 to vector<16x256xf32>
    %53 = arith.select %47, %51, %52 : vector<16x256xi1>, vector<16x256xf32>
    %54 = vector.broadcast %41 : vector<1x256xf32> to vector<16x256xf32>
    %55 = arith.cmpf oeq, %11, %54 : vector<16x256xf32>
    %cst_18 = arith.constant 0.000000e+00 : f32
    %56 = vector.shape_cast %36 : vector<1x256xf32> to vector<1x256xf32>
    %57 = vector.broadcast %56 : vector<1x256xf32> to vector<16x256xf32>
    %58 = vector.broadcast %cst_18 : f32 to vector<16x256xf32>
    %59 = arith.select %55, %57, %58 : vector<16x256xi1>, vector<16x256xf32>
    %60 = arith.addf %53, %59 : vector<16x256xf32>
    %cst_19 = arith.constant 0.000000e+00 : f32
    %61 = vector.broadcast %cst_19 : f32 to vector<1x256xf32>
    %62 = arith.cmpf oeq, %35, %61 : vector<1x256xf32>
    %cst_20 = arith.constant 1.000000e+00 : f32
    %63 = vector.broadcast %cst_20 : f32 to vector<1x256xf32>
    %64 = arith.subf %63, %37 : vector<1x256xf32>
    %cst_21 = arith.constant 0.000000e+00 : f32
    %65 = vector.broadcast %cst_21 : f32 to vector<1x256xf32>
    %66 = arith.select %62, %64, %65 : vector<1x256xi1>, vector<1x256xf32>
    %cst_22 = arith.constant 0.000000e+00 : f32
    %67 = vector.broadcast %cst_22 : f32 to vector<1x256xf32>
    %68 = arith.cmpf oeq, %45, %67 : vector<1x256xf32>
    %cst_23 = arith.constant 0.000000e+00 : f32
    %69 = vector.broadcast %cst_23 : f32 to vector<1x256xf32>
    %70 = arith.select %68, %37, %69 : vector<1x256xi1>, vector<1x256xf32>
    %71 = arith.addf %66, %70 : vector<1x256xf32>
    %72 = vector.broadcast %71 : vector<1x256xf32> to vector<16x256xf32>
    %73 = arith.mulf %72, %60 : vector<16x256xf32>
    %c0_24 = arith.constant 0 : index
    %c0_25 = arith.constant 0 : index
    %74 = vector.load %arg4[%c0_24, %c0_25] : memref<256x256xf32, #tpu.memory_space<vmem>>, vector<16x256xf32>
    tpu.vector_store %arg4[%c0_24, %c0_25], %73 {strides = array<i32>} : memref<256x256xf32, #tpu.memory_space<vmem>>, vector<16x256xf32>,
    %cst_26 = arith.constant 1.000000e+00 : f32
    %75 = vector.broadcast %cst_26 : f32 to vector<1x256xf32>
    %76 = arith.cmpf oeq, %35, %75 : vector<1x256xf32>
    %cst_27 = arith.constant 1.000000e+00 : f32
    %77 = vector.broadcast %cst_27 : f32 to vector<1x256xf32>
    %78 = arith.subf %77, %37 : vector<1x256xf32>
    %cst_28 = arith.constant 0.000000e+00 : f32
    %79 = vector.broadcast %cst_28 : f32 to vector<1x256xf32>
    %80 = arith.select %76, %78, %79 : vector<1x256xi1>, vector<1x256xf32>
    %cst_29 = arith.constant 1.000000e+00 : f32
    %81 = vector.broadcast %cst_29 : f32 to vector<1x256xf32>
    %82 = arith.cmpf oeq, %45, %81 : vector<1x256xf32>
    %cst_30 = arith.constant 0.000000e+00 : f32
    %83 = vector.broadcast %cst_30 : f32 to vector<1x256xf32>
    %84 = arith.select %82, %37, %83 : vector<1x256xi1>, vector<1x256xf32>
    %85 = arith.addf %80, %84 : vector<1x256xf32>
    %86 = vector.broadcast %85 : vector<1x256xf32> to vector<16x256xf32>
    %87 = arith.mulf %86, %60 : vector<16x256xf32>
    %c16 = arith.constant 16 : index
    %c0_31 = arith.constant 0 : index
    %88 = vector.load %arg4[%c16, %c0_31] : memref<256x256xf32, #tpu.memory_space<vmem>>, vector<16x256xf32>
    tpu.vector_store %arg4[%c16, %c0_31], %87 {strides = array<i32>} : memref<256x256xf32, #tpu.memory_space<vmem>>, vector<16x256xf32>,
    %cst_32 = arith.constant 2.000000e+00 : f32
    %89 = vector.broadcast %cst_32 : f32 to vector<1x256xf32>
    %90 = arith.cmpf oeq, %35, %89 : vector<1x256xf32>
    %cst_33 = arith.constant 1.000000e+00 : f32
    %91 = vector.broadcast %cst_33 : f32 to vector<1x256xf32>
    %92 = arith.subf %91, %37 : vector<1x256xf32>
    %cst_34 = arith.constant 0.000000e+00 : f32
    %93 = vector.broadcast %cst_34 : f32 to vector<1x256xf32>
    %94 = arith.select %90, %92, %93 : vector<1x256xi1>, vector<1x256xf32>
    %cst_35 = arith.constant 2.000000e+00 : f32
    %95 = vector.broadcast %cst_35 : f32 to vector<1x256xf32>
    %96 = arith.cmpf oeq, %45, %95 : vector<1x256xf32>
    %cst_36 = arith.constant 0.000000e+00 : f32
    %97 = vector.broadcast %cst_36 : f32 to vector<1x256xf32>
    %98 = arith.select %96, %37, %97 : vector<1x256xi1>, vector<1x256xf32>
    %99 = arith.addf %94, %98 : vector<1x256xf32>
    %100 = vector.broadcast %99 : vector<1x256xf32> to vector<16x256xf32>
    %101 = arith.mulf %100, %60 : vector<16x256xf32>
    %c32 = arith.constant 32 : index
    %c0_37 = arith.constant 0 : index
    %102 = vector.load %arg4[%c32, %c0_37] : memref<256x256xf32, #tpu.memory_space<vmem>>, vector<16x256xf32>
    tpu.vector_store %arg4[%c32, %c0_37], %101 {strides = array<i32>} : memref<256x256xf32, #tpu.memory_space<vmem>>, vector<16x256xf32>,
    %cst_38 = arith.constant 3.000000e+00 : f32
    %103 = vector.broadcast %cst_38 : f32 to vector<1x256xf32>
    %104 = arith.cmpf oeq, %35, %103 : vector<1x256xf32>
    %cst_39 = arith.constant 1.000000e+00 : f32
    %105 = vector.broadcast %cst_39 : f32 to vector<1x256xf32>
    %106 = arith.subf %105, %37 : vector<1x256xf32>
    %cst_40 = arith.constant 0.000000e+00 : f32
    %107 = vector.broadcast %cst_40 : f32 to vector<1x256xf32>
    %108 = arith.select %104, %106, %107 : vector<1x256xi1>, vector<1x256xf32>
    %cst_41 = arith.constant 3.000000e+00 : f32
    %109 = vector.broadcast %cst_41 : f32 to vector<1x256xf32>
    %110 = arith.cmpf oeq, %45, %109 : vector<1x256xf32>
    %cst_42 = arith.constant 0.000000e+00 : f32
    %111 = vector.broadcast %cst_42 : f32 to vector<1x256xf32>
    %112 = arith.select %110, %37, %111 : vector<1x256xi1>, vector<1x256xf32>
    %113 = arith.addf %108, %112 : vector<1x256xf32>
    %114 = vector.broadcast %113 : vector<1x256xf32> to vector<16x256xf32>
    %115 = arith.mulf %114, %60 : vector<16x256xf32>
    %c48 = arith.constant 48 : index
    %c0_43 = arith.constant 0 : index
    %116 = vector.load %arg4[%c48, %c0_43] : memref<256x256xf32, #tpu.memory_space<vmem>>, vector<16x256xf32>
    tpu.vector_store %arg4[%c48, %c0_43], %115 {strides = array<i32>} : memref<256x256xf32, #tpu.memory_space<vmem>>, vector<16x256xf32>,
    %cst_44 = arith.constant 4.000000e+00 : f32
    %117 = vector.broadcast %cst_44 : f32 to vector<1x256xf32>
    %118 = arith.cmpf oeq, %35, %117 : vector<1x256xf32>
    %cst_45 = arith.constant 1.000000e+00 : f32
    %119 = vector.broadcast %cst_45 : f32 to vector<1x256xf32>
    %120 = arith.subf %119, %37 : vector<1x256xf32>
    %cst_46 = arith.constant 0.000000e+00 : f32
    %121 = vector.broadcast %cst_46 : f32 to vector<1x256xf32>
    %122 = arith.select %118, %120, %121 : vector<1x256xi1>, vector<1x256xf32>
    %cst_47 = arith.constant 4.000000e+00 : f32
    %123 = vector.broadcast %cst_47 : f32 to vector<1x256xf32>
    %124 = arith.cmpf oeq, %45, %123 : vector<1x256xf32>
    %cst_48 = arith.constant 0.000000e+00 : f32
    %125 = vector.broadcast %cst_48 : f32 to vector<1x256xf32>
    %126 = arith.select %124, %37, %125 : vector<1x256xi1>, vector<1x256xf32>
    %127 = arith.addf %122, %126 : vector<1x256xf32>
    %128 = vector.broadcast %127 : vector<1x256xf32> to vector<16x256xf32>
    %129 = arith.mulf %128, %60 : vector<16x256xf32>
    %c64 = arith.constant 64 : index
    %c0_49 = arith.constant 0 : index
    %130 = vector.load %arg4[%c64, %c0_49] : memref<256x256xf32, #tpu.memory_space<vmem>>, vector<16x256xf32>
    tpu.vector_store %arg4[%c64, %c0_49], %129 {strides = array<i32>} : memref<256x256xf32, #tpu.memory_space<vmem>>, vector<16x256xf32>,
    %cst_50 = arith.constant 5.000000e+00 : f32
    %131 = vector.broadcast %cst_50 : f32 to vector<1x256xf32>
    %132 = arith.cmpf oeq, %35, %131 : vector<1x256xf32>
    %cst_51 = arith.constant 1.000000e+00 : f32
    %133 = vector.broadcast %cst_51 : f32 to vector<1x256xf32>
    %134 = arith.subf %133, %37 : vector<1x256xf32>
    %cst_52 = arith.constant 0.000000e+00 : f32
    %135 = vector.broadcast %cst_52 : f32 to vector<1x256xf32>
    %136 = arith.select %132, %134, %135 : vector<1x256xi1>, vector<1x256xf32>
    %cst_53 = arith.constant 5.000000e+00 : f32
    %137 = vector.broadcast %cst_53 : f32 to vector<1x256xf32>
    %138 = arith.cmpf oeq, %45, %137 : vector<1x256xf32>
    %cst_54 = arith.constant 0.000000e+00 : f32
    %139 = vector.broadcast %cst_54 : f32 to vector<1x256xf32>
    %140 = arith.select %138, %37, %139 : vector<1x256xi1>, vector<1x256xf32>
    %141 = arith.addf %136, %140 : vector<1x256xf32>
    %142 = vector.broadcast %141 : vector<1x256xf32> to vector<16x256xf32>
    %143 = arith.mulf %142, %60 : vector<16x256xf32>
    %c80 = arith.constant 80 : index
    %c0_55 = arith.constant 0 : index
    %144 = vector.load %arg4[%c80, %c0_55] : memref<256x256xf32, #tpu.memory_space<vmem>>, vector<16x256xf32>
    tpu.vector_store %arg4[%c80, %c0_55], %143 {strides = array<i32>} : memref<256x256xf32, #tpu.memory_space<vmem>>, vector<16x256xf32>,
    %cst_56 = arith.constant 6.000000e+00 : f32
    %145 = vector.broadcast %cst_56 : f32 to vector<1x256xf32>
    %146 = arith.cmpf oeq, %35, %145 : vector<1x256xf32>
    %cst_57 = arith.constant 1.000000e+00 : f32
    %147 = vector.broadcast %cst_57 : f32 to vector<1x256xf32>
    %148 = arith.subf %147, %37 : vector<1x256xf32>
    %cst_58 = arith.constant 0.000000e+00 : f32
    %149 = vector.broadcast %cst_58 : f32 to vector<1x256xf32>
    %150 = arith.select %146, %148, %149 : vector<1x256xi1>, vector<1x256xf32>
    %cst_59 = arith.constant 6.000000e+00 : f32
    %151 = vector.broadcast %cst_59 : f32 to vector<1x256xf32>
    %152 = arith.cmpf oeq, %45, %151 : vector<1x256xf32>
    %cst_60 = arith.constant 0.000000e+00 : f32
    %153 = vector.broadcast %cst_60 : f32 to vector<1x256xf32>
    %154 = arith.select %152, %37, %153 : vector<1x256xi1>, vector<1x256xf32>
    %155 = arith.addf %150, %154 : vector<1x256xf32>
    %156 = vector.broadcast %155 : vector<1x256xf32> to vector<16x256xf32>
    %157 = arith.mulf %156, %60 : vector<16x256xf32>
    %c96 = arith.constant 96 : index
    %c0_61 = arith.constant 0 : index
    %158 = vector.load %arg4[%c96, %c0_61] : memref<256x256xf32, #tpu.memory_space<vmem>>, vector<16x256xf32>
    tpu.vector_store %arg4[%c96, %c0_61], %157 {strides = array<i32>} : memref<256x256xf32, #tpu.memory_space<vmem>>, vector<16x256xf32>,
    %cst_62 = arith.constant 7.000000e+00 : f32
    %159 = vector.broadcast %cst_62 : f32 to vector<1x256xf32>
    %160 = arith.cmpf oeq, %35, %159 : vector<1x256xf32>
    %cst_63 = arith.constant 1.000000e+00 : f32
    %161 = vector.broadcast %cst_63 : f32 to vector<1x256xf32>
    %162 = arith.subf %161, %37 : vector<1x256xf32>
    %cst_64 = arith.constant 0.000000e+00 : f32
    %163 = vector.broadcast %cst_64 : f32 to vector<1x256xf32>
    %164 = arith.select %160, %162, %163 : vector<1x256xi1>, vector<1x256xf32>
    %cst_65 = arith.constant 7.000000e+00 : f32
    %165 = vector.broadcast %cst_65 : f32 to vector<1x256xf32>
    %166 = arith.cmpf oeq, %45, %165 : vector<1x256xf32>
    %cst_66 = arith.constant 0.000000e+00 : f32
    %167 = vector.broadcast %cst_66 : f32 to vector<1x256xf32>
    %168 = arith.select %166, %37, %167 : vector<1x256xi1>, vector<1x256xf32>
    %169 = arith.addf %164, %168 : vector<1x256xf32>
    %170 = vector.broadcast %169 : vector<1x256xf32> to vector<16x256xf32>
    %171 = arith.mulf %170, %60 : vector<16x256xf32>
    %c112 = arith.constant 112 : index
    %c0_67 = arith.constant 0 : index
    %172 = vector.load %arg4[%c112, %c0_67] : memref<256x256xf32, #tpu.memory_space<vmem>>, vector<16x256xf32>
    tpu.vector_store %arg4[%c112, %c0_67], %171 {strides = array<i32>} : memref<256x256xf32, #tpu.memory_space<vmem>>, vector<16x256xf32>,
    %cst_68 = arith.constant 8.000000e+00 : f32
    %173 = vector.broadcast %cst_68 : f32 to vector<1x256xf32>
    %174 = arith.cmpf oeq, %35, %173 : vector<1x256xf32>
    %cst_69 = arith.constant 1.000000e+00 : f32
    %175 = vector.broadcast %cst_69 : f32 to vector<1x256xf32>
    %176 = arith.subf %175, %37 : vector<1x256xf32>
    %cst_70 = arith.constant 0.000000e+00 : f32
    %177 = vector.broadcast %cst_70 : f32 to vector<1x256xf32>
    %178 = arith.select %174, %176, %177 : vector<1x256xi1>, vector<1x256xf32>
    %cst_71 = arith.constant 8.000000e+00 : f32
    %179 = vector.broadcast %cst_71 : f32 to vector<1x256xf32>
    %180 = arith.cmpf oeq, %45, %179 : vector<1x256xf32>
    %cst_72 = arith.constant 0.000000e+00 : f32
    %181 = vector.broadcast %cst_72 : f32 to vector<1x256xf32>
    %182 = arith.select %180, %37, %181 : vector<1x256xi1>, vector<1x256xf32>
    %183 = arith.addf %178, %182 : vector<1x256xf32>
    %184 = vector.broadcast %183 : vector<1x256xf32> to vector<16x256xf32>
    %185 = arith.mulf %184, %60 : vector<16x256xf32>
    %c128 = arith.constant 128 : index
    %c0_73 = arith.constant 0 : index
    %186 = vector.load %arg4[%c128, %c0_73] : memref<256x256xf32, #tpu.memory_space<vmem>>, vector<16x256xf32>
    tpu.vector_store %arg4[%c128, %c0_73], %185 {strides = array<i32>} : memref<256x256xf32, #tpu.memory_space<vmem>>, vector<16x256xf32>,
    %cst_74 = arith.constant 9.000000e+00 : f32
    %187 = vector.broadcast %cst_74 : f32 to vector<1x256xf32>
    %188 = arith.cmpf oeq, %35, %187 : vector<1x256xf32>
    %cst_75 = arith.constant 1.000000e+00 : f32
    %189 = vector.broadcast %cst_75 : f32 to vector<1x256xf32>
    %190 = arith.subf %189, %37 : vector<1x256xf32>
    %cst_76 = arith.constant 0.000000e+00 : f32
    %191 = vector.broadcast %cst_76 : f32 to vector<1x256xf32>
    %192 = arith.select %188, %190, %191 : vector<1x256xi1>, vector<1x256xf32>
    %cst_77 = arith.constant 9.000000e+00 : f32
    %193 = vector.broadcast %cst_77 : f32 to vector<1x256xf32>
    %194 = arith.cmpf oeq, %45, %193 : vector<1x256xf32>
    %cst_78 = arith.constant 0.000000e+00 : f32
    %195 = vector.broadcast %cst_78 : f32 to vector<1x256xf32>
    %196 = arith.select %194, %37, %195 : vector<1x256xi1>, vector<1x256xf32>
    %197 = arith.addf %192, %196 : vector<1x256xf32>
    %198 = vector.broadcast %197 : vector<1x256xf32> to vector<16x256xf32>
    %199 = arith.mulf %198, %60 : vector<16x256xf32>
    %c144 = arith.constant 144 : index
    %c0_79 = arith.constant 0 : index
    %200 = vector.load %arg4[%c144, %c0_79] : memref<256x256xf32, #tpu.memory_space<vmem>>, vector<16x256xf32>
    tpu.vector_store %arg4[%c144, %c0_79], %199 {strides = array<i32>} : memref<256x256xf32, #tpu.memory_space<vmem>>, vector<16x256xf32>,
    %cst_80 = arith.constant 1.000000e+01 : f32
    %201 = vector.broadcast %cst_80 : f32 to vector<1x256xf32>
    %202 = arith.cmpf oeq, %35, %201 : vector<1x256xf32>
    %cst_81 = arith.constant 1.000000e+00 : f32
    %203 = vector.broadcast %cst_81 : f32 to vector<1x256xf32>
    %204 = arith.subf %203, %37 : vector<1x256xf32>
    %cst_82 = arith.constant 0.000000e+00 : f32
    %205 = vector.broadcast %cst_82 : f32 to vector<1x256xf32>
    %206 = arith.select %202, %204, %205 : vector<1x256xi1>, vector<1x256xf32>
    %cst_83 = arith.constant 1.000000e+01 : f32
    %207 = vector.broadcast %cst_83 : f32 to vector<1x256xf32>
    %208 = arith.cmpf oeq, %45, %207 : vector<1x256xf32>
    %cst_84 = arith.constant 0.000000e+00 : f32
    %209 = vector.broadcast %cst_84 : f32 to vector<1x256xf32>
    %210 = arith.select %208, %37, %209 : vector<1x256xi1>, vector<1x256xf32>
    %211 = arith.addf %206, %210 : vector<1x256xf32>
    %212 = vector.broadcast %211 : vector<1x256xf32> to vector<16x256xf32>
    %213 = arith.mulf %212, %60 : vector<16x256xf32>
    %c160 = arith.constant 160 : index
    %c0_85 = arith.constant 0 : index
    %214 = vector.load %arg4[%c160, %c0_85] : memref<256x256xf32, #tpu.memory_space<vmem>>, vector<16x256xf32>
    tpu.vector_store %arg4[%c160, %c0_85], %213 {strides = array<i32>} : memref<256x256xf32, #tpu.memory_space<vmem>>, vector<16x256xf32>,
    %cst_86 = arith.constant 1.100000e+01 : f32
    %215 = vector.broadcast %cst_86 : f32 to vector<1x256xf32>
    %216 = arith.cmpf oeq, %35, %215 : vector<1x256xf32>
    %cst_87 = arith.constant 1.000000e+00 : f32
    %217 = vector.broadcast %cst_87 : f32 to vector<1x256xf32>
    %218 = arith.subf %217, %37 : vector<1x256xf32>
    %cst_88 = arith.constant 0.000000e+00 : f32
    %219 = vector.broadcast %cst_88 : f32 to vector<1x256xf32>
    %220 = arith.select %216, %218, %219 : vector<1x256xi1>, vector<1x256xf32>
    %cst_89 = arith.constant 1.100000e+01 : f32
    %221 = vector.broadcast %cst_89 : f32 to vector<1x256xf32>
    %222 = arith.cmpf oeq, %45, %221 : vector<1x256xf32>
    %cst_90 = arith.constant 0.000000e+00 : f32
    %223 = vector.broadcast %cst_90 : f32 to vector<1x256xf32>
    %224 = arith.select %222, %37, %223 : vector<1x256xi1>, vector<1x256xf32>
    %225 = arith.addf %220, %224 : vector<1x256xf32>
    %226 = vector.broadcast %225 : vector<1x256xf32> to vector<16x256xf32>
    %227 = arith.mulf %226, %60 : vector<16x256xf32>
    %c176 = arith.constant 176 : index
    %c0_91 = arith.constant 0 : index
    %228 = vector.load %arg4[%c176, %c0_91] : memref<256x256xf32, #tpu.memory_space<vmem>>, vector<16x256xf32>
    tpu.vector_store %arg4[%c176, %c0_91], %227 {strides = array<i32>} : memref<256x256xf32, #tpu.memory_space<vmem>>, vector<16x256xf32>,
    %cst_92 = arith.constant 1.200000e+01 : f32
    %229 = vector.broadcast %cst_92 : f32 to vector<1x256xf32>
    %230 = arith.cmpf oeq, %35, %229 : vector<1x256xf32>
    %cst_93 = arith.constant 1.000000e+00 : f32
    %231 = vector.broadcast %cst_93 : f32 to vector<1x256xf32>
    %232 = arith.subf %231, %37 : vector<1x256xf32>
    %cst_94 = arith.constant 0.000000e+00 : f32
    %233 = vector.broadcast %cst_94 : f32 to vector<1x256xf32>
    %234 = arith.select %230, %232, %233 : vector<1x256xi1>, vector<1x256xf32>
    %cst_95 = arith.constant 1.200000e+01 : f32
    %235 = vector.broadcast %cst_95 : f32 to vector<1x256xf32>
    %236 = arith.cmpf oeq, %45, %235 : vector<1x256xf32>
    %cst_96 = arith.constant 0.000000e+00 : f32
    %237 = vector.broadcast %cst_96 : f32 to vector<1x256xf32>
    %238 = arith.select %236, %37, %237 : vector<1x256xi1>, vector<1x256xf32>
    %239 = arith.addf %234, %238 : vector<1x256xf32>
    %240 = vector.broadcast %239 : vector<1x256xf32> to vector<16x256xf32>
    %241 = arith.mulf %240, %60 : vector<16x256xf32>
    %c192 = arith.constant 192 : index
    %c0_97 = arith.constant 0 : index
    %242 = vector.load %arg4[%c192, %c0_97] : memref<256x256xf32, #tpu.memory_space<vmem>>, vector<16x256xf32>
    tpu.vector_store %arg4[%c192, %c0_97], %241 {strides = array<i32>} : memref<256x256xf32, #tpu.memory_space<vmem>>, vector<16x256xf32>,
    %cst_98 = arith.constant 1.300000e+01 : f32
    %243 = vector.broadcast %cst_98 : f32 to vector<1x256xf32>
    %244 = arith.cmpf oeq, %35, %243 : vector<1x256xf32>
    %cst_99 = arith.constant 1.000000e+00 : f32
    %245 = vector.broadcast %cst_99 : f32 to vector<1x256xf32>
    %246 = arith.subf %245, %37 : vector<1x256xf32>
    %cst_100 = arith.constant 0.000000e+00 : f32
    %247 = vector.broadcast %cst_100 : f32 to vector<1x256xf32>
    %248 = arith.select %244, %246, %247 : vector<1x256xi1>, vector<1x256xf32>
    %cst_101 = arith.constant 1.300000e+01 : f32
    %249 = vector.broadcast %cst_101 : f32 to vector<1x256xf32>
    %250 = arith.cmpf oeq, %45, %249 : vector<1x256xf32>
    %cst_102 = arith.constant 0.000000e+00 : f32
    %251 = vector.broadcast %cst_102 : f32 to vector<1x256xf32>
    %252 = arith.select %250, %37, %251 : vector<1x256xi1>, vector<1x256xf32>
    %253 = arith.addf %248, %252 : vector<1x256xf32>
    %254 = vector.broadcast %253 : vector<1x256xf32> to vector<16x256xf32>
    %255 = arith.mulf %254, %60 : vector<16x256xf32>
    %c208 = arith.constant 208 : index
    %c0_103 = arith.constant 0 : index
    %256 = vector.load %arg4[%c208, %c0_103] : memref<256x256xf32, #tpu.memory_space<vmem>>, vector<16x256xf32>
    tpu.vector_store %arg4[%c208, %c0_103], %255 {strides = array<i32>} : memref<256x256xf32, #tpu.memory_space<vmem>>, vector<16x256xf32>,
    %cst_104 = arith.constant 1.400000e+01 : f32
    %257 = vector.broadcast %cst_104 : f32 to vector<1x256xf32>
    %258 = arith.cmpf oeq, %35, %257 : vector<1x256xf32>
    %cst_105 = arith.constant 1.000000e+00 : f32
    %259 = vector.broadcast %cst_105 : f32 to vector<1x256xf32>
    %260 = arith.subf %259, %37 : vector<1x256xf32>
    %cst_106 = arith.constant 0.000000e+00 : f32
    %261 = vector.broadcast %cst_106 : f32 to vector<1x256xf32>
    %262 = arith.select %258, %260, %261 : vector<1x256xi1>, vector<1x256xf32>
    %cst_107 = arith.constant 1.400000e+01 : f32
    %263 = vector.broadcast %cst_107 : f32 to vector<1x256xf32>
    %264 = arith.cmpf oeq, %45, %263 : vector<1x256xf32>
    %cst_108 = arith.constant 0.000000e+00 : f32
    %265 = vector.broadcast %cst_108 : f32 to vector<1x256xf32>
    %266 = arith.select %264, %37, %265 : vector<1x256xi1>, vector<1x256xf32>
    %267 = arith.addf %262, %266 : vector<1x256xf32>
    %268 = vector.broadcast %267 : vector<1x256xf32> to vector<16x256xf32>
    %269 = arith.mulf %268, %60 : vector<16x256xf32>
    %c224 = arith.constant 224 : index
    %c0_109 = arith.constant 0 : index
    %270 = vector.load %arg4[%c224, %c0_109] : memref<256x256xf32, #tpu.memory_space<vmem>>, vector<16x256xf32>
    tpu.vector_store %arg4[%c224, %c0_109], %269 {strides = array<i32>} : memref<256x256xf32, #tpu.memory_space<vmem>>, vector<16x256xf32>,
    %cst_110 = arith.constant 1.500000e+01 : f32
    %271 = vector.broadcast %cst_110 : f32 to vector<1x256xf32>
    %272 = arith.cmpf oeq, %35, %271 : vector<1x256xf32>
    %cst_111 = arith.constant 1.000000e+00 : f32
    %273 = vector.broadcast %cst_111 : f32 to vector<1x256xf32>
    %274 = arith.subf %273, %37 : vector<1x256xf32>
    %cst_112 = arith.constant 0.000000e+00 : f32
    %275 = vector.broadcast %cst_112 : f32 to vector<1x256xf32>
    %276 = arith.select %272, %274, %275 : vector<1x256xi1>, vector<1x256xf32>
    %cst_113 = arith.constant 1.500000e+01 : f32
    %277 = vector.broadcast %cst_113 : f32 to vector<1x256xf32>
    %278 = arith.cmpf oeq, %45, %277 : vector<1x256xf32>
    %cst_114 = arith.constant 0.000000e+00 : f32
    %279 = vector.broadcast %cst_114 : f32 to vector<1x256xf32>
    %280 = arith.select %278, %37, %279 : vector<1x256xi1>, vector<1x256xf32>
    %281 = arith.addf %276, %280 : vector<1x256xf32>
    %282 = vector.broadcast %281 : vector<1x256xf32> to vector<16x256xf32>
    %283 = arith.mulf %282, %60 : vector<16x256xf32>
    %c240 = arith.constant 240 : index
    %c0_115 = arith.constant 0 : index
    %284 = vector.load %arg4[%c240, %c0_115] : memref<256x256xf32, #tpu.memory_space<vmem>>, vector<16x256xf32>
    tpu.vector_store %arg4[%c240, %c0_115], %283 {strides = array<i32>} : memref<256x256xf32, #tpu.memory_space<vmem>>, vector<16x256xf32>,
    %c0_116 = arith.constant 0 : index
    %c0_117 = arith.constant 0 : index
    %c0_118 = arith.constant 0 : index
    %285 = vector.load %arg1[%c0_116, %c0_117, %c0_118] : memref<2x4x256xf32, #tpu.memory_space<vmem>>, vector<1x4x256xf32>
    %286 = vector.shape_cast %285 : vector<1x4x256xf32> to vector<4x256xf32>
    %c0_119 = arith.constant 0 : index
    %c0_120 = arith.constant 0 : index
    %287 = vector.load %arg4[%c0_119, %c0_120] : memref<256x256xf32, #tpu.memory_space<vmem>>, vector<256x256xf32>
    %cst_121 = arith.constant dense<0.000000e+00> : vector<4x256xf32>
    %288 = tpu.matmul %286, %287, %cst_121 {dimension_numbers = #tpu.dot_dimension_numbers<[1], [0], [0], [1], [0, 0, 1, 1], [], []>} : vector<4x256xf32>, vector<256x256xf32>, vector<4x256xf32> -> vector<4x256xf32>
    %cst_122 = arith.constant dense<0.000000e+00> : vector<4x256xf32>
    %289 = tpu.matmul %288, %287, %cst_122 {dimension_numbers = #tpu.dot_dimension_numbers<[1], [0], [0], [1], [0, 0, 1, 1], [], []>} : vector<4x256xf32>, vector<256x256xf32>, vector<4x256xf32> -> vector<4x256xf32>
    %cst_123 = arith.constant dense<0.000000e+00> : vector<4x256xf32>
    %290 = tpu.matmul %289, %287, %cst_123 {dimension_numbers = #tpu.dot_dimension_numbers<[1], [0], [0], [1], [0, 0, 1, 1], [], []>} : vector<4x256xf32>, vector<256x256xf32>, vector<4x256xf32> -> vector<4x256xf32>
    %cst_124 = arith.constant dense<0.000000e+00> : vector<4x256xf32>
    %291 = tpu.matmul %290, %287, %cst_124 {dimension_numbers = #tpu.dot_dimension_numbers<[1], [0], [0], [1], [0, 0, 1, 1], [], []>} : vector<4x256xf32>, vector<256x256xf32>, vector<4x256xf32> -> vector<4x256xf32>
    %c0_125 = arith.constant 0 : index
    %c0_126 = arith.constant 0 : index
    %c0_127 = arith.constant 0 : index
    %292 = vector.load %arg3[%c0_125, %c0_126, %c0_127] : memref<2x4x256xf32, #tpu.memory_space<vmem>>, vector<1x4x256xf32>
    %293 = vector.shape_cast %292 : vector<1x4x256xf32> to vector<4x256xf32>
    %294 = vector.shape_cast %291 : vector<4x256xf32> to vector<1x4x256xf32>
    tpu.vector_store %arg3[%c0_125, %c0_126, %c0_127], %294 {strides = array<i32>} : memref<2x4x256xf32, #tpu.memory_space<vmem>>, vector<1x4x256xf32>,
    %c1 = arith.constant 1 : index
    %c0_128 = arith.constant 0 : index
    %c0_129 = arith.constant 0 : index
    %295 = vector.load %arg2[%c1, %c0_128, %c0_129] : memref<2x2x256xf32, #tpu.memory_space<vmem>>, vector<1x2x256xf32>
    %296 = vector.shape_cast %295 : vector<1x2x256xf32> to vector<2x256xf32>
    %297 = vector.extract_strided_slice %296 {offsets = [0, 0], sizes = [1, 256], strides = [1, 1]} : vector<2x256xf32> to vector<1x256xf32>
    %298 = vector.extract_strided_slice %296 {offsets = [1, 0], sizes = [1, 256], strides = [1, 1]} : vector<2x256xf32> to vector<1x256xf32>
    %cst_130 = arith.constant 2.000000e+00 : f32
    %299 = vector.broadcast %cst_130 : f32 to vector<1x256xf32>
    %300 = arith.mulf %299, %298 : vector<1x256xf32>
    %301 = arith.addf %6, %300 : vector<1x256xf32>
    %cst_131 = arith.constant 1.000000e+00 : f32
    %302 = vector.broadcast %cst_131 : f32 to vector<1x256xf32>
    %303 = arith.mulf %301, %302 : vector<1x256xf32>
    %cst_132 = arith.constant 2.000000e+00 : f32
    %304 = vector.broadcast %cst_132 : f32 to vector<1x256xf32>
    %305 = arith.mulf %304, %297 : vector<1x256xf32>
    %306 = arith.addf %9, %305 : vector<1x256xf32>
    %cst_133 = arith.constant 1.000000e+00 : f32
    %307 = vector.broadcast %cst_133 : f32 to vector<1x256xf32>
    %308 = arith.mulf %306, %307 : vector<1x256xf32>
    %cst_134 = arith.constant 0.000000e+00 : f32
    %cst_135 = arith.constant 1.500000e+01 : f32
    %309 = vector.broadcast %cst_134 : f32 to vector<1x256xf32>
    %310 = arith.maximumf %309, %303 : vector<1x256xf32>
    %311 = vector.broadcast %cst_135 : f32 to vector<1x256xf32>
    %312 = arith.minimumf %311, %310 : vector<1x256xf32>
    %cst_136 = arith.constant 0.000000e+00 : f32
    %cst_137 = arith.constant 1.500000e+01 : f32
    %313 = vector.broadcast %cst_136 : f32 to vector<1x256xf32>
    %314 = arith.maximumf %313, %308 : vector<1x256xf32>
    %315 = vector.broadcast %cst_137 : f32 to vector<1x256xf32>
    %316 = arith.minimumf %315, %314 : vector<1x256xf32>
    %317 = math.floor %312 : vector<1x256xf32>
    %318 = math.floor %316 : vector<1x256xf32>
    %319 = arith.subf %312, %317 : vector<1x256xf32>
    %320 = arith.subf %316, %318 : vector<1x256xf32>
    %cst_138 = arith.constant 1.000000e+00 : f32
    %321 = vector.broadcast %cst_138 : f32 to vector<1x256xf32>
    %322 = arith.addf %317, %321 : vector<1x256xf32>
    %cst_139 = arith.constant 1.500000e+01 : f32
    %323 = vector.broadcast %cst_139 : f32 to vector<1x256xf32>
    %324 = arith.minimumf %322, %323 : vector<1x256xf32>
    %cst_140 = arith.constant 1.000000e+00 : f32
    %325 = vector.broadcast %cst_140 : f32 to vector<1x256xf32>
    %326 = arith.addf %318, %325 : vector<1x256xf32>
    %cst_141 = arith.constant 1.500000e+01 : f32
    %327 = vector.broadcast %cst_141 : f32 to vector<1x256xf32>
    %328 = arith.minimumf %326, %327 : vector<1x256xf32>
    %329 = vector.broadcast %317 : vector<1x256xf32> to vector<16x256xf32>
    %330 = arith.cmpf oeq, %11, %329 : vector<16x256xf32>
    %cst_142 = arith.constant 1.000000e+00 : f32
    %331 = vector.broadcast %cst_142 : f32 to vector<1x256xf32>
    %332 = arith.subf %331, %319 : vector<1x256xf32>
    %cst_143 = arith.constant 0.000000e+00 : f32
    %333 = vector.shape_cast %332 : vector<1x256xf32> to vector<1x256xf32>
    %334 = vector.broadcast %333 : vector<1x256xf32> to vector<16x256xf32>
    %335 = vector.broadcast %cst_143 : f32 to vector<16x256xf32>
    %336 = arith.select %330, %334, %335 : vector<16x256xi1>, vector<16x256xf32>
    %337 = vector.broadcast %324 : vector<1x256xf32> to vector<16x256xf32>
    %338 = arith.cmpf oeq, %11, %337 : vector<16x256xf32>
    %cst_144 = arith.constant 0.000000e+00 : f32
    %339 = vector.shape_cast %319 : vector<1x256xf32> to vector<1x256xf32>
    %340 = vector.broadcast %339 : vector<1x256xf32> to vector<16x256xf32>
    %341 = vector.broadcast %cst_144 : f32 to vector<16x256xf32>
    %342 = arith.select %338, %340, %341 : vector<16x256xi1>, vector<16x256xf32>
    %343 = arith.addf %336, %342 : vector<16x256xf32>
    %cst_145 = arith.constant 0.000000e+00 : f32
    %344 = vector.broadcast %cst_145 : f32 to vector<1x256xf32>
    %345 = arith.cmpf oeq, %318, %344 : vector<1x256xf32>
    %cst_146 = arith.constant 1.000000e+00 : f32
    %346 = vector.broadcast %cst_146 : f32 to vector<1x256xf32>
    %347 = arith.subf %346, %320 : vector<1x256xf32>
    %cst_147 = arith.constant 0.000000e+00 : f32
    %348 = vector.broadcast %cst_147 : f32 to vector<1x256xf32>
    %349 = arith.select %345, %347, %348 : vector<1x256xi1>, vector<1x256xf32>
    %cst_148 = arith.constant 0.000000e+00 : f32
    %350 = vector.broadcast %cst_148 : f32 to vector<1x256xf32>
    %351 = arith.cmpf oeq, %328, %350 : vector<1x256xf32>
    %cst_149 = arith.constant 0.000000e+00 : f32
    %352 = vector.broadcast %cst_149 : f32 to vector<1x256xf32>
    %353 = arith.select %351, %320, %352 : vector<1x256xi1>, vector<1x256xf32>
    %354 = arith.addf %349, %353 : vector<1x256xf32>
    %355 = vector.broadcast %354 : vector<1x256xf32> to vector<16x256xf32>
    %356 = arith.mulf %355, %343 : vector<16x256xf32>
    %c0_150 = arith.constant 0 : index
    %c0_151 = arith.constant 0 : index
    %357 = vector.load %arg4[%c0_150, %c0_151] : memref<256x256xf32, #tpu.memory_space<vmem>>, vector<16x256xf32>
    tpu.vector_store %arg4[%c0_150, %c0_151], %356 {strides = array<i32>} : memref<256x256xf32, #tpu.memory_space<vmem>>, vector<16x256xf32>,
    %cst_152 = arith.constant 1.000000e+00 : f32
    %358 = vector.broadcast %cst_152 : f32 to vector<1x256xf32>
    %359 = arith.cmpf oeq, %318, %358 : vector<1x256xf32>
    %cst_153 = arith.constant 1.000000e+00 : f32
    %360 = vector.broadcast %cst_153 : f32 to vector<1x256xf32>
    %361 = arith.subf %360, %320 : vector<1x256xf32>
    %cst_154 = arith.constant 0.000000e+00 : f32
    %362 = vector.broadcast %cst_154 : f32 to vector<1x256xf32>
    %363 = arith.select %359, %361, %362 : vector<1x256xi1>, vector<1x256xf32>
    %cst_155 = arith.constant 1.000000e+00 : f32
    %364 = vector.broadcast %cst_155 : f32 to vector<1x256xf32>
    %365 = arith.cmpf oeq, %328, %364 : vector<1x256xf32>
    %cst_156 = arith.constant 0.000000e+00 : f32
    %366 = vector.broadcast %cst_156 : f32 to vector<1x256xf32>
    %367 = arith.select %365, %320, %366 : vector<1x256xi1>, vector<1x256xf32>
    %368 = arith.addf %363, %367 : vector<1x256xf32>
    %369 = vector.broadcast %368 : vector<1x256xf32> to vector<16x256xf32>
    %370 = arith.mulf %369, %343 : vector<16x256xf32>
    %c16_157 = arith.constant 16 : index
    %c0_158 = arith.constant 0 : index
    %371 = vector.load %arg4[%c16_157, %c0_158] : memref<256x256xf32, #tpu.memory_space<vmem>>, vector<16x256xf32>
    tpu.vector_store %arg4[%c16_157, %c0_158], %370 {strides = array<i32>} : memref<256x256xf32, #tpu.memory_space<vmem>>, vector<16x256xf32>,
    %cst_159 = arith.constant 2.000000e+00 : f32
    %372 = vector.broadcast %cst_159 : f32 to vector<1x256xf32>
    %373 = arith.cmpf oeq, %318, %372 : vector<1x256xf32>
    %cst_160 = arith.constant 1.000000e+00 : f32
    %374 = vector.broadcast %cst_160 : f32 to vector<1x256xf32>
    %375 = arith.subf %374, %320 : vector<1x256xf32>
    %cst_161 = arith.constant 0.000000e+00 : f32
    %376 = vector.broadcast %cst_161 : f32 to vector<1x256xf32>
    %377 = arith.select %373, %375, %376 : vector<1x256xi1>, vector<1x256xf32>
    %cst_162 = arith.constant 2.000000e+00 : f32
    %378 = vector.broadcast %cst_162 : f32 to vector<1x256xf32>
    %379 = arith.cmpf oeq, %328, %378 : vector<1x256xf32>
    %cst_163 = arith.constant 0.000000e+00 : f32
    %380 = vector.broadcast %cst_163 : f32 to vector<1x256xf32>
    %381 = arith.select %379, %320, %380 : vector<1x256xi1>, vector<1x256xf32>
    %382 = arith.addf %377, %381 : vector<1x256xf32>
    %383 = vector.broadcast %382 : vector<1x256xf32> to vector<16x256xf32>
    %384 = arith.mulf %383, %343 : vector<16x256xf32>
    %c32_164 = arith.constant 32 : index
    %c0_165 = arith.constant 0 : index
    %385 = vector.load %arg4[%c32_164, %c0_165] : memref<256x256xf32, #tpu.memory_space<vmem>>, vector<16x256xf32>
    tpu.vector_store %arg4[%c32_164, %c0_165], %384 {strides = array<i32>} : memref<256x256xf32, #tpu.memory_space<vmem>>, vector<16x256xf32>,
    %cst_166 = arith.constant 3.000000e+00 : f32
    %386 = vector.broadcast %cst_166 : f32 to vector<1x256xf32>
    %387 = arith.cmpf oeq, %318, %386 : vector<1x256xf32>
    %cst_167 = arith.constant 1.000000e+00 : f32
    %388 = vector.broadcast %cst_167 : f32 to vector<1x256xf32>
    %389 = arith.subf %388, %320 : vector<1x256xf32>
    %cst_168 = arith.constant 0.000000e+00 : f32
    %390 = vector.broadcast %cst_168 : f32 to vector<1x256xf32>
    %391 = arith.select %387, %389, %390 : vector<1x256xi1>, vector<1x256xf32>
    %cst_169 = arith.constant 3.000000e+00 : f32
    %392 = vector.broadcast %cst_169 : f32 to vector<1x256xf32>
    %393 = arith.cmpf oeq, %328, %392 : vector<1x256xf32>
    %cst_170 = arith.constant 0.000000e+00 : f32
    %394 = vector.broadcast %cst_170 : f32 to vector<1x256xf32>
    %395 = arith.select %393, %320, %394 : vector<1x256xi1>, vector<1x256xf32>
    %396 = arith.addf %391, %395 : vector<1x256xf32>
    %397 = vector.broadcast %396 : vector<1x256xf32> to vector<16x256xf32>
    %398 = arith.mulf %397, %343 : vector<16x256xf32>
    %c48_171 = arith.constant 48 : index
    %c0_172 = arith.constant 0 : index
    %399 = vector.load %arg4[%c48_171, %c0_172] : memref<256x256xf32, #tpu.memory_space<vmem>>, vector<16x256xf32>
    tpu.vector_store %arg4[%c48_171, %c0_172], %398 {strides = array<i32>} : memref<256x256xf32, #tpu.memory_space<vmem>>, vector<16x256xf32>,
    %cst_173 = arith.constant 4.000000e+00 : f32
    %400 = vector.broadcast %cst_173 : f32 to vector<1x256xf32>
    %401 = arith.cmpf oeq, %318, %400 : vector<1x256xf32>
    %cst_174 = arith.constant 1.000000e+00 : f32
    %402 = vector.broadcast %cst_174 : f32 to vector<1x256xf32>
    %403 = arith.subf %402, %320 : vector<1x256xf32>
    %cst_175 = arith.constant 0.000000e+00 : f32
    %404 = vector.broadcast %cst_175 : f32 to vector<1x256xf32>
    %405 = arith.select %401, %403, %404 : vector<1x256xi1>, vector<1x256xf32>
    %cst_176 = arith.constant 4.000000e+00 : f32
    %406 = vector.broadcast %cst_176 : f32 to vector<1x256xf32>
    %407 = arith.cmpf oeq, %328, %406 : vector<1x256xf32>
    %cst_177 = arith.constant 0.000000e+00 : f32
    %408 = vector.broadcast %cst_177 : f32 to vector<1x256xf32>
    %409 = arith.select %407, %320, %408 : vector<1x256xi1>, vector<1x256xf32>
    %410 = arith.addf %405, %409 : vector<1x256xf32>
    %411 = vector.broadcast %410 : vector<1x256xf32> to vector<16x256xf32>
    %412 = arith.mulf %411, %343 : vector<16x256xf32>
    %c64_178 = arith.constant 64 : index
    %c0_179 = arith.constant 0 : index
    %413 = vector.load %arg4[%c64_178, %c0_179] : memref<256x256xf32, #tpu.memory_space<vmem>>, vector<16x256xf32>
    tpu.vector_store %arg4[%c64_178, %c0_179], %412 {strides = array<i32>} : memref<256x256xf32, #tpu.memory_space<vmem>>, vector<16x256xf32>,
    %cst_180 = arith.constant 5.000000e+00 : f32
    %414 = vector.broadcast %cst_180 : f32 to vector<1x256xf32>
    %415 = arith.cmpf oeq, %318, %414 : vector<1x256xf32>
    %cst_181 = arith.constant 1.000000e+00 : f32
    %416 = vector.broadcast %cst_181 : f32 to vector<1x256xf32>
    %417 = arith.subf %416, %320 : vector<1x256xf32>
    %cst_182 = arith.constant 0.000000e+00 : f32
    %418 = vector.broadcast %cst_182 : f32 to vector<1x256xf32>
    %419 = arith.select %415, %417, %418 : vector<1x256xi1>, vector<1x256xf32>
    %cst_183 = arith.constant 5.000000e+00 : f32
    %420 = vector.broadcast %cst_183 : f32 to vector<1x256xf32>
    %421 = arith.cmpf oeq, %328, %420 : vector<1x256xf32>
    %cst_184 = arith.constant 0.000000e+00 : f32
    %422 = vector.broadcast %cst_184 : f32 to vector<1x256xf32>
    %423 = arith.select %421, %320, %422 : vector<1x256xi1>, vector<1x256xf32>
    %424 = arith.addf %419, %423 : vector<1x256xf32>
    %425 = vector.broadcast %424 : vector<1x256xf32> to vector<16x256xf32>
    %426 = arith.mulf %425, %343 : vector<16x256xf32>
    %c80_185 = arith.constant 80 : index
    %c0_186 = arith.constant 0 : index
    %427 = vector.load %arg4[%c80_185, %c0_186] : memref<256x256xf32, #tpu.memory_space<vmem>>, vector<16x256xf32>
    tpu.vector_store %arg4[%c80_185, %c0_186], %426 {strides = array<i32>} : memref<256x256xf32, #tpu.memory_space<vmem>>, vector<16x256xf32>,
    %cst_187 = arith.constant 6.000000e+00 : f32
    %428 = vector.broadcast %cst_187 : f32 to vector<1x256xf32>
    %429 = arith.cmpf oeq, %318, %428 : vector<1x256xf32>
    %cst_188 = arith.constant 1.000000e+00 : f32
    %430 = vector.broadcast %cst_188 : f32 to vector<1x256xf32>
    %431 = arith.subf %430, %320 : vector<1x256xf32>
    %cst_189 = arith.constant 0.000000e+00 : f32
    %432 = vector.broadcast %cst_189 : f32 to vector<1x256xf32>
    %433 = arith.select %429, %431, %432 : vector<1x256xi1>, vector<1x256xf32>
    %cst_190 = arith.constant 6.000000e+00 : f32
    %434 = vector.broadcast %cst_190 : f32 to vector<1x256xf32>
    %435 = arith.cmpf oeq, %328, %434 : vector<1x256xf32>
    %cst_191 = arith.constant 0.000000e+00 : f32
    %436 = vector.broadcast %cst_191 : f32 to vector<1x256xf32>
    %437 = arith.select %435, %320, %436 : vector<1x256xi1>, vector<1x256xf32>
    %438 = arith.addf %433, %437 : vector<1x256xf32>
    %439 = vector.broadcast %438 : vector<1x256xf32> to vector<16x256xf32>
    %440 = arith.mulf %439, %343 : vector<16x256xf32>
    %c96_192 = arith.constant 96 : index
    %c0_193 = arith.constant 0 : index
    %441 = vector.load %arg4[%c96_192, %c0_193] : memref<256x256xf32, #tpu.memory_space<vmem>>, vector<16x256xf32>
    tpu.vector_store %arg4[%c96_192, %c0_193], %440 {strides = array<i32>} : memref<256x256xf32, #tpu.memory_space<vmem>>, vector<16x256xf32>,
    %cst_194 = arith.constant 7.000000e+00 : f32
    %442 = vector.broadcast %cst_194 : f32 to vector<1x256xf32>
    %443 = arith.cmpf oeq, %318, %442 : vector<1x256xf32>
    %cst_195 = arith.constant 1.000000e+00 : f32
    %444 = vector.broadcast %cst_195 : f32 to vector<1x256xf32>
    %445 = arith.subf %444, %320 : vector<1x256xf32>
    %cst_196 = arith.constant 0.000000e+00 : f32
    %446 = vector.broadcast %cst_196 : f32 to vector<1x256xf32>
    %447 = arith.select %443, %445, %446 : vector<1x256xi1>, vector<1x256xf32>
    %cst_197 = arith.constant 7.000000e+00 : f32
    %448 = vector.broadcast %cst_197 : f32 to vector<1x256xf32>
    %449 = arith.cmpf oeq, %328, %448 : vector<1x256xf32>
    %cst_198 = arith.constant 0.000000e+00 : f32
    %450 = vector.broadcast %cst_198 : f32 to vector<1x256xf32>
    %451 = arith.select %449, %320, %450 : vector<1x256xi1>, vector<1x256xf32>
    %452 = arith.addf %447, %451 : vector<1x256xf32>
    %453 = vector.broadcast %452 : vector<1x256xf32> to vector<16x256xf32>
    %454 = arith.mulf %453, %343 : vector<16x256xf32>
    %c112_199 = arith.constant 112 : index
    %c0_200 = arith.constant 0 : index
    %455 = vector.load %arg4[%c112_199, %c0_200] : memref<256x256xf32, #tpu.memory_space<vmem>>, vector<16x256xf32>
    tpu.vector_store %arg4[%c112_199, %c0_200], %454 {strides = array<i32>} : memref<256x256xf32, #tpu.memory_space<vmem>>, vector<16x256xf32>,
    %cst_201 = arith.constant 8.000000e+00 : f32
    %456 = vector.broadcast %cst_201 : f32 to vector<1x256xf32>
    %457 = arith.cmpf oeq, %318, %456 : vector<1x256xf32>
    %cst_202 = arith.constant 1.000000e+00 : f32
    %458 = vector.broadcast %cst_202 : f32 to vector<1x256xf32>
    %459 = arith.subf %458, %320 : vector<1x256xf32>
    %cst_203 = arith.constant 0.000000e+00 : f32
    %460 = vector.broadcast %cst_203 : f32 to vector<1x256xf32>
    %461 = arith.select %457, %459, %460 : vector<1x256xi1>, vector<1x256xf32>
    %cst_204 = arith.constant 8.000000e+00 : f32
    %462 = vector.broadcast %cst_204 : f32 to vector<1x256xf32>
    %463 = arith.cmpf oeq, %328, %462 : vector<1x256xf32>
    %cst_205 = arith.constant 0.000000e+00 : f32
    %464 = vector.broadcast %cst_205 : f32 to vector<1x256xf32>
    %465 = arith.select %463, %320, %464 : vector<1x256xi1>, vector<1x256xf32>
    %466 = arith.addf %461, %465 : vector<1x256xf32>
    %467 = vector.broadcast %466 : vector<1x256xf32> to vector<16x256xf32>
    %468 = arith.mulf %467, %343 : vector<16x256xf32>
    %c128_206 = arith.constant 128 : index
    %c0_207 = arith.constant 0 : index
    %469 = vector.load %arg4[%c128_206, %c0_207] : memref<256x256xf32, #tpu.memory_space<vmem>>, vector<16x256xf32>
    tpu.vector_store %arg4[%c128_206, %c0_207], %468 {strides = array<i32>} : memref<256x256xf32, #tpu.memory_space<vmem>>, vector<16x256xf32>,
    %cst_208 = arith.constant 9.000000e+00 : f32
    %470 = vector.broadcast %cst_208 : f32 to vector<1x256xf32>
    %471 = arith.cmpf oeq, %318, %470 : vector<1x256xf32>
    %cst_209 = arith.constant 1.000000e+00 : f32
    %472 = vector.broadcast %cst_209 : f32 to vector<1x256xf32>
    %473 = arith.subf %472, %320 : vector<1x256xf32>
    %cst_210 = arith.constant 0.000000e+00 : f32
    %474 = vector.broadcast %cst_210 : f32 to vector<1x256xf32>
    %475 = arith.select %471, %473, %474 : vector<1x256xi1>, vector<1x256xf32>
    %cst_211 = arith.constant 9.000000e+00 : f32
    %476 = vector.broadcast %cst_211 : f32 to vector<1x256xf32>
    %477 = arith.cmpf oeq, %328, %476 : vector<1x256xf32>
    %cst_212 = arith.constant 0.000000e+00 : f32
    %478 = vector.broadcast %cst_212 : f32 to vector<1x256xf32>
    %479 = arith.select %477, %320, %478 : vector<1x256xi1>, vector<1x256xf32>
    %480 = arith.addf %475, %479 : vector<1x256xf32>
    %481 = vector.broadcast %480 : vector<1x256xf32> to vector<16x256xf32>
    %482 = arith.mulf %481, %343 : vector<16x256xf32>
    %c144_213 = arith.constant 144 : index
    %c0_214 = arith.constant 0 : index
    %483 = vector.load %arg4[%c144_213, %c0_214] : memref<256x256xf32, #tpu.memory_space<vmem>>, vector<16x256xf32>
    tpu.vector_store %arg4[%c144_213, %c0_214], %482 {strides = array<i32>} : memref<256x256xf32, #tpu.memory_space<vmem>>, vector<16x256xf32>,
    %cst_215 = arith.constant 1.000000e+01 : f32
    %484 = vector.broadcast %cst_215 : f32 to vector<1x256xf32>
    %485 = arith.cmpf oeq, %318, %484 : vector<1x256xf32>
    %cst_216 = arith.constant 1.000000e+00 : f32
    %486 = vector.broadcast %cst_216 : f32 to vector<1x256xf32>
    %487 = arith.subf %486, %320 : vector<1x256xf32>
    %cst_217 = arith.constant 0.000000e+00 : f32
    %488 = vector.broadcast %cst_217 : f32 to vector<1x256xf32>
    %489 = arith.select %485, %487, %488 : vector<1x256xi1>, vector<1x256xf32>
    %cst_218 = arith.constant 1.000000e+01 : f32
    %490 = vector.broadcast %cst_218 : f32 to vector<1x256xf32>
    %491 = arith.cmpf oeq, %328, %490 : vector<1x256xf32>
    %cst_219 = arith.constant 0.000000e+00 : f32
    %492 = vector.broadcast %cst_219 : f32 to vector<1x256xf32>
    %493 = arith.select %491, %320, %492 : vector<1x256xi1>, vector<1x256xf32>
    %494 = arith.addf %489, %493 : vector<1x256xf32>
    %495 = vector.broadcast %494 : vector<1x256xf32> to vector<16x256xf32>
    %496 = arith.mulf %495, %343 : vector<16x256xf32>
    %c160_220 = arith.constant 160 : index
    %c0_221 = arith.constant 0 : index
    %497 = vector.load %arg4[%c160_220, %c0_221] : memref<256x256xf32, #tpu.memory_space<vmem>>, vector<16x256xf32>
    tpu.vector_store %arg4[%c160_220, %c0_221], %496 {strides = array<i32>} : memref<256x256xf32, #tpu.memory_space<vmem>>, vector<16x256xf32>,
    %cst_222 = arith.constant 1.100000e+01 : f32
    %498 = vector.broadcast %cst_222 : f32 to vector<1x256xf32>
    %499 = arith.cmpf oeq, %318, %498 : vector<1x256xf32>
    %cst_223 = arith.constant 1.000000e+00 : f32
    %500 = vector.broadcast %cst_223 : f32 to vector<1x256xf32>
    %501 = arith.subf %500, %320 : vector<1x256xf32>
    %cst_224 = arith.constant 0.000000e+00 : f32
    %502 = vector.broadcast %cst_224 : f32 to vector<1x256xf32>
    %503 = arith.select %499, %501, %502 : vector<1x256xi1>, vector<1x256xf32>
    %cst_225 = arith.constant 1.100000e+01 : f32
    %504 = vector.broadcast %cst_225 : f32 to vector<1x256xf32>
    %505 = arith.cmpf oeq, %328, %504 : vector<1x256xf32>
    %cst_226 = arith.constant 0.000000e+00 : f32
    %506 = vector.broadcast %cst_226 : f32 to vector<1x256xf32>
    %507 = arith.select %505, %320, %506 : vector<1x256xi1>, vector<1x256xf32>
    %508 = arith.addf %503, %507 : vector<1x256xf32>
    %509 = vector.broadcast %508 : vector<1x256xf32> to vector<16x256xf32>
    %510 = arith.mulf %509, %343 : vector<16x256xf32>
    %c176_227 = arith.constant 176 : index
    %c0_228 = arith.constant 0 : index
    %511 = vector.load %arg4[%c176_227, %c0_228] : memref<256x256xf32, #tpu.memory_space<vmem>>, vector<16x256xf32>
    tpu.vector_store %arg4[%c176_227, %c0_228], %510 {strides = array<i32>} : memref<256x256xf32, #tpu.memory_space<vmem>>, vector<16x256xf32>,
    %cst_229 = arith.constant 1.200000e+01 : f32
    %512 = vector.broadcast %cst_229 : f32 to vector<1x256xf32>
    %513 = arith.cmpf oeq, %318, %512 : vector<1x256xf32>
    %cst_230 = arith.constant 1.000000e+00 : f32
    %514 = vector.broadcast %cst_230 : f32 to vector<1x256xf32>
    %515 = arith.subf %514, %320 : vector<1x256xf32>
    %cst_231 = arith.constant 0.000000e+00 : f32
    %516 = vector.broadcast %cst_231 : f32 to vector<1x256xf32>
    %517 = arith.select %513, %515, %516 : vector<1x256xi1>, vector<1x256xf32>
    %cst_232 = arith.constant 1.200000e+01 : f32
    %518 = vector.broadcast %cst_232 : f32 to vector<1x256xf32>
    %519 = arith.cmpf oeq, %328, %518 : vector<1x256xf32>
    %cst_233 = arith.constant 0.000000e+00 : f32
    %520 = vector.broadcast %cst_233 : f32 to vector<1x256xf32>
    %521 = arith.select %519, %320, %520 : vector<1x256xi1>, vector<1x256xf32>
    %522 = arith.addf %517, %521 : vector<1x256xf32>
    %523 = vector.broadcast %522 : vector<1x256xf32> to vector<16x256xf32>
    %524 = arith.mulf %523, %343 : vector<16x256xf32>
    %c192_234 = arith.constant 192 : index
    %c0_235 = arith.constant 0 : index
    %525 = vector.load %arg4[%c192_234, %c0_235] : memref<256x256xf32, #tpu.memory_space<vmem>>, vector<16x256xf32>
    tpu.vector_store %arg4[%c192_234, %c0_235], %524 {strides = array<i32>} : memref<256x256xf32, #tpu.memory_space<vmem>>, vector<16x256xf32>,
    %cst_236 = arith.constant 1.300000e+01 : f32
    %526 = vector.broadcast %cst_236 : f32 to vector<1x256xf32>
    %527 = arith.cmpf oeq, %318, %526 : vector<1x256xf32>
    %cst_237 = arith.constant 1.000000e+00 : f32
    %528 = vector.broadcast %cst_237 : f32 to vector<1x256xf32>
    %529 = arith.subf %528, %320 : vector<1x256xf32>
    %cst_238 = arith.constant 0.000000e+00 : f32
    %530 = vector.broadcast %cst_238 : f32 to vector<1x256xf32>
    %531 = arith.select %527, %529, %530 : vector<1x256xi1>, vector<1x256xf32>
    %cst_239 = arith.constant 1.300000e+01 : f32
    %532 = vector.broadcast %cst_239 : f32 to vector<1x256xf32>
    %533 = arith.cmpf oeq, %328, %532 : vector<1x256xf32>
    %cst_240 = arith.constant 0.000000e+00 : f32
    %534 = vector.broadcast %cst_240 : f32 to vector<1x256xf32>
    %535 = arith.select %533, %320, %534 : vector<1x256xi1>, vector<1x256xf32>
    %536 = arith.addf %531, %535 : vector<1x256xf32>
    %537 = vector.broadcast %536 : vector<1x256xf32> to vector<16x256xf32>
    %538 = arith.mulf %537, %343 : vector<16x256xf32>
    %c208_241 = arith.constant 208 : index
    %c0_242 = arith.constant 0 : index
    %539 = vector.load %arg4[%c208_241, %c0_242] : memref<256x256xf32, #tpu.memory_space<vmem>>, vector<16x256xf32>
    tpu.vector_store %arg4[%c208_241, %c0_242], %538 {strides = array<i32>} : memref<256x256xf32, #tpu.memory_space<vmem>>, vector<16x256xf32>,
    %cst_243 = arith.constant 1.400000e+01 : f32
    %540 = vector.broadcast %cst_243 : f32 to vector<1x256xf32>
    %541 = arith.cmpf oeq, %318, %540 : vector<1x256xf32>
    %cst_244 = arith.constant 1.000000e+00 : f32
    %542 = vector.broadcast %cst_244 : f32 to vector<1x256xf32>
    %543 = arith.subf %542, %320 : vector<1x256xf32>
    %cst_245 = arith.constant 0.000000e+00 : f32
    %544 = vector.broadcast %cst_245 : f32 to vector<1x256xf32>
    %545 = arith.select %541, %543, %544 : vector<1x256xi1>, vector<1x256xf32>
    %cst_246 = arith.constant 1.400000e+01 : f32
    %546 = vector.broadcast %cst_246 : f32 to vector<1x256xf32>
    %547 = arith.cmpf oeq, %328, %546 : vector<1x256xf32>
    %cst_247 = arith.constant 0.000000e+00 : f32
    %548 = vector.broadcast %cst_247 : f32 to vector<1x256xf32>
    %549 = arith.select %547, %320, %548 : vector<1x256xi1>, vector<1x256xf32>
    %550 = arith.addf %545, %549 : vector<1x256xf32>
    %551 = vector.broadcast %550 : vector<1x256xf32> to vector<16x256xf32>
    %552 = arith.mulf %551, %343 : vector<16x256xf32>
    %c224_248 = arith.constant 224 : index
    %c0_249 = arith.constant 0 : index
    %553 = vector.load %arg4[%c224_248, %c0_249] : memref<256x256xf32, #tpu.memory_space<vmem>>, vector<16x256xf32>
    tpu.vector_store %arg4[%c224_248, %c0_249], %552 {strides = array<i32>} : memref<256x256xf32, #tpu.memory_space<vmem>>, vector<16x256xf32>,
    %cst_250 = arith.constant 1.500000e+01 : f32
    %554 = vector.broadcast %cst_250 : f32 to vector<1x256xf32>
    %555 = arith.cmpf oeq, %318, %554 : vector<1x256xf32>
    %cst_251 = arith.constant 1.000000e+00 : f32
    %556 = vector.broadcast %cst_251 : f32 to vector<1x256xf32>
    %557 = arith.subf %556, %320 : vector<1x256xf32>
    %cst_252 = arith.constant 0.000000e+00 : f32
    %558 = vector.broadcast %cst_252 : f32 to vector<1x256xf32>
    %559 = arith.select %555, %557, %558 : vector<1x256xi1>, vector<1x256xf32>
    %cst_253 = arith.constant 1.500000e+01 : f32
    %560 = vector.broadcast %cst_253 : f32 to vector<1x256xf32>
    %561 = arith.cmpf oeq, %328, %560 : vector<1x256xf32>
    %cst_254 = arith.constant 0.000000e+00 : f32
    %562 = vector.broadcast %cst_254 : f32 to vector<1x256xf32>
    %563 = arith.select %561, %320, %562 : vector<1x256xi1>, vector<1x256xf32>
    %564 = arith.addf %559, %563 : vector<1x256xf32>
    %565 = vector.broadcast %564 : vector<1x256xf32> to vector<16x256xf32>
    %566 = arith.mulf %565, %343 : vector<16x256xf32>
    %c240_255 = arith.constant 240 : index
    %c0_256 = arith.constant 0 : index
    %567 = vector.load %arg4[%c240_255, %c0_256] : memref<256x256xf32, #tpu.memory_space<vmem>>, vector<16x256xf32>
    tpu.vector_store %arg4[%c240_255, %c0_256], %566 {strides = array<i32>} : memref<256x256xf32, #tpu.memory_space<vmem>>, vector<16x256xf32>,
    %c1_257 = arith.constant 1 : index
    %c0_258 = arith.constant 0 : index
    %c0_259 = arith.constant 0 : index
    %568 = vector.load %arg1[%c1_257, %c0_258, %c0_259] : memref<2x4x256xf32, #tpu.memory_space<vmem>>, vector<1x4x256xf32>
    %569 = vector.shape_cast %568 : vector<1x4x256xf32> to vector<4x256xf32>
    %c0_260 = arith.constant 0 : index
    %c0_261 = arith.constant 0 : index
    %570 = vector.load %arg4[%c0_260, %c0_261] : memref<256x256xf32, #tpu.memory_space<vmem>>, vector<256x256xf32>
    %cst_262 = arith.constant dense<0.000000e+00> : vector<4x256xf32>
    %571 = tpu.matmul %569, %570, %cst_262 {dimension_numbers = #tpu.dot_dimension_numbers<[1], [0], [0], [1], [0, 0, 1, 1], [], []>} : vector<4x256xf32>, vector<256x256xf32>, vector<4x256xf32> -> vector<4x256xf32>
    %cst_263 = arith.constant dense<0.000000e+00> : vector<4x256xf32>
    %572 = tpu.matmul %571, %570, %cst_263 {dimension_numbers = #tpu.dot_dimension_numbers<[1], [0], [0], [1], [0, 0, 1, 1], [], []>} : vector<4x256xf32>, vector<256x256xf32>, vector<4x256xf32> -> vector<4x256xf32>
    %cst_264 = arith.constant dense<0.000000e+00> : vector<4x256xf32>
    %573 = tpu.matmul %572, %570, %cst_264 {dimension_numbers = #tpu.dot_dimension_numbers<[1], [0], [0], [1], [0, 0, 1, 1], [], []>} : vector<4x256xf32>, vector<256x256xf32>, vector<4x256xf32> -> vector<4x256xf32>
    %cst_265 = arith.constant dense<0.000000e+00> : vector<4x256xf32>
    %574 = tpu.matmul %573, %570, %cst_265 {dimension_numbers = #tpu.dot_dimension_numbers<[1], [0], [0], [1], [0, 0, 1, 1], [], []>} : vector<4x256xf32>, vector<256x256xf32>, vector<4x256xf32> -> vector<4x256xf32>
    %c1_266 = arith.constant 1 : index
    %c0_267 = arith.constant 0 : index
    %c0_268 = arith.constant 0 : index
    %575 = vector.load %arg3[%c1_266, %c0_267, %c0_268] : memref<2x4x256xf32, #tpu.memory_space<vmem>>, vector<1x4x256xf32>
    %576 = vector.shape_cast %575 : vector<1x4x256xf32> to vector<4x256xf32>
    %577 = vector.shape_cast %574 : vector<4x256xf32> to vector<1x4x256xf32>
    tpu.vector_store %arg3[%c1_266, %c0_267, %c0_268], %577 {strides = array<i32>} : memref<2x4x256xf32, #tpu.memory_space<vmem>>, vector<1x4x256xf32>,
    return
  }
  func.func @transform_0(%arg0: i32) -> (i32, i32, i32) {
    %c0_i32 = arith.constant 0 : i32
    %c0_i32_0 = arith.constant 0 : i32
    %c0_i32_1 = arith.constant 0 : i32
    %c0_i32_2 = arith.constant 0 : i32
    return %c0_i32, %c0_i32_0, %c0_i32_1 : i32, i32, i32
  }
  func.func @transform_1(%arg0: i32) -> (i32, i32, i32) {
    %c0_i32 = arith.constant 0 : i32
    %c0_i32_0 = arith.constant 0 : i32
    %c0_i32_1 = arith.constant 0 : i32
    %c0_i32_2 = arith.constant 0 : i32
    return %c0_i32, %c0_i32_0, %c0_i32_1 : i32, i32, i32
  }
  func.func @transform_2(%arg0: i32) -> (i32, i32, i32) {
    %c0_i32 = arith.constant 0 : i32
    %c0_i32_0 = arith.constant 0 : i32
    %c0_i32_1 = arith.constant 0 : i32
    %c0_i32_2 = arith.constant 0 : i32
    return %c0_i32, %c0_i32_0, %c0_i32_1 : i32, i32, i32
  }
}

</mosaic_0001>

<bundles_post_ra>
// kernel: tpu_custom_call.1
= control target key start
LH: loop header
LB: loop body
LE: loop exit
PB: predicated region body
PF: predicated region fallthrough
CT: control target
= control target key end

     0   :  { %7 = vsyncpa [#allocation4], 0  ;;  %s3112_s0 = inlined_call_operand.hbm [shape: f32[2,4,256], index: 0, kind: input, shape index: {}]   ;;  %s3113_s1 = inlined_call_operand.hbm [shape: f32[2,2,256], index: 1, kind: input, shape index: {}]   ;;  %s3114_s2 = inlined_call_operand.hbm [shape: f32[2,4,256], index: 2, kind: output, shape index: {}]  }
   0x1   :  { %8 = vsyncpa [#allocation7], 0 }
   0x2   :  { %9 = vsyncpa [#allocation5], 0  ;;  %s14_s11 = sshll.u32 %s3112_s0, 4  ;;  %s1749_s12 = smov [#allocation3]   ;;  %s15_s11 = int_to_ptr.hbm [resolvable:$true] %s14_s11 }
   0x3   :  { %s16_s13 = sshll.u32 %s1749_s12, 4  ;;  %s27_s16 = sshll.u32 %s3113_s1, 4  ;;  %s17_s13 = int_to_ptr.vmem [resolvable:$true] %s16_s13  ;;  %s28_s16 = int_to_ptr.hbm [resolvable:$true] %s27_s16 }
   0x4   :  { %s1750_s17 = smov 128   ;;  %s1751_s18 = smov 8  }
   0x5   :  { %22 = dma.hbm_to_vmem [thread:$0]  %s15_s11, 256, %s17_s13, [#allocation4], %s1750_s17, %s1750_s17, %s1751_s18  }
   0x6   :  { %s1752_s19 = smov [#allocation6]   ;;  %s1753_s21 = smov 64  }
   0x7   :  { %s29_s20 = sshll.u32 %s1752_s19, 4  ;;  %s1754_s0 = smov 4   ;;  %s30_s20 = int_to_ptr.vmem [resolvable:$true] %s29_s20 }
   0x8   :  { %35 = dma.hbm_to_vmem [thread:$0]  %s28_s16, 128, %s30_s20, [#allocation7], %s1753_s21, %s1753_s21, %s1754_s0  }
   0x9   :  { %1743 = dma.done.wait [#allocation4], 256  }
   0xa   :  { %1744 = vsyncadd [#allocation4], 4294967040 }
   0xb   :  { %1745 = dma.done.wait [#allocation7], 128  }
   0xc   :  { %1746 = vsyncadd [#allocation7], 4294967168  ;;  %v44_v0 = vlaneseq  ;;  %v64_v6 = vld [vmem:[#allocation6] sm:$0xf]  ;;  %s1755_s1 = smov [#allocation8]   ;;  %s1650_s25 = sshll.u32 %s3114_s2, 4  ;;  %s1651_s25 = int_to_ptr.hbm [resolvable:$true] %s1650_s25 }
   0xd   :  { %v65_v8 = vmul.f32 2.0, %v64_v6  ;;  %s1648_s22 = sshll.u32 %s1755_s1, 4  ;;  %s1649_s22 = int_to_ptr.vmem [resolvable:$true] %s1648_s22 }
   0xe   :  { %v45_v1 = vand.u32 127, %v44_v0  ;;  %v60_v15 = vshrl.u32 %v44_v0, 7 }
   0xf   :  { %v68_v11 = vperm.slane %v65_v8, 3  ;;  %v67_v13 = vperm.slane %v65_v8, 1  ;;  %v73_v17 = vperm.slane %v65_v8, 0  ;;  %v74_v21 = vperm.slane %v65_v8, 2 }
  0x10   :  { %v46_v2 = vadd.s32 128, %v45_v1  ;;  %v47_v3 = vcvt.s32.f32 %v45_v1  ;;  %v61_v25 = vadd.s32 8, %v60_v15  ;;  %v1798_v37 = vcvt.s32.f32 %v60_v15 }
  0x12   :  { %v48_v4 = vcvt.s32.f32 %v46_v2  ;;  %v49_v5 = vadd.f32 0.5, %v47_v3  ;;  %v1796_v33 = vcvt.s32.f32 %v61_v25  ;;  %3193 = vst [vmem:[#allocation17_spill] sm:$0xff] %v1798_v37 }
  0x14   :  { %v50_v7 = vadd.f32 0.5, %v48_v4  ;;  %v51_v9 = vmul.f32 0.0625, %v49_v5  ;;  %3192 = vst [vmem:[#allocation16_spill] sm:$0xff] %v1796_v33 }
  0x16   :  { %v52_v10 = vmul.f32 0.0625, %v50_v7  ;;  %v1780_v12 = vfloor.f32 %v51_v9 }
  0x18   :  { %3188 = vst [vmem:[#allocation12_spill] sm:$0xff] %v1780_v12  ;;  %v1782_v14 = vfloor.f32 %v52_v10  ;;  %v55_v16 = vmul.f32 16.0, %v1780_v12  ;;  %v71_v18 = vadd.f32 %v67_v13, %v1780_v12 }
  0x1a   :  { %3189 = vst [vmem:[#allocation13_spill] sm:$0xff] %v1782_v14  ;;  %v56_v19 = vmul.f32 16.0, %v1782_v14  ;;  %v72_v20 = vadd.f32 %v68_v11, %v1782_v14  ;;  %v1788_v22 = vsub.f32 %v47_v3, %v55_v16  ;;  %v79_v23 = vmax.f32 %v71_v18, 0.0 }
  0x1c   :  { %3190 = vst [vmem:[#allocation14_spill] sm:$0xff] %v1788_v22  ;;  %v1790_v24 = vsub.f32 %v48_v4, %v56_v19  ;;  %v80_v26 = vmax.f32 %v72_v20, 0.0  ;;  %v77_v27 = vadd.f32 %v73_v17, %v1788_v22  ;;  %v81_v28 = vmin.f32 %v79_v23, 15.0 }
  0x1e   :  { %3191 = vst [vmem:[#allocation15_spill] sm:$0xff] %v1790_v24  ;;  %v78_v29 = vadd.f32 %v74_v21, %v1790_v24  ;;  %v82_v30 = vmin.f32 %v80_v26, 15.0  ;;  %v83_v31 = vmax.f32 %v77_v27, 0.0  ;;  %v1794_v32 = vfloor.f32 %v81_v28 }
  0x20   :  { %v84_v34 = vmax.f32 %v78_v29, 0.0  ;;  %v88_v35 = vfloor.f32 %v82_v30  ;;  %v85_v36 = vmin.f32 %v83_v31, 15.0  ;;  %v1801_v38 = vsub.f32 %v81_v28, %v1794_v32 }
  0x21   :  { %v95_v39 = vadd.f32 1.0, %v1794_v32  ;;  %v103_v40 = vperm.slane %v1794_v32, 0 }
  0x22   :  { %v86_v41 = vmin.f32 %v84_v34, 15.0  ;;  %v92_v42 = vsub.f32 %v82_v30, %v88_v35  ;;  %v96_v43 = vadd.f32 1.0, %v88_v35  ;;  %v104_v44 = vperm.slane %v88_v35, 0 }
  0x23   :  { %v1805_v45 = vfloor.f32 %v85_v36  ;;  %v97_v46 = vmin.f32 %v95_v39, 15.0  ;;  %v109_v47 = vsub.f32 1.0, %v1801_v38  ;;  %vm1827_vm2 = vcmp.eq.f32.partialorder %v1796_v33, %v103_v40 }
  0x24   :  { %v1808_v48 = vfloor.f32 %v86_v41  ;;  %v98_v49 = vmin.f32 %v96_v43, 15.0  ;;  %vm1811_vm0 = vcmp.eq.f32.partialorder %v1796_v33, %v104_v44  ;;  %v110_v51 = vsub.f32 1.0, %v92_v42 }
  0x25   :  { %v124_v52 = vperm.slane %v92_v42, 0  ;;  %vm1816_vm1 = vcmp.eq.f32.partialorder %v1798_v37, %v104_v44  ;;  %v1821_v54 = vsub.f32 %v85_v36, %v1805_v45  ;;  %v99_v55 = vadd.f32 1.0, %v1805_v45 }
  0x26   :  { %v1832_v57 = vsub.f32 %v86_v41, %v1808_v48  ;;  %v100_v58 = vadd.f32 1.0, %v1808_v48  ;;  %v112_v59 = vperm.slane %v110_v51, 0  ;;  %v118_v60 = vperm.slane %v98_v49, 0 }
  0x27   :  { %vm276_vm3 = vcmp.eq.f32.partialorder %v1808_v48, 7.0  ;;  %vm436_vm4 = vcmp.eq.f32.partialorder %v1808_v48, 15.0  ;;  %vm256_vm5 = vcmp.eq.f32.partialorder %v1808_v48, 6.0  ;;  %vm416_vm6 = vcmp.eq.f32.partialorder %v1808_v48, 14.0 }
  0x28   :  { %v1839_v61 = vmin.f32 %v100_v58, 15.0  ;;  %v116_v62 = vsel %vm1811_vm0, %v112_v59, 0.0  ;;  %vm122_vm7 = vcmp.eq.f32.partialorder %v1796_v33, %v118_v60  ;;  %v1845_v63 = vsub.f32 1.0, %v1832_v57 }
  0x29   :  { %v128_v0 = vsel %vm122_vm7, %v124_v52, 0.0  ;;  %v114_v1 = vsel %vm1816_vm1, %v112_v59, 0.0  ;;  %vm120_vm8 = vcmp.eq.f32.partialorder %v1798_v37, %v118_v60  ;;  %v1850_v2 = vmin.f32 %v99_v55, 15.0 }
  0x2a   :  { %v1852_v3 = vadd.f32 %v128_v0, %v116_v62  ;;  %v278_v4 = vsel %vm276_vm3, %v1845_v63, 0.0  ;;  %vm280_vm9 = vcmp.eq.f32.partialorder %v1839_v61, 7.0  ;;  %v438_v5 = vsel %vm436_vm4, %v1845_v63, 0.0 }
  0x2b   :  { %v282_v6 = vsel %vm280_vm9, %v1832_v57, 0.0  ;;  %vm440_vm10 = vcmp.eq.f32.partialorder %v1839_v61, 15.0  ;;  %v126_v7 = vsel %vm120_vm8, %v124_v52, 0.0  ;;  %v258_v8 = vsel %vm256_vm5, %v1845_v63, 0.0 }
  0x2c   :  { %v284_v9 = vadd.f32 %v282_v6, %v278_v4  ;;  %v442_v10 = vsel %vm440_vm10, %v1832_v57, 0.0  ;;  %v1863_v11 = vadd.f32 %v126_v7, %v114_v1  ;;  %vm260_vm11 = vcmp.eq.f32.partialorder %v1839_v61, 6.0 }
  0x2d   :  { %v444_v13 = vadd.f32 %v442_v10, %v438_v5  ;;  %v262_v15 = vsel %vm260_vm11, %v1832_v57, 0.0  ;;  %v418_v16 = vsel %vm416_vm6, %v1845_v63, 0.0  ;;  %vm420_vm12 = vcmp.eq.f32.partialorder %v1839_v61, 14.0 }
  0x2e   :  { %v286_v17 = vperm.slane %v284_v9, 0  ;;  %v264_v18 = vadd.f32 %v262_v15, %v258_v8  ;;  %v422_v19 = vsel %vm420_vm12, %v1832_v57, 0.0  ;;  %v111_v20 = vperm.slane %v109_v47, 0 }
  0x2f   :  { %v446_v21 = vperm.slane %v444_v13, 0  ;;  %v424_v23 = vadd.f32 %v422_v19, %v418_v16  ;;  %v117_v25 = vperm.slane %v97_v46, 0  ;;  %v123_v26 = vperm.slane %v1801_v38, 0 }
  0x30   :  { %v1874_v27 = vmul.f32 %v286_v17, %v1852_v3  ;;  %v1877_v28 = vmul.f32 %v286_v17, %v1863_v11  ;;  %v266_v29 = vperm.slane %v264_v18, 0  ;;  %v115_v30 = vsel %vm1827_vm2, %v111_v20, 0.0 }
  0x31   :  { %v1882_v31 = vmul.f32 %v446_v21, %v1852_v3  ;;  %v1885_v34 = vmul.f32 %v446_v21, %v1863_v11  ;;  %v426_v35 = vperm.slane %v424_v23, 0  ;;  %vm121_vm13 = vcmp.eq.f32.partialorder %v1796_v33, %v117_v25 }
  0x32   :  { %566 = vmatpush.msra.mxu2 %v1874_v27  ;;  %v1890_v36 = vmul.f32 %v266_v29, %v1852_v3  ;;  %v127_v38 = vsel %vm121_vm13, %v123_v26, 0.0  ;;  %v1893_v39 = vsub.f32 1.0, %v1821_v54  ;;  %vm275_vm14 = vcmp.eq.f32.partialorder %v1805_v45, 7.0 }
  0x33   :  { %586 = vmatpush.msra.mxu3 %v1882_v31  ;;  %v1898_v41 = vmul.f32 %v426_v35, %v1852_v3  ;;  %v1900_v42 = vadd.f32 %v127_v38, %v115_v30  ;;  %vm279_vm15 = vcmp.eq.f32.partialorder %v1850_v2, 7.0  ;;  %vm435_vm0 = vcmp.eq.f32.partialorder %v1805_v45, 15.0 }
  0x34   :  { %567 = vmatpush.msra.mxu2 %v1877_v28  ;;  %v277_v43 = vsel %vm275_vm14, %v1893_v39, 0.0  ;;  %v281_v44 = vsel %vm279_vm15, %v1821_v54, 0.0  ;;  %v437_v46 = vsel %vm435_vm0, %v1893_v39, 0.0  ;;  %vm439_vm1 = vcmp.eq.f32.partialorder %v1850_v2, 15.0 }
  0x35   :  { %587 = vmatpush.msra.mxu3 %v1885_v34  ;;  %v283_v47 = vadd.f32 %v281_v44, %v277_v43  ;;  %v441_v49 = vsel %vm439_vm1, %v1821_v54, 0.0  ;;  %v1912_v50 = vmul.f32 %v266_v29, %v1863_v11  ;;  %v1915_v51 = vmul.f32 %v426_v35, %v1863_v11 }
  0x36   :  { %568 = vmatpush.msra.mxu2 %v1890_v36  ;;  %v443_v52 = vadd.f32 %v441_v49, %v437_v46  ;;  %vm105_vm2 = vcmp.eq.f32.partialorder %v1798_v37, %v103_v40  ;;  %vm119_vm3 = vcmp.eq.f32.partialorder %v1798_v37, %v117_v25  ;;  %vm236_vm4 = vcmp.eq.f32.partialorder %v1808_v48, 5.0 }
  0x37   :  { %588 = vmatpush.msra.mxu3 %v1898_v41  ;;  %v285_v53 = vperm.slane %v283_v47, 0  ;;  %v113_v55 = vsel %vm105_vm2, %v111_v20, 0.0  ;;  %v125_v56 = vsel %vm119_vm3, %v123_v26, 0.0  ;;  %v238_v58 = vsel %vm236_vm4, %v1845_v63, 0.0 }
  0x38   :  { %v445_v59 = vperm.slane %v443_v52, 0  ;;  %569 = vmatpush.msra.mxu2 %v1912_v50  ;;  %v1926_v60 = vadd.f32 %v125_v56, %v113_v55  ;;  %vm240_vm5 = vcmp.eq.f32.partialorder %v1839_v61, 5.0  ;;  %vm396_vm6 = vcmp.eq.f32.partialorder %v1808_v48, 13.0 }
  0x39   :  { %v1931_v32 = vmul.f32 %v285_v53, %v1900_v42  ;;  %589 = vmatpush.msra.mxu3 %v1915_v51  ;;  %v242_v40 = vsel %vm240_vm5, %v1832_v57, 0.0  ;;  %v398_v62 = vsel %vm396_vm6, %v1845_v63, 0.0  ;;  %vm400_vm7 = vcmp.eq.f32.partialorder %v1839_v61, 13.0 }
  0x3a   :  { %v1938_v0 = vmul.f32 %v445_v59, %v1900_v42  ;;  %v1941_v1 = vmul.f32 %v285_v53, %v1926_v60  ;;  %v1944_v4 = vmul.f32 %v445_v59, %v1926_v60  ;;  %v244_v5 = vadd.f32 %v242_v40, %v238_v58 }
  0x3b   :  { %526 = vmatpush.msra.mxu0 %v1931_v32  ;;  %v402_v6 = vsel %vm400_vm7, %v1832_v57, 0.0  ;;  %vm255_vm8 = vcmp.eq.f32.partialorder %v1805_v45, 6.0  ;;  %vm259_vm9 = vcmp.eq.f32.partialorder %v1850_v2, 6.0  ;;  %vm415_vm10 = vcmp.eq.f32.partialorder %v1805_v45, 14.0 }
  0x3c   :  { %546 = vmatpush.msra.mxu1 %v1938_v0  ;;  %v246_v7 = vperm.slane %v244_v5, 0  ;;  %v404_v8 = vadd.f32 %v402_v6, %v398_v62  ;;  %v257_v9 = vsel %vm255_vm8, %v1893_v39, 0.0  ;;  %v261_v10 = vsel %vm259_vm9, %v1821_v54, 0.0  ;;  %v455_v62 = vld [vmem:[#allocation3] sm:$0xff] }
  0x3d   :  { %527 = vmatpush.msra.mxu0 %v1941_v1  ;;  %v263_v13 = vadd.f32 %v261_v10, %v257_v9  ;;  %v417_v15 = vsel %vm415_vm10, %v1893_v39, 0.0  ;;  %vm419_vm11 = vcmp.eq.f32.partialorder %v1850_v2, 14.0  ;;  %vm216_vm12 = vcmp.eq.f32.partialorder %v1808_v48, 4.0  ;;  %521 = vst [vmem:[#allocation1] ss:$2 sm:$0xff] %v455_v62 }
  0x3e   :  { %547 = vmatpush.msra.mxu1 %v1944_v4  ;;  %v1960_v16 = vmul.f32 %v246_v7, %v1852_v3  ;;  %v406_v17 = vperm.slane %v404_v8, 0  ;;  %v421_v18 = vsel %vm419_vm11, %v1821_v54, 0.0  ;;  %v1964_v19 = vmul.f32 %v246_v7, %v1863_v11 }
  0x3f   :  { %v265_v20 = vperm.slane %v263_v13, 0  ;;  %v423_v21 = vadd.f32 %v421_v18, %v417_v15  ;;  %v218_v23 = vsel %vm216_vm12, %v1845_v63, 0.0  ;;  %vm220_vm13 = vcmp.eq.f32.partialorder %v1839_v61, 4.0 }
  0x40   :  { %570 = vmatpush.msra.mxu2 %v1960_v16  ;;  %v1970_v25 = vmul.f32 %v406_v17, %v1852_v3  ;;  %v1973_v26 = vmul.f32 %v406_v17, %v1863_v11  ;;  %v222_v29 = vsel %vm220_vm13, %v1832_v57, 0.0  ;;  %vm376_vm14 = vcmp.eq.f32.partialorder %v1808_v48, 12.0 }
  0x41   :  { %v1978_v30 = vmul.f32 %v265_v20, %v1900_v42  ;;  %v425_v35 = vperm.slane %v423_v21, 0  ;;  %v1981_v38 = vmul.f32 %v265_v20, %v1926_v60  ;;  %v224_v43 = vadd.f32 %v222_v29, %v218_v23 }
  0x42   :  { %590 = vmatpush.msra.mxu3 %v1970_v25  ;;  %571 = vmatpush.msra.mxu2 %v1964_v19  ;;  %v378_v44 = vsel %vm376_vm14, %v1845_v63, 0.0  ;;  %vm380_vm15 = vcmp.eq.f32.partialorder %v1839_v61, 12.0  ;;  %vm235_vm0 = vcmp.eq.f32.partialorder %v1805_v45, 5.0  ;;  %vm239_vm1 = vcmp.eq.f32.partialorder %v1850_v2, 5.0 }
  0x43   :  { %528 = vmatpush.msra.mxu0 %v1978_v30  ;;  %v1991_v46 = vmul.f32 %v425_v35, %v1900_v42  ;;  %v1994_v47 = vmul.f32 %v425_v35, %v1926_v60  ;;  %v226_v49 = vperm.slane %v224_v43, 0  ;;  %v382_v52 = vsel %vm380_vm15, %v1832_v57, 0.0 }
  0x44   :  { %591 = vmatpush.msra.mxu3 %v1973_v26  ;;  %v384_v53 = vadd.f32 %v382_v52, %v378_v44  ;;  %v237_v55 = vsel %vm235_vm0, %v1893_v39, 0.0  ;;  %v241_v56 = vsel %vm239_vm1, %v1821_v54, 0.0  ;;  %vm395_vm2 = vcmp.eq.f32.partialorder %v1805_v45, 13.0  ;;  %v2056_v62 = vld.sshfl [vmem:[#allocation1] sm:$0xff pattern:$0x75316420] }
  0x45   :  { %548 = vmatpush.msra.mxu1 %v1991_v46  ;;  %529 = vmatpush.msra.mxu0 %v1981_v38  ;;  %v2004_v58 = vmul.f32 %v226_v49, %v1852_v3  ;;  %v243_v59 = vadd.f32 %v241_v56, %v237_v55  ;;  %v397_v40 = vsel %vm395_vm2, %v1893_v39, 0.0  ;;  %vm399_vm3 = vcmp.eq.f32.partialorder %v1850_v2, 13.0 }
  0x46   :  { %v386_v5 = vperm.slane %v384_v53, 0  ;;  %v401_v6 = vsel %vm399_vm3, %v1821_v54, 0.0  ;;  %v2010_v7 = vmul.f32 %v226_v49, %v1863_v11  ;;  %vm196_vm4 = vcmp.eq.f32.partialorder %v1808_v48, 3.0 }
  0x47   :  { %549 = vmatpush.msra.mxu1 %v1994_v47  ;;  %572 = vmatpush.msra.mxu2 %v2004_v58  ;;  %v245_v8 = vperm.slane %v243_v59, 0  ;;  %v403_v9 = vadd.f32 %v401_v6, %v397_v40  ;;  %v198_v10 = vsel %vm196_vm4, %v1845_v63, 0.0  ;;  %vm200_vm5 = vcmp.eq.f32.partialorder %v1839_v61, 3.0 }
  0x48   :  { %v2018_v13 = vmul.f32 %v386_v5, %v1852_v3  ;;  %v2021_v15 = vmul.f32 %v386_v5, %v1863_v11  ;;  %v202_v17 = vsel %vm200_vm5, %v1832_v57, 0.0  ;;  %vm356_vm6 = vcmp.eq.f32.partialorder %v1808_v48, 11.0  ;;  %v1246_v5 = vld [vmem:[#allocation3 + $0x8] sm:$0xff] }
  0x49   :  { %v2026_v18 = vmul.f32 %v245_v8, %v1900_v42  ;;  %v405_v20 = vperm.slane %v403_v9, 0  ;;  %573 = vmatpush.msra.mxu2 %v2010_v7  ;;  %v2030_v21 = vmul.f32 %v245_v8, %v1926_v60  ;;  %v204_v23 = vadd.f32 %v202_v17, %v198_v10  ;;  %v2063_v10 = vld.sshfl [vmem:[#allocation1 + $0x8] sm:$0xff pattern:$0x75316420] }
  0x4a   :  { %592 = vmatpush.msra.mxu3 %v2018_v13  ;;  %v358_v29 = vsel %vm356_vm6, %v1845_v63, 0.0  ;;  %vm360_vm7 = vcmp.eq.f32.partialorder %v1839_v61, 11.0  ;;  %vm215_vm8 = vcmp.eq.f32.partialorder %v1805_v45, 4.0  ;;  %vm219_vm9 = vcmp.eq.f32.partialorder %v1850_v2, 4.0  ;;  %1312 = vst [vmem:[#allocation1] ss:$2 sm:$0xff] %v1246_v5 }
  0x4b   :  { %530 = vmatpush.msra.mxu0 %v2026_v18  ;;  %v2039_v35 = vmul.f32 %v405_v20, %v1900_v42  ;;  %v2042_v43 = vmul.f32 %v405_v20, %v1926_v60  ;;  %v206_v44 = vperm.slane %v204_v23, 0  ;;  %v362_v49 = vsel %vm360_vm7, %v1832_v57, 0.0 }
  0x4c   :  { %593 = vmatpush.msra.mxu3 %v2021_v15  ;;  %v364_v52 = vadd.f32 %v362_v49, %v358_v29  ;;  %v217_v53 = vsel %vm215_vm8, %v1893_v39, 0.0  ;;  %v221_v55 = vsel %vm219_vm9, %v1821_v54, 0.0  ;;  %vm375_vm10 = vcmp.eq.f32.partialorder %v1805_v45, 12.0 }
  0x4d   :  { %550 = vmatpush.msra.mxu1 %v2039_v35  ;;  %531 = vmatpush.msra.mxu0 %v2030_v21  ;;  %v2052_v56 = vmul.f32 %v206_v44, %v1852_v3  ;;  %v223_v59 = vadd.f32 %v221_v55, %v217_v53  ;;  %v377_v40 = vsel %vm375_vm10, %v1893_v39, 0.0  ;;  %vm379_vm11 = vcmp.eq.f32.partialorder %v1850_v2, 12.0 }
  0x4e   :  { %v366_v6 = vperm.slane %v364_v52, 0  ;;  %v381_v8 = vsel %vm379_vm11, %v1821_v54, 0.0  ;;  %v2060_v9 = vmul.f32 %v206_v44, %v1863_v11  ;;  %vm176_vm12 = vcmp.eq.f32.partialorder %v1808_v48, 2.0 }
  0x4f   :  { %551 = vmatpush.msra.mxu1 %v2042_v43  ;;  %574 = vmatpush.msra.mxu2 %v2052_v56  ;;  %v225_v17 = vperm.slane %v223_v59, 0  ;;  %v383_v20 = vadd.f32 %v381_v8, %v377_v40  ;;  %v178_v23 = vsel %vm176_vm12, %v1845_v63, 0.0  ;;  %vm180_vm13 = vcmp.eq.f32.partialorder %v1839_v61, 2.0 }
  0x50   :  { %v2070_v29 = vmul.f32 %v366_v6, %v1852_v3  ;;  %v2073_v44 = vmul.f32 %v366_v6, %v1863_v11  ;;  %v182_v49 = vsel %vm180_vm13, %v1832_v57, 0.0  ;;  %vm336_vm14 = vcmp.eq.f32.partialorder %v1808_v48, 10.0 }
  0x51   :  { %v2078_v52 = vmul.f32 %v225_v17, %v1900_v42  ;;  %v385_v53 = vperm.slane %v383_v20, 0  ;;  %575 = vmatpush.msra.mxu2 %v2060_v9  ;;  %v2082_v55 = vmul.f32 %v225_v17, %v1926_v60  ;;  %v184_v59 = vadd.f32 %v182_v49, %v178_v23 }
  0x52   :  { %594 = vmatpush.msra.mxu3 %v2070_v29  ;;  %v338_v40 = vsel %vm336_vm14, %v1845_v63, 0.0  ;;  %vm340_vm15 = vcmp.eq.f32.partialorder %v1839_v61, 10.0  ;;  %vm195_vm0 = vcmp.eq.f32.partialorder %v1805_v45, 3.0  ;;  %vm199_vm1 = vcmp.eq.f32.partialorder %v1850_v2, 3.0 }
  0x53   :  { %532 = vmatpush.msra.mxu0 %v2078_v52  ;;  %v2091_v5 = vmul.f32 %v385_v53, %v1900_v42  ;;  %v2094_v6 = vmul.f32 %v385_v53, %v1926_v60  ;;  %v186_v8 = vperm.slane %v184_v59, 0  ;;  %v342_v17 = vsel %vm340_vm15, %v1832_v57, 0.0 }
  0x54   :  { %595 = vmatpush.msra.mxu3 %v2073_v44  ;;  %v344_v20 = vadd.f32 %v342_v17, %v338_v40  ;;  %v197_v23 = vsel %vm195_vm0, %v1893_v39, 0.0  ;;  %v201_v49 = vsel %vm199_vm1, %v1821_v54, 0.0  ;;  %vm355_vm2 = vcmp.eq.f32.partialorder %v1805_v45, 11.0 }
  0x55   :  { %552 = vmatpush.msra.mxu1 %v2091_v5  ;;  %533 = vmatpush.msra.mxu0 %v2082_v55  ;;  %v2104_v37 = vmul.f32 %v186_v8, %v1852_v3  ;;  %v203_v53 = vadd.f32 %v201_v49, %v197_v23  ;;  %v357_v59 = vsel %vm355_vm2, %v1893_v39, 0.0  ;;  %vm359_vm3 = vcmp.eq.f32.partialorder %v1850_v2, 11.0 }
  0x56   :  { %v346_v33 = vperm.slane %v344_v20, 0  ;;  %v361_v40 = vsel %vm359_vm3, %v1821_v54, 0.0  ;;  %v2110_v17 = vmul.f32 %v186_v8, %v1863_v11  ;;  %vm156_vm4 = vcmp.eq.f32.partialorder %v1808_v48, 1.0 }
  0x57   :  { %553 = vmatpush.msra.mxu1 %v2094_v6  ;;  %576 = vmatpush.msra.mxu2 %v2104_v37  ;;  %v205_v22 = vperm.slane %v203_v53, 0  ;;  %v363_v12 = vadd.f32 %v361_v40, %v357_v59  ;;  %v158_v23 = vsel %vm156_vm4, %v1845_v63, 0.0  ;;  %vm160_vm5 = vcmp.eq.f32.partialorder %v1839_v61, 1.0 }
  0x58   :  { %3200 = vst [vmem:[#allocation18_spill] sm:$0xff] %v2110_v17  ;;  %v2118_v49 = vmul.f32 %v346_v33, %v1852_v3  ;;  %v2121_v20 = vmul.f32 %v346_v33, %v1863_v11  ;;  %v162_v8 = vsel %vm160_vm5, %v1832_v57, 0.0  ;;  %vm316_vm6 = vcmp.eq.f32.partialorder %v1808_v48, 9.0 }
  0x59   :  { %v2126_v24 = vmul.f32 %v205_v22, %v1900_v42  ;;  %v365_v14 = vperm.slane %v363_v12, 0  ;;  %577 = vmatpush.msra.mxu2 %v2110_v17  ;;  %v2130_v53 = vmul.f32 %v205_v22, %v1926_v60  ;;  %v164_v59 = vadd.f32 %v162_v8, %v158_v23 }
  0x5a   :  { %3201 = vst [vmem:[#allocation19_spill] sm:$0xff] %v2118_v49  ;;  %596 = vmatpush.msra.mxu3 %v2118_v49  ;;  %v318_v40 = vsel %vm316_vm6, %v1845_v63, 0.0  ;;  %vm320_vm7 = vcmp.eq.f32.partialorder %v1839_v61, 9.0  ;;  %vm175_vm8 = vcmp.eq.f32.partialorder %v1805_v45, 2.0  ;;  %vm179_vm9 = vcmp.eq.f32.partialorder %v1850_v2, 2.0 }
  0x5b   :  { %3202 = vst [vmem:[#allocation20_spill] sm:$0xff] %v2121_v20  ;;  %534 = vmatpush.msra.mxu0 %v2126_v24  ;;  %v2139_v12 = vmul.f32 %v365_v14, %v1900_v42  ;;  %v2142_v33 = vmul.f32 %v365_v14, %v1926_v60  ;;  %v166_v22 = vperm.slane %v164_v59, 0  ;;  %v322_v23 = vsel %vm320_vm7, %v1832_v57, 0.0 }
  0x5c   :  { %3203 = vst [vmem:[#allocation21_spill] sm:$0xff] %v2126_v24  ;;  %597 = vmatpush.msra.mxu3 %v2121_v20  ;;  %v324_v8 = vadd.f32 %v322_v23, %v318_v40  ;;  %v177_v17 = vsel %vm175_vm8, %v1893_v39, 0.0  ;;  %v181_v49 = vsel %vm179_vm9, %v1821_v54, 0.0  ;;  %vm335_vm10 = vcmp.eq.f32.partialorder %v1805_v45, 10.0 }
  0x5d   :  { %3204 = vst [vmem:[#allocation22_spill] sm:$0xff] %v2130_v53  ;;  %554 = vmatpush.msra.mxu1 %v2139_v12  ;;  %535 = vmatpush.msra.mxu0 %v2130_v53  ;;  %v2152_v24 = vmul.f32 %v166_v22, %v1852_v3  ;;  %v183_v14 = vadd.f32 %v181_v49, %v177_v17  ;;  %v337_v59 = vsel %vm335_vm10, %v1893_v39, 0.0  ;;  %vm339_vm11 = vcmp.eq.f32.partialorder %v1850_v2, 10.0 }
  0x5e   :  { %3205 = vst [vmem:[#allocation23_spill] sm:$0xff] %v2139_v12  ;;  %v326_v20 = vperm.slane %v324_v8, 0  ;;  %v341_v40 = vsel %vm339_vm11, %v1821_v54, 0.0  ;;  %v2158_v23 = vmul.f32 %v166_v22, %v1863_v11  ;;  %vm134_vm12 = vcmp.eq.f32.partialorder %v1808_v48, 0.0 }
  0x5f   :  { %3206 = vst [vmem:[#allocation24_spill] sm:$0xff] %v2142_v33  ;;  %555 = vmatpush.msra.mxu1 %v2142_v33  ;;  %578 = vmatpush.msra.mxu2 %v2152_v24  ;;  %v185_v53 = vperm.slane %v183_v14, 0  ;;  %v343_v12 = vadd.f32 %v341_v40, %v337_v59  ;;  %v138_v17 = vsel %vm134_vm12, %v1845_v63, 0.0  ;;  %vm140_vm13 = vcmp.eq.f32.partialorder %v1839_v61, 0.0 }
  0x60   :  { %3207 = vst [vmem:[#allocation25_spill] sm:$0xff] %v2152_v24  ;;  %v2166_v49 = vmul.f32 %v326_v20, %v1852_v3  ;;  %v2169_v8 = vmul.f32 %v326_v20, %v1863_v11  ;;  %v142_v22 = vsel %vm140_vm13, %v1832_v57, 0.0  ;;  %vm296_vm14 = vcmp.eq.f32.partialorder %v1808_v48, 8.0 }
  0x61   :  { %3208 = vst [vmem:[#allocation26_spill] sm:$0xff] %v2158_v23  ;;  %v2174_v33 = vmul.f32 %v185_v53, %v1900_v42  ;;  %v345_v24 = vperm.slane %v343_v12, 0  ;;  %579 = vmatpush.msra.mxu2 %v2158_v23  ;;  %v2178_v14 = vmul.f32 %v185_v53, %v1926_v60  ;;  %v144_v59 = vadd.f32 %v142_v22, %v138_v17 }
  0x62   :  { %3209 = vst [vmem:[#allocation27_spill] sm:$0xff] %v2169_v8  ;;  %598 = vmatpush.msra.mxu3 %v2166_v49  ;;  %v298_v40 = vsel %vm296_vm14, %v1845_v63, 0.0  ;;  %vm300_vm15 = vcmp.eq.f32.partialorder %v1839_v61, 8.0  ;;  %vm155_vm0 = vcmp.eq.f32.partialorder %v1805_v45, 1.0  ;;  %vm159_vm1 = vcmp.eq.f32.partialorder %v1850_v2, 1.0 }
  0x63   :  { %3210 = vst [vmem:[#allocation28_spill] sm:$0xff] %v2178_v14  ;;  %536 = vmatpush.msra.mxu0 %v2174_v33  ;;  %v2187_v48 = vmul.f32 %v345_v24, %v1900_v42  ;;  %v2190_v20 = vmul.f32 %v345_v24, %v1926_v60  ;;  %v146_v53 = vperm.slane %v144_v59, 0  ;;  %v302_v12 = vsel %vm300_vm15, %v1832_v57, 0.0 }
  0x64   :  { %599 = vmatpush.msra.mxu3 %v2169_v8  ;;  %v304_v63 = vadd.f32 %v302_v12, %v298_v40  ;;  %v157_v61 = vsel %vm155_vm0, %v1893_v39, 0.0  ;;  %v161_v17 = vsel %vm159_vm1, %v1821_v54, 0.0  ;;  %vm315_vm2 = vcmp.eq.f32.partialorder %v1805_v45, 9.0 }
  0x65   :  { %3211 = vst [vmem:[#allocation29_spill] sm:$0xff] %v2190_v20  ;;  %556 = vmatpush.msra.mxu1 %v2187_v48  ;;  %537 = vmatpush.msra.mxu0 %v2178_v14  ;;  %v2200_v22 = vmul.f32 %v146_v53, %v1852_v3  ;;  %v163_v24 = vadd.f32 %v161_v17, %v157_v61  ;;  %v317_v59 = vsel %vm315_vm2, %v1893_v39, 0.0  ;;  %vm319_vm3 = vcmp.eq.f32.partialorder %v1850_v2, 9.0 }
  0x66   :  { %v306_v57 = vperm.slane %v304_v63, 0  ;;  %v321_v40 = vsel %vm319_vm3, %v1821_v54, 0.0  ;;  %v2206_v12 = vmul.f32 %v146_v53, %v1863_v11  ;;  %vm133_vm4 = vcmp.eq.f32.partialorder %v1805_v45, 0.0 }
  0x67   :  { %3212 = vst [vmem:[#allocation30_spill] sm:$0xff] %v2200_v22  ;;  %557 = vmatpush.msra.mxu1 %v2190_v20  ;;  %580 = vmatpush.msra.mxu2 %v2200_v22  ;;  %v165_v8 = vperm.slane %v163_v24, 0  ;;  %v323_v14 = vadd.f32 %v321_v40, %v317_v59  ;;  %v137_v61 = vsel %vm133_vm4, %v1893_v39, 0.0  ;;  %vm139_vm5 = vcmp.eq.f32.partialorder %v1850_v2, 0.0 }
  0x68   :  { %3213 = vst [vmem:[#allocation31_spill] sm:$0xff] %v2206_v12  ;;  %v2214_v17 = vmul.f32 %v306_v57, %v1852_v3  ;;  %v2217_v63 = vmul.f32 %v306_v57, %v1863_v11  ;;  %v141_v53 = vsel %vm139_vm5, %v1821_v54, 0.0  ;;  %vm295_vm6 = vcmp.eq.f32.partialorder %v1805_v45, 8.0 }
  0x69   :  { %v2222_v20 = vmul.f32 %v165_v8, %v1900_v42  ;;  %v325_v22 = vperm.slane %v323_v14, 0  ;;  %581 = vmatpush.msra.mxu2 %v2206_v12  ;;  %v143_v24 = vadd.f32 %v141_v53, %v137_v61  ;;  %v2228_v3 = vmul.f32 %v165_v8, %v1926_v60  ;;  %v3220_v61 = vld [vmem:[#allocation22_spill] sm:$0xff]  ;;  %v3221_v53 = vld [vmem:[#allocation20_spill] sm:$0xff] }
  0x6a   :  { %600 = vmatpush.msra.mxu3 %v2214_v17  ;;  %582 = vmatmul.f32.vlgmr.msra.gmra.mxu2 %v2056_v62  ;;  %v297_v11 = vsel %vm295_vm6, %v1893_v39, 0.0  ;;  %vm299_vm7 = vcmp.eq.f32.partialorder %v1850_v2, 8.0 }
  0x6b   :  { %3214 = vst [vmem:[#allocation32_spill] sm:$0xff] %v2222_v20  ;;  %538 = vmatpush.msra.mxu0 %v2222_v20  ;;  %v2234_v45 = vmul.f32 %v325_v22, %v1900_v42  ;;  %v2237_v14 = vmul.f32 %v325_v22, %v1926_v60  ;;  %v145_v59 = vperm.slane %v143_v24, 0  ;;  %v301_v57 = vsel %vm299_vm7, %v1821_v54, 0.0  ;;  %646 = vmatpush.msrb.mxu2 %v1874_v27  ;;  %v3222_v24 = vld [vmem:[#allocation25_spill] sm:$0xff] }
  0x6c   :  { %3215 = vst [vmem:[#allocation33_spill] sm:$0xff] %v2228_v3  ;;  %601 = vmatpush.msra.mxu3 %v2217_v63  ;;  %v303_v8 = vadd.f32 %v301_v57, %v297_v11  ;;  %v3223_v11 = vld [vmem:[#allocation24_spill] sm:$0xff]  ;;  %v3225_v57 = vld [vmem:[#allocation27_spill] sm:$0xff] }
  0x6d   :  { %558 = vmatpush.msra.mxu1 %v2234_v45  ;;  %602 = vmatmul.f32.vlgmr.msra.gmra.mxu3 %v2063_v10  ;;  %v2245_v2 = vmul.f32 %v145_v59, %v1900_v42  ;;  %v2249_v22 = vmul.f32 %v145_v59, %v1926_v60  ;;  %v3224_v59 = vld [vmem:[#allocation28_spill] sm:$0xff] }
  0x6e   :  { %539 = vmatpush.msra.mxu0 %v2228_v3  ;;  %v305_v39 = vperm.slane %v303_v8, 0  ;;  %666 = vmatpush.msrb.mxu3 %v1882_v31  ;;  %v3226_v8 = vld [vmem:[#allocation30_spill] sm:$0xff] }
  0x6f   :  { %559 = vmatpush.msra.mxu1 %v2237_v14  ;;  %647 = vmatpush.msrb.mxu2 %v1877_v28 }
  0x70   :  { %540 = vmatpush.msra.mxu0 %v2245_v2  ;;  %v2256_v54 = vmul.f32 %v305_v39, %v1900_v42  ;;  %v2259_v40 = vmul.f32 %v305_v39, %v1926_v60  ;;  %667 = vmatpush.msrb.mxu3 %v1885_v34  ;;  %v3216_v42 = vld [vmem:[#allocation21_spill] sm:$0xff]  ;;  %v3217_v60 = vld [vmem:[#allocation19_spill] sm:$0xff] }
  0x71   :  { %648 = vmatpush.msrb.mxu2 %v1890_v36  ;;  %v3227_v39 = vld [vmem:[#allocation29_spill] sm:$0xff] }
  0x72   :  { %560 = vmatpush.msra.mxu1 %v2256_v54  ;;  %541 = vmatpush.msra.mxu0 %v2249_v22 }
  0x73   :  { %542 = vmatmul.f32.vlgmr.msra.gmra.mxu0 %v2056_v62  ;;  %668 = vmatpush.msrb.mxu3 %v1898_v41  ;;  %v3218_v62 = vld [vmem:[#allocation18_spill] sm:$0xff] }
  0x74   :  { %561 = vmatpush.msra.mxu1 %v2259_v40  ;;  %606 = vmatpush.msrb.mxu0 %v1931_v32 }
  0x75   :  { %562 = vmatmul.f32.vlgmr.msra.gmra.mxu1 %v2063_v10  ;;  %649 = vmatpush.msrb.mxu2 %v1912_v50  ;;  %v3219_v10 = vld [vmem:[#allocation23_spill] sm:$0xff] }
  0x76   :  { %626 = vmatpush.msrb.mxu1 %v1938_v0  ;;  %607 = vmatpush.msrb.mxu0 %v1941_v1 }
  0x77   :  { %669 = vmatpush.msrb.mxu3 %v1915_v51  ;;  %650 = vmatpush.msrb.mxu2 %v1960_v16 }
  0x78   :  { %627 = vmatpush.msrb.mxu1 %v1944_v4  ;;  %608 = vmatpush.msrb.mxu0 %v1978_v30 }
  0x79   :  { %670 = vmatpush.msrb.mxu3 %v1970_v25  ;;  %651 = vmatpush.msrb.mxu2 %v1964_v19 }
  0x7a   :  { %628 = vmatpush.msrb.mxu1 %v1991_v46  ;;  %609 = vmatpush.msrb.mxu0 %v1981_v38 }
  0x7b   :  { %671 = vmatpush.msrb.mxu3 %v1973_v26  ;;  %652 = vmatpush.msrb.mxu2 %v2004_v58 }
  0x7c   :  { %629 = vmatpush.msrb.mxu1 %v1994_v47  ;;  %610 = vmatpush.msrb.mxu0 %v2026_v18 }
  0x7d   :  { %672 = vmatpush.msrb.mxu3 %v2018_v13  ;;  %653 = vmatpush.msrb.mxu2 %v2010_v7 }
  0x7e   :  { %630 = vmatpush.msrb.mxu1 %v2039_v35  ;;  %611 = vmatpush.msrb.mxu0 %v2030_v21 }
  0x7f   :  { %673 = vmatpush.msrb.mxu3 %v2021_v15  ;;  %654 = vmatpush.msrb.mxu2 %v2052_v56 }
  0x80   :  { %631 = vmatpush.msrb.mxu1 %v2042_v43  ;;  %612 = vmatpush.msrb.mxu0 %v2078_v52 }
  0x81   :  { %674 = vmatpush.msrb.mxu3 %v2070_v29  ;;  %655 = vmatpush.msrb.mxu2 %v2060_v9 }
  0x82   :  { %632 = vmatpush.msrb.mxu1 %v2091_v5  ;;  %613 = vmatpush.msrb.mxu0 %v2082_v55 }
  0x83   :  { %675 = vmatpush.msrb.mxu3 %v2073_v44  ;;  %656 = vmatpush.msrb.mxu2 %v2104_v37 }
  0x84   :  { %633 = vmatpush.msrb.mxu1 %v2094_v6  ;;  %614 = vmatpush.msrb.mxu0 %v3216_v42 }
  0x85   :  { %676 = vmatpush.msrb.mxu3 %v3217_v60  ;;  %657 = vmatpush.msrb.mxu2 %v3218_v62 }
  0x86   :  { %634 = vmatpush.msrb.mxu1 %v3219_v10  ;;  %615 = vmatpush.msrb.mxu0 %v3220_v61 }
  0x87   :  { %677 = vmatpush.msrb.mxu3 %v3221_v53  ;;  %658 = vmatpush.msrb.mxu2 %v3222_v24 }
  0x88   :  { %635 = vmatpush.msrb.mxu1 %v3223_v11  ;;  %616 = vmatpush.msrb.mxu0 %v2174_v33 }
  0x89   :  { %678 = vmatpush.msrb.mxu3 %v2166_v49  ;;  %659 = vmatpush.msrb.mxu2 %v2158_v23 }
  0x8a   :  { %636 = vmatpush.msrb.mxu1 %v2187_v48  ;;  %617 = vmatpush.msrb.mxu0 %v3224_v59 }
  0x8b   :  { %679 = vmatpush.msrb.mxu3 %v3225_v57  ;;  %660 = vmatpush.msrb.mxu2 %v3226_v8 }
  0x8c   :  { %637 = vmatpush.msrb.mxu1 %v3227_v39  ;;  %618 = vmatpush.msrb.mxu0 %v2222_v20 }
  0x8d   :  { %680 = vmatpush.msrb.mxu3 %v2214_v17  ;;  %661 = vmatpush.msrb.mxu2 %v2206_v12 }
  0x8e   :  { %638 = vmatpush.msrb.mxu1 %v2234_v45  ;;  %619 = vmatpush.msrb.mxu0 %v2228_v3 }
  0x8f   :  { %681 = vmatpush.msrb.mxu3 %v2217_v63  ;;  %726 = vmatpush.msra.mxu2 %v1874_v27 }
  0x90   :  { %639 = vmatpush.msrb.mxu1 %v2237_v14  ;;  %620 = vmatpush.msrb.mxu0 %v2245_v2 }
  0x91   :  { %727 = vmatpush.msra.mxu2 %v1877_v28  ;;  %746 = vmatpush.msra.mxu3 %v1882_v31 }
  0x92   :  { %640 = vmatpush.msrb.mxu1 %v2256_v54  ;;  %621 = vmatpush.msrb.mxu0 %v2249_v22 }
  0x93   :  { %728 = vmatpush.msra.mxu2 %v1890_v36  ;;  %747 = vmatpush.msra.mxu3 %v1885_v34 }
  0x94   :  { %686 = vmatpush.msra.mxu0 %v1931_v32  ;;  %641 = vmatpush.msrb.mxu1 %v2259_v40 }
  0x95   :  { %729 = vmatpush.msra.mxu2 %v1912_v50  ;;  %748 = vmatpush.msra.mxu3 %v1898_v41 }
  0x96   :  { %687 = vmatpush.msra.mxu0 %v1941_v1  ;;  %706 = vmatpush.msra.mxu1 %v1938_v0 }
  0x97   :  { %730 = vmatpush.msra.mxu2 %v1960_v16  ;;  %749 = vmatpush.msra.mxu3 %v1915_v51 }
  0x98   :  { %688 = vmatpush.msra.mxu0 %v1978_v30  ;;  %707 = vmatpush.msra.mxu1 %v1944_v4 }
  0x99   :  { %731 = vmatpush.msra.mxu2 %v1964_v19  ;;  %750 = vmatpush.msra.mxu3 %v1970_v25 }
  0x9a   :  { %689 = vmatpush.msra.mxu0 %v1981_v38  ;;  %708 = vmatpush.msra.mxu1 %v1991_v46 }
  0x9b   :  { %732 = vmatpush.msra.mxu2 %v2004_v58  ;;  %751 = vmatpush.msra.mxu3 %v1973_v26 }
  0x9c   :  { %690 = vmatpush.msra.mxu0 %v2026_v18  ;;  %709 = vmatpush.msra.mxu1 %v1994_v47 }
  0x9d   :  { %733 = vmatpush.msra.mxu2 %v2010_v7  ;;  %752 = vmatpush.msra.mxu3 %v2018_v13 }
  0x9e   :  { %691 = vmatpush.msra.mxu0 %v2030_v21  ;;  %710 = vmatpush.msra.mxu1 %v2039_v35 }
  0x9f   :  { %734 = vmatpush.msra.mxu2 %v2052_v56  ;;  %753 = vmatpush.msra.mxu3 %v2021_v15 }
  0xa0   :  { %692 = vmatpush.msra.mxu0 %v2078_v52  ;;  %711 = vmatpush.msra.mxu1 %v2042_v43 }
  0xa1   :  { %735 = vmatpush.msra.mxu2 %v2060_v9  ;;  %754 = vmatpush.msra.mxu3 %v2070_v29 }
  0xa2   :  { %693 = vmatpush.msra.mxu0 %v2082_v55  ;;  %712 = vmatpush.msra.mxu1 %v2091_v5 }
  0xa3   :  { %736 = vmatpush.msra.mxu2 %v2104_v37  ;;  %755 = vmatpush.msra.mxu3 %v2073_v44 }
  0xa4   :  { %694 = vmatpush.msra.mxu0 %v3216_v42  ;;  %713 = vmatpush.msra.mxu1 %v2094_v6 }
  0xa5   :  { %737 = vmatpush.msra.mxu2 %v3218_v62  ;;  %756 = vmatpush.msra.mxu3 %v3217_v60 }
  0xa6   :  { %695 = vmatpush.msra.mxu0 %v3220_v61  ;;  %714 = vmatpush.msra.mxu1 %v3219_v10 }
  0xa7   :  { %738 = vmatpush.msra.mxu2 %v3222_v24  ;;  %757 = vmatpush.msra.mxu3 %v3221_v53 }
  0xa8   :  { %696 = vmatpush.msra.mxu0 %v2174_v33  ;;  %715 = vmatpush.msra.mxu1 %v3223_v11 }
  0xa9   :  { %739 = vmatpush.msra.mxu2 %v2158_v23  ;;  %758 = vmatpush.msra.mxu3 %v2166_v49 }
  0xaa   :  { %697 = vmatpush.msra.mxu0 %v3224_v59  ;;  %716 = vmatpush.msra.mxu1 %v2187_v48 }
  0xab   :  { %740 = vmatpush.msra.mxu2 %v3226_v8  ;;  %759 = vmatpush.msra.mxu3 %v3225_v57 }
  0xac   :  { %698 = vmatpush.msra.mxu0 %v2222_v20  ;;  %717 = vmatpush.msra.mxu1 %v3227_v39 }
  0xad   :  { %741 = vmatpush.msra.mxu2 %v2206_v12  ;;  %760 = vmatpush.msra.mxu3 %v2214_v17 }
  0xae   :  { %699 = vmatpush.msra.mxu0 %v2228_v3  ;;  %718 = vmatpush.msra.mxu1 %v2234_v45 }
  0xaf   :  { %761 = vmatpush.msra.mxu3 %v2217_v63 }
  0xb0   :  { %700 = vmatpush.msra.mxu0 %v2245_v2  ;;  %719 = vmatpush.msra.mxu1 %v2237_v14 }
  0xb2   :  { %701 = vmatpush.msra.mxu0 %v2249_v22  ;;  %720 = vmatpush.msra.mxu1 %v2256_v54 }
  0xb4   :  { %721 = vmatpush.msra.mxu1 %v2259_v40 }
  0xed   :  { %v583_v8 = vpop.f32.mrf.mxu2 }
  0xf0   :  { %v543_v3 = vpop.f32.mrf.mxu0  ;;  %v603_v23 = vpop.f32.mrf.mxu3 }
  0xf1   :  { %v604_v20 = vadd.f32 %v603_v23, %v583_v8 }
  0xf2   :  { %v563_v57 = vpop.f32.mrf.mxu1 }
  0xf3   :  { %v564_v12 = vadd.f32 %v563_v57, %v543_v3  ;;  %642 = vmatmul.f32.vlgmr.msrb.gmra.mxu1 %v604_v20  ;;  %682 = vmatmul.f32.vlgmr.msrb.gmra.mxu3 %v604_v20 }
  0xf4   :  { %826 = vmatpush.msrb.mxu3 %v1882_v31  ;;  %786 = vmatpush.msrb.mxu1 %v1938_v0  ;;  %v3231_v31 = vld [vmem:[#allocation33_spill] sm:$0xff] }
  0xf5   :  { %622 = vmatmul.f32.vlgmr.msrb.gmra.mxu0 %v564_v12  ;;  %662 = vmatmul.f32.vlgmr.msrb.gmra.mxu2 %v564_v12  ;;  %v3234_v0 = vld [vmem:[#allocation13_spill] sm:$0xff] }
  0xf6   :  { %806 = vmatpush.msrb.mxu2 %v1874_v27  ;;  %827 = vmatpush.msrb.mxu3 %v1885_v34  ;;  %v3228_v27 = vld [vmem:[#allocation27_spill] sm:$0xff]  ;;  %v3232_v34 = vld [vmem:[#allocation30_spill] sm:$0xff]  ;;  %v3241_v12 = vld [vmem:[#allocation17_spill] sm:$0xff] }
  0xf7   :  { %766 = vmatpush.msrb.mxu0 %v1931_v32  ;;  %787 = vmatpush.msrb.mxu1 %v1944_v4  ;;  %v3235_v4 = vld [vmem:[#allocation15_spill] sm:$0xff] }
  0xf8   :  { %807 = vmatpush.msrb.mxu2 %v1877_v28  ;;  %828 = vmatpush.msrb.mxu3 %v1898_v41  ;;  %v3229_v28 = vld [vmem:[#allocation32_spill] sm:$0xff]  ;;  %v854_v41 = vld [vmem:[#allocation6 + $0x4] sm:$0xf] }
  0xf9   :  { %767 = vmatpush.msrb.mxu0 %v1941_v1  ;;  %788 = vmatpush.msrb.mxu1 %v1991_v46 }
  0xfa   :  { %808 = vmatpush.msrb.mxu2 %v1890_v36  ;;  %829 = vmatpush.msrb.mxu3 %v1915_v51  ;;  %v3233_v36 = vld [vmem:[#allocation31_spill] sm:$0xff] }
  0xfb   :  { %768 = vmatpush.msrb.mxu0 %v1978_v30  ;;  %789 = vmatpush.msrb.mxu1 %v1994_v47  ;;  %v3237_v47 = vld [vmem:[#allocation14_spill] sm:$0xff] }
  0xfc   :  { %809 = vmatpush.msrb.mxu2 %v1912_v50  ;;  %830 = vmatpush.msrb.mxu3 %v1970_v25  ;;  %v855_v50 = vmul.f32 2.0, %v854_v41 }
  0xfd   :  { %769 = vmatpush.msrb.mxu0 %v1981_v38  ;;  %790 = vmatpush.msrb.mxu1 %v2039_v35  ;;  %v3236_v38 = vld [vmem:[#allocation12_spill] sm:$0xff] }
  0xfe   :  { %810 = vmatpush.msrb.mxu2 %v1960_v16  ;;  %831 = vmatpush.msrb.mxu3 %v1973_v26  ;;  %v858_v51 = vperm.slane %v855_v50, 3  ;;  %v864_v32 = vperm.slane %v855_v50, 2  ;;  %v863_v25 = vperm.slane %v855_v50, 0 }
  0xff   :  { %770 = vmatpush.msrb.mxu0 %v2026_v18  ;;  %791 = vmatpush.msrb.mxu1 %v2042_v43 }
 0x100   :  { %811 = vmatpush.msrb.mxu2 %v1964_v19  ;;  %832 = vmatpush.msrb.mxu3 %v2018_v13  ;;  %v862_v1 = vadd.f32 %v858_v51, %v3234_v0  ;;  %v868_v16 = vadd.f32 %v864_v32, %v3235_v4  ;;  %v857_v19 = vperm.slane %v855_v50, 1 }
 0x101   :  { %771 = vmatpush.msrb.mxu0 %v2030_v21  ;;  %792 = vmatpush.msrb.mxu1 %v2091_v5 }
 0x102   :  { %812 = vmatpush.msrb.mxu2 %v2004_v58  ;;  %833 = vmatpush.msrb.mxu3 %v2021_v15  ;;  %v870_v26 = vmax.f32 %v862_v1, 0.0  ;;  %v874_v30 = vmax.f32 %v868_v16, 0.0  ;;  %v861_v46 = vadd.f32 %v857_v19, %v3236_v38  ;;  %v867_v58 = vadd.f32 %v863_v25, %v3237_v47 }
 0x103   :  { %772 = vmatpush.msrb.mxu0 %v2078_v52  ;;  %793 = vmatpush.msrb.mxu1 %v2094_v6 }
 0x104   :  { %813 = vmatpush.msrb.mxu2 %v2010_v7  ;;  %834 = vmatpush.msrb.mxu3 %v2070_v29  ;;  %v872_v7 = vmin.f32 %v870_v26, 15.0  ;;  %v876_v13 = vmin.f32 %v874_v30, 15.0  ;;  %v869_v15 = vmax.f32 %v861_v46, 0.0  ;;  %v873_v18 = vmax.f32 %v867_v58, 0.0 }
 0x105   :  { %773 = vmatpush.msrb.mxu0 %v2082_v55  ;;  %794 = vmatpush.msrb.mxu1 %v3219_v10 }
 0x106   :  { %814 = vmatpush.msrb.mxu2 %v2052_v56  ;;  %835 = vmatpush.msrb.mxu3 %v2073_v44  ;;  %v878_v21 = vfloor.f32 %v872_v7  ;;  %v2459_v35 = vfloor.f32 %v876_v13  ;;  %v871_v43 = vmin.f32 %v869_v15, 15.0  ;;  %v875_v56 = vmin.f32 %v873_v18, 15.0 }
 0x107   :  { %774 = vmatpush.msrb.mxu0 %v3216_v42  ;;  %795 = vmatpush.msrb.mxu1 %v3223_v11 }
 0x108   :  { %815 = vmatpush.msrb.mxu2 %v2060_v9  ;;  %836 = vmatpush.msrb.mxu3 %v3217_v60  ;;  %v882_v9 = vsub.f32 %v872_v7, %v878_v21  ;;  %v2462_v29 = vsub.f32 %v876_v13, %v2459_v35  ;;  %v886_v44 = vadd.f32 1.0, %v878_v21  ;;  %v890_v52 = vadd.f32 1.0, %v2459_v35 }
 0x109   :  { %775 = vmatpush.msrb.mxu0 %v3220_v61  ;;  %796 = vmatpush.msrb.mxu1 %v2187_v48  ;;  %v894_v55 = vperm.slane %v878_v21, 0  ;;  %vm1066_vm8 = vcmp.eq.f32.partialorder %v2459_v35, 7.0  ;;  %vm1226_vm9 = vcmp.eq.f32.partialorder %v2459_v35, 15.0  ;;  %vm1046_vm10 = vcmp.eq.f32.partialorder %v2459_v35, 6.0 }
 0x10a   :  { %816 = vmatpush.msrb.mxu2 %v2104_v37  ;;  %837 = vmatpush.msrb.mxu3 %v3221_v53  ;;  %v3230_v37 = vld [vmem:[#allocation26_spill] sm:$0xff]  ;;  %v888_v5 = vmin.f32 %v886_v44, 15.0  ;;  %v2468_v6 = vmin.f32 %v890_v52, 15.0  ;;  %v914_v23 = vperm.slane %v882_v9, 0  ;;  %v2476_v20 = vsub.f32 1.0, %v2462_v29 }
 0x10b   :  { %776 = vmatpush.msrb.mxu0 %v2174_v33  ;;  %797 = vmatpush.msrb.mxu1 %v3227_v39  ;;  %v900_v33 = vsub.f32 1.0, %v882_v9  ;;  %vm2479_vm12 = vcmp.eq.f32.partialorder %v3241_v12, %v894_v55  ;;  %vm1206_vm13 = vcmp.eq.f32.partialorder %v2459_v35, 14.0  ;;  %v2518_v50 = vfloor.f32 %v871_v43 }
 0x10c   :  { %817 = vmatpush.msrb.mxu2 %v3218_v62  ;;  %838 = vmatpush.msrb.mxu3 %v2166_v49  ;;  %v3238_v49 = vld [vmem:[#allocation16_spill] sm:$0xff]  ;;  %v908_v3 = vperm.slane %v888_v5, 0  ;;  %vm1070_vm14 = vcmp.eq.f32.partialorder %v2468_v6, 7.0  ;;  %vm1230_vm15 = vcmp.eq.f32.partialorder %v2468_v6, 15.0  ;;  %v1048_v10 = vsel %vm1046_vm10, %v2476_v20, 0.0 }
 0x10d   :  { %777 = vmatpush.msrb.mxu0 %v3224_v59  ;;  %798 = vmatpush.msrb.mxu1 %v2234_v45  ;;  %vm2471_vm11 = vcmp.eq.f32.partialorder %v3238_v49, %v894_v55  ;;  %v1068_v45 = vsel %vm1066_vm8, %v2476_v20, 0.0  ;;  %vm1050_vm2 = vcmp.eq.f32.partialorder %v2468_v6, 6.0  ;;  %v1208_v8 = vsel %vm1206_vm13, %v2476_v20, 0.0 }
 0x10e   :  { %818 = vmatpush.msrb.mxu2 %v3222_v24  ;;  %839 = vmatpush.msrb.mxu3 %v3228_v27  ;;  %vm912_vm0 = vcmp.eq.f32.partialorder %v3238_v49, %v908_v3  ;;  %vm910_vm1 = vcmp.eq.f32.partialorder %v3241_v12, %v908_v3  ;;  %vm1210_vm3 = vcmp.eq.f32.partialorder %v2468_v6, 14.0  ;;  %v2520_v51 = vfloor.f32 %v875_v56 }
 0x10f   :  { %778 = vmatpush.msrb.mxu0 %v3229_v28  ;;  %799 = vmatpush.msrb.mxu1 %v2237_v14  ;;  %v1072_v14 = vsel %vm1070_vm14, %v2462_v29, 0.0  ;;  %v918_v60 = vsel %vm912_vm0, %v914_v23, 0.0  ;;  %v916_v59 = vsel %vm910_vm1, %v914_v23, 0.0  ;;  %v1052_v28 = vsel %vm1050_vm2, %v2462_v29, 0.0 }
 0x110   :  { %819 = vmatpush.msrb.mxu2 %v3230_v37  ;;  %840 = vmatpush.msrb.mxu3 %v2214_v17  ;;  %v1212_v37 = vsel %vm1210_vm3, %v2462_v29, 0.0  ;;  %v881_v19 = vsub.f32 %v871_v43, %v2518_v50  ;;  %v2531_v25 = vsub.f32 %v875_v56, %v2520_v51  ;;  %v885_v26 = vadd.f32 1.0, %v2518_v50 }
 0x111   :  { %779 = vmatpush.msrb.mxu0 %v3231_v31  ;;  %800 = vmatpush.msrb.mxu1 %v2256_v54  ;;  %v1214_v41 = vadd.f32 %v1212_v37, %v1208_v8  ;;  %v889_v38 = vadd.f32 1.0, %v2520_v51  ;;  %v893_v46 = vperm.slane %v2518_v50, 0  ;;  %vm1065_vm4 = vcmp.eq.f32.partialorder %v2520_v51, 7.0 }
 0x112   :  { %820 = vmatpush.msrb.mxu2 %v3232_v34  ;;  %841 = vmatpush.msrb.mxu3 %v2217_v63  ;;  %v902_v63 = vperm.slane %v900_v33, 0  ;;  %v1054_v34 = vadd.f32 %v1052_v28, %v1048_v10  ;;  %v887_v7 = vmin.f32 %v885_v26, 15.0  ;;  %v899_v13 = vsub.f32 1.0, %v881_v19 }
 0x113   :  { %780 = vmatpush.msrb.mxu0 %v2245_v2  ;;  %801 = vmatpush.msrb.mxu1 %v2259_v40  ;;  %v1228_v2 = vsel %vm1226_vm9, %v2476_v20, 0.0  ;;  %v1074_v40 = vadd.f32 %v1072_v14, %v1068_v45  ;;  %v1216_v16 = vperm.slane %v1214_v41, 0  ;;  %v913_v15 = vperm.slane %v881_v19, 0 }
 0x114   :  { %821 = vmatpush.msrb.mxu2 %v3233_v36  ;;  %v906_v54 = vsel %vm2471_vm11, %v902_v63, 0.0  ;;  %v904_v62 = vsel %vm2479_vm12, %v902_v63, 0.0  ;;  %v1056_v1 = vperm.slane %v1054_v34, 0  ;;  %v2544_v21 = vmin.f32 %v889_v38, 15.0 }
 0x115   :  { %781 = vmatpush.msrb.mxu0 %v2249_v22  ;;  %v1232_v22 = vsel %vm1230_vm15, %v2462_v29, 0.0  ;;  %v2501_v53 = vadd.f32 %v918_v60, %v906_v54  ;;  %v1076_v24 = vperm.slane %v1074_v40, 0  ;;  %v2503_v57 = vadd.f32 %v916_v59, %v904_v62 }
 0x116   :  { %v1234_v42 = vadd.f32 %v1232_v22, %v1228_v2  ;;  %vm2547_vm5 = vcmp.eq.f32.partialorder %v3238_v49, %v893_v46  ;;  %v2552_v56 = vsub.f32 1.0, %v2531_v25  ;;  %v901_v9 = vperm.slane %v899_v13, 0 }
 0x117   :  { %v2511_v27 = vmul.f32 %v1076_v24, %v2501_v53  ;;  %v2516_v36 = vmul.f32 %v1076_v24, %v2503_v57  ;;  %v2535_v30 = vmul.f32 %v1056_v1, %v2501_v53  ;;  %v2542_v58 = vmul.f32 %v1216_v16, %v2501_v53 }
 0x118   :  { %v1236_v11 = vperm.slane %v1234_v42, 0  ;;  %v907_v44 = vperm.slane %v887_v7, 0  ;;  %vm1225_vm6 = vcmp.eq.f32.partialorder %v2520_v51, 15.0  ;;  %v2557_v52 = vmul.f32 %v1056_v1, %v2503_v57 }
 0x119   :  { %v1067_v55 = vsel %vm1065_vm4, %v2552_v56, 0.0  ;;  %vm1069_vm7 = vcmp.eq.f32.partialorder %v2544_v21, 7.0  ;;  %v1227_v5 = vsel %vm1225_vm6, %v2552_v56, 0.0  ;;  %vm1229_vm8 = vcmp.eq.f32.partialorder %v2544_v21, 15.0 }
 0x11a   :  { %v2523_v32 = vmul.f32 %v1236_v11, %v2501_v53  ;;  %v2526_v0 = vmul.f32 %v1236_v11, %v2503_v57  ;;  %v905_v33 = vsel %vm2547_vm5, %v901_v9, 0.0  ;;  %vm911_vm9 = vcmp.eq.f32.partialorder %v3238_v49, %v907_v44 }
 0x11b   :  { %v1071_v23 = vsel %vm1069_vm7, %v2531_v25, 0.0  ;;  %v1231_v48 = vsel %vm1229_vm8, %v2531_v25, 0.0  ;;  %v917_v17 = vsel %vm911_vm9, %v913_v15, 0.0  ;;  %v2576_v14 = vmul.f32 %v1216_v16, %v2503_v57 }
 0x11c   :  { %v1073_v63 = vadd.f32 %v1071_v23, %v1067_v55  ;;  %v1233_v3 = vadd.f32 %v1231_v48, %v1227_v5  ;;  %v2573_v45 = vadd.f32 %v917_v17, %v905_v33  ;;  %vm1026_vm10 = vcmp.eq.f32.partialorder %v2459_v35, 5.0 }
 0x11d   :  { %vm1030_vm11 = vcmp.eq.f32.partialorder %v2468_v6, 5.0  ;;  %vm1186_vm12 = vcmp.eq.f32.partialorder %v2459_v35, 13.0  ;;  %vm1190_vm13 = vcmp.eq.f32.partialorder %v2468_v6, 13.0  ;;  %v1028_v40 = vsel %vm1026_vm10, %v2476_v20, 0.0 }
 0x11e   :  { %v1075_v2 = vperm.slane %v1073_v63, 0  ;;  %v1235_v22 = vperm.slane %v1233_v3, 0  ;;  %v1032_v42 = vsel %vm1030_vm11, %v2462_v29, 0.0  ;;  %v1188_v60 = vsel %vm1186_vm12, %v2476_v20, 0.0 }
 0x11f   :  { %v1192_v62 = vsel %vm1190_vm13, %v2462_v29, 0.0  ;;  %vm895_vm14 = vcmp.eq.f32.partialorder %v3241_v12, %v893_v46  ;;  %vm909_vm15 = vcmp.eq.f32.partialorder %v3241_v12, %v907_v44  ;;  %v1034_v10 = vadd.f32 %v1032_v42, %v1028_v40 }
 0x120   :  { %v2580_v49 = vmul.f32 %v1075_v2, %v2573_v45  ;;  %v2583_v54 = vmul.f32 %v1235_v22, %v2573_v45  ;;  %v903_v24 = vsel %vm895_vm14, %v901_v9, 0.0  ;;  %v915_v11 = vsel %vm909_vm15, %v913_v15, 0.0 }
 0x121   :  { %vm1045_vm0 = vcmp.eq.f32.partialorder %v2520_v51, 6.0  ;;  %vm1049_vm1 = vcmp.eq.f32.partialorder %v2544_v21, 6.0  ;;  %v2600_v59 = vadd.f32 %v915_v11, %v903_v24  ;;  %v1036_v8 = vperm.slane %v1034_v10, 0 }
 0x122   :  { %v1047_v28 = vsel %vm1045_vm0, %v2552_v56, 0.0  ;;  %v1051_v37 = vsel %vm1049_vm1, %v2531_v25, 0.0  ;;  %vm1205_vm2 = vcmp.eq.f32.partialorder %v2520_v51, 14.0  ;;  %vm1209_vm3 = vcmp.eq.f32.partialorder %v2544_v21, 14.0 }
 0x123   :  { %vm1006_vm4 = vcmp.eq.f32.partialorder %v2459_v35, 4.0  ;;  %v2608_v12 = vmul.f32 %v1075_v2, %v2600_v59  ;;  %v2614_v34 = vmul.f32 %v1036_v8, %v2501_v53  ;;  %v1053_v50 = vadd.f32 %v1051_v37, %v1047_v28 }
 0x124   :  { %v1207_v1 = vsel %vm1205_vm2, %v2552_v56, 0.0  ;;  %v1008_v16 = vsel %vm1006_vm4, %v2476_v20, 0.0  ;;  %v2625_v26 = vmul.f32 %v1036_v8, %v2503_v57  ;;  %vm1010_vm5 = vcmp.eq.f32.partialorder %v2468_v6, 4.0 }
 0x125   :  { %v1055_v46 = vperm.slane %v1053_v50, 0  ;;  %vm1166_vm6 = vcmp.eq.f32.partialorder %v2459_v35, 12.0  ;;  %vm1170_vm7 = vcmp.eq.f32.partialorder %v2468_v6, 12.0  ;;  %vm1025_vm8 = vcmp.eq.f32.partialorder %v2520_v51, 5.0 }
 0x126   :  { %v1168_v15 = vsel %vm1166_vm6, %v2476_v20, 0.0  ;;  %v1027_v23 = vsel %vm1025_vm8, %v2552_v56, 0.0  ;;  %vm1029_vm9 = vcmp.eq.f32.partialorder %v2544_v21, 5.0  ;;  %vm1185_vm10 = vcmp.eq.f32.partialorder %v2520_v51, 13.0 }
 0x127   :  { %v2639_v43 = vmul.f32 %v1055_v46, %v2573_v45  ;;  %v2644_v9 = vmul.f32 %v1055_v46, %v2600_v59  ;;  %vm1189_vm11 = vcmp.eq.f32.partialorder %v2544_v21, 13.0  ;;  %v1031_v63 = vsel %vm1029_vm9, %v2531_v25, 0.0 }
 0x128   :  { %v1187_v3 = vsel %vm1185_vm10, %v2552_v56, 0.0  ;;  %v1191_v2 = vsel %vm1189_vm11, %v2531_v25, 0.0  ;;  %v1033_v40 = vadd.f32 %v1031_v63, %v1027_v23  ;;  %vm986_vm12 = vcmp.eq.f32.partialorder %v2459_v35, 3.0 }
 0x129   :  { %v1193_v42 = vadd.f32 %v1191_v2, %v1187_v3  ;;  %vm990_vm13 = vcmp.eq.f32.partialorder %v2468_v6, 3.0  ;;  %vm1146_vm14 = vcmp.eq.f32.partialorder %v2459_v35, 11.0  ;;  %v988_v24 = vsel %vm986_vm12, %v2476_v20, 0.0 }
 0x12a   :  { %v1035_v10 = vperm.slane %v1033_v40, 0  ;;  %v992_v11 = vsel %vm990_vm13, %v2462_v29, 0.0  ;;  %vm1150_vm15 = vcmp.eq.f32.partialorder %v2468_v6, 11.0  ;;  %vm1005_vm0 = vcmp.eq.f32.partialorder %v2520_v51, 4.0 }
 0x12b   :  { %v994_v8 = vadd.f32 %v992_v11, %v988_v24  ;;  %vm1009_vm1 = vcmp.eq.f32.partialorder %v2544_v21, 4.0  ;;  %vm1165_vm2 = vcmp.eq.f32.partialorder %v2520_v51, 12.0  ;;  %vm966_vm4 = vcmp.eq.f32.partialorder %v2459_v35, 2.0 }
 0x12c   :  { %v2688_v28 = vmul.f32 %v1035_v10, %v2573_v45  ;;  %v2695_v50 = vmul.f32 %v1035_v10, %v2600_v59  ;;  %v968_v63 = vsel %vm966_vm4, %v2476_v20, 0.0  ;;  %vm1126_vm6 = vcmp.eq.f32.partialorder %v2459_v35, 10.0 }
 0x12d   :  { %v1128_v11 = vsel %vm1126_vm6, %v2476_v20, 0.0  ;;  %vm985_vm8 = vcmp.eq.f32.partialorder %v2520_v51, 3.0  ;;  %vm989_vm9 = vcmp.eq.f32.partialorder %v2544_v21, 3.0  ;;  %vm1145_vm10 = vcmp.eq.f32.partialorder %v2520_v51, 11.0 }
 0x12e   :  { %vm1149_vm11 = vcmp.eq.f32.partialorder %v2544_v21, 11.0  ;;  %vm946_vm12 = vcmp.eq.f32.partialorder %v2459_v35, 1.0  ;;  %vm950_vm13 = vcmp.eq.f32.partialorder %v2468_v6, 1.0  ;;  %vm924_vm4 = vcmp.eq.f32.partialorder %v2459_v35, 0.0 }
 0x12f   :  { %vm1086_vm6 = vcmp.eq.f32.partialorder %v2459_v35, 8.0 }
 0x170   :  { %v643_v61 = vpop.f32.mrf.mxu1 }
 0x172   :  { %v623_v39 = vpop.f32.mrf.mxu0 }
 0x173   :  { %v644_v31 = vadd.f32 %v643_v61, %v623_v39  ;;  %v1194_v61 = vadd.f32 %v1192_v62, %v1188_v60 }
 0x175   :  { %702 = vmatmul.f32.vlgmr.msra.gmra.mxu0 %v644_v31  ;;  %742 = vmatmul.f32.vlgmr.msra.gmra.mxu2 %v644_v31  ;;  %v1196_v39 = vperm.slane %v1194_v61, 0  ;;  %v2611_v31 = vmul.f32 %v1235_v22, %v2600_v59  ;;  %v1195_v61 = vperm.slane %v1193_v42, 0 }
 0x176   :  { %v683_v4 = vpop.f32.mrf.mxu3  ;;  %1357 = vmatpush.msra.mxu2 %v2511_v27  ;;  %1317 = vmatpush.msra.mxu0 %v2580_v49 }
 0x177   :  { %v2617_v41 = vmul.f32 %v1196_v39, %v2501_v53  ;;  %v2628_v38 = vmul.f32 %v1196_v39, %v2503_v57  ;;  %v1148_v39 = vsel %vm1146_vm14, %v2476_v20, 0.0  ;;  %v2691_v37 = vmul.f32 %v1195_v61, %v2573_v45 }
 0x178   :  { %v663_v47 = vpop.f32.mrf.mxu2  ;;  %1358 = vmatpush.msra.mxu2 %v2516_v36  ;;  %1318 = vmatpush.msra.mxu0 %v2608_v12  ;;  %vm1106_vm14 = vcmp.eq.f32.partialorder %v2459_v35, 9.0  ;;  %v1088_v35 = vsel %vm1086_vm6, %v2476_v20, 0.0 }
 0x179   :  { %v684_v18 = vadd.f32 %v683_v4, %v663_v47  ;;  %v1211_v4 = vsel %vm1209_vm3, %v2531_v25, 0.0  ;;  %v1012_v47 = vsel %vm1010_vm5, %v2462_v29, 0.0  ;;  %vm1169_vm3 = vcmp.eq.f32.partialorder %v2544_v21, 12.0 }
 0x17a   :  { %1359 = vmatpush.msra.mxu2 %v2535_v30  ;;  %v1213_v19 = vadd.f32 %v1211_v4, %v1207_v1  ;;  %v1014_v13 = vadd.f32 %v1012_v47, %v1008_v16  ;;  %1319 = vmatpush.msra.mxu0 %v2639_v43  ;;  %v2698_v1 = vmul.f32 %v1195_v61, %v2600_v59  ;;  %v996_v4 = vperm.slane %v994_v8, 0 }
 0x17b   :  { %722 = vmatmul.f32.vlgmr.msra.gmra.mxu1 %v684_v18  ;;  %762 = vmatmul.f32.vlgmr.msra.gmra.mxu3 %v684_v18  ;;  %v1172_v18 = vsel %vm1170_vm7, %v2462_v29, 0.0  ;;  %v1152_v16 = vsel %vm1150_vm15, %v2462_v29, 0.0  ;;  %v1011_v47 = vsel %vm1009_vm1, %v2531_v25, 0.0  ;;  %vm970_vm5 = vcmp.eq.f32.partialorder %v2468_v6, 2.0 }
 0x17c   :  { %1377 = vmatpush.msra.mxu3 %v2523_v32  ;;  %1360 = vmatpush.msra.mxu2 %v2557_v52  ;;  %v1215_v7 = vperm.slane %v1213_v19, 0  ;;  %v1174_v44 = vadd.f32 %v1172_v18, %v1168_v15  ;;  %v1016_v33 = vperm.slane %v1014_v13, 0  ;;  %v1007_v19 = vsel %vm1005_vm0, %v2552_v56, 0.0 }
 0x17d   :  { %1337 = vmatpush.msra.mxu1 %v2583_v54  ;;  %1320 = vmatpush.msra.mxu0 %v2644_v9  ;;  %v1154_v46 = vadd.f32 %v1152_v16, %v1148_v39  ;;  %v1013_v13 = vadd.f32 %v1011_v47, %v1007_v19  ;;  %v1167_v15 = vsel %vm1165_vm2, %v2552_v56, 0.0  ;;  %v1171_v18 = vsel %vm1169_vm3, %v2531_v25, 0.0 }
 0x17e   :  { %1378 = vmatpush.msra.mxu3 %v2526_v0  ;;  %1361 = vmatpush.msra.mxu2 %v2614_v34  ;;  %v2648_v55 = vmul.f32 %v1215_v7, %v2573_v45  ;;  %v2651_v5 = vmul.f32 %v1215_v7, %v2600_v59  ;;  %v1176_v48 = vperm.slane %v1174_v44, 0  ;;  %v2660_v17 = vmul.f32 %v1016_v33, %v2501_v53 }
 0x17f   :  { %1338 = vmatpush.msra.mxu1 %v2611_v31  ;;  %v2670_v60 = vmul.f32 %v1016_v33, %v2503_v57  ;;  %1321 = vmatpush.msra.mxu0 %v2688_v28  ;;  %v2709_v7 = vmul.f32 %v996_v4, %v2501_v53  ;;  %v1156_v44 = vperm.slane %v1154_v46, 0  ;;  %v1173_v33 = vadd.f32 %v1171_v18, %v1167_v15 }
 0x180   :  { %1379 = vmatpush.msra.mxu3 %v2542_v58  ;;  %1362 = vmatpush.msra.mxu2 %v2625_v26  ;;  %v2667_v22 = vmul.f32 %v1176_v48, %v2501_v53  ;;  %v2675_v62 = vmul.f32 %v1176_v48, %v2503_v57  ;;  %v2716_v23 = vmul.f32 %v996_v4, %v2503_v57  ;;  %v1015_v48 = vperm.slane %v1013_v13, 0 }
 0x181   :  { %1339 = vmatpush.msra.mxu1 %v2648_v55  ;;  %1322 = vmatpush.msra.mxu0 %v2695_v50  ;;  %v2724_v3 = vmul.f32 %v1156_v44, %v2501_v53  ;;  %v1175_v2 = vperm.slane %v1173_v33, 0  ;;  %v2727_v40 = vmul.f32 %v1156_v44, %v2503_v57  ;;  %v972_v42 = vsel %vm970_vm5, %v2462_v29, 0.0 }
 0x182   :  { %1380 = vmatpush.msra.mxu3 %v2576_v14  ;;  %1363 = vmatpush.msra.mxu2 %v2660_v17  ;;  %v2731_v10 = vmul.f32 %v1015_v48, %v2573_v45  ;;  %v2735_v61 = vmul.f32 %v1015_v48, %v2600_v59  ;;  %v974_v24 = vadd.f32 %v972_v42, %v968_v63  ;;  %vm1130_vm7 = vcmp.eq.f32.partialorder %v2468_v6, 10.0 }
 0x183   :  { %1340 = vmatpush.msra.mxu1 %v2651_v5  ;;  %v2740_v8 = vmul.f32 %v1175_v2, %v2573_v45  ;;  %v2743_v39 = vmul.f32 %v1175_v2, %v2600_v59  ;;  %v1132_v16 = vsel %vm1130_vm7, %v2462_v29, 0.0  ;;  %v987_v19 = vsel %vm985_vm8, %v2552_v56, 0.0 }
 0x184   :  { %1381 = vmatpush.msra.mxu3 %v2617_v41  ;;  %1364 = vmatpush.msra.mxu2 %v2670_v60  ;;  %v976_v4 = vperm.slane %v974_v24, 0  ;;  %v1134_v46 = vadd.f32 %v1132_v16, %v1128_v11  ;;  %v991_v47 = vsel %vm989_vm9, %v2531_v25, 0.0  ;;  %v1147_v18 = vsel %vm1145_vm10, %v2552_v56, 0.0 }
 0x185   :  { %1341 = vmatpush.msra.mxu1 %v2691_v37  ;;  %1323 = vmatpush.msra.mxu0 %v2731_v10  ;;  %v993_v15 = vadd.f32 %v991_v47, %v987_v19  ;;  %v1151_v44 = vsel %vm1149_vm11, %v2531_v25, 0.0  ;;  %v948_v42 = vsel %vm946_vm12, %v2476_v20, 0.0  ;;  %vm1110_vm15 = vcmp.eq.f32.partialorder %v2468_v6, 9.0 }
 0x186   :  { %1382 = vmatpush.msra.mxu3 %v2628_v38  ;;  %1365 = vmatpush.msra.mxu2 %v2709_v7  ;;  %v2758_v13 = vmul.f32 %v976_v4, %v2501_v53  ;;  %v1136_v33 = vperm.slane %v1134_v46, 0  ;;  %v1153_v48 = vadd.f32 %v1151_v44, %v1147_v18  ;;  %v2764_v63 = vmul.f32 %v976_v4, %v2503_v57 }
 0x187   :  { %1342 = vmatpush.msra.mxu1 %v2698_v1  ;;  %1324 = vmatpush.msra.mxu0 %v2735_v61  ;;  %v995_v2 = vperm.slane %v993_v15, 0  ;;  %v952_v4 = vsel %vm950_vm13, %v2462_v29, 0.0  ;;  %v1108_v15 = vsel %vm1106_vm14, %v2476_v20, 0.0  ;;  %vm965_vm0 = vcmp.eq.f32.partialorder %v2520_v51, 2.0 }
 0x188   :  { %1383 = vmatpush.msra.mxu3 %v2667_v22  ;;  %1366 = vmatpush.msra.mxu2 %v2716_v23  ;;  %3246 = vst [vmem:[#allocation21_spill] sm:$0xff] %v2764_v63  ;;  %v2772_v24 = vmul.f32 %v1136_v33, %v2501_v53  ;;  %v1155_v11 = vperm.slane %v1153_v48, 0  ;;  %v2775_v16 = vmul.f32 %v1136_v33, %v2503_v57  ;;  %v1112_v48 = vsel %vm1110_vm15, %v2462_v29, 0.0 }
 0x189   :  { %1343 = vmatpush.msra.mxu1 %v2740_v8  ;;  %v2779_v19 = vmul.f32 %v995_v2, %v2573_v45  ;;  %v2783_v46 = vmul.f32 %v995_v2, %v2600_v59  ;;  %v954_v47 = vadd.f32 %v952_v4, %v948_v42  ;;  %v967_v2 = vsel %vm965_vm0, %v2552_v56, 0.0 }
 0x18a   :  { %1384 = vmatpush.msra.mxu3 %v2675_v62  ;;  %1367 = vmatpush.msra.mxu2 %v2758_v13  ;;  %3247 = vst [vmem:[#allocation19_spill] sm:$0xff] %v2772_v24  ;;  %v2788_v18 = vmul.f32 %v1155_v11, %v2573_v45  ;;  %v2791_v44 = vmul.f32 %v1155_v11, %v2600_v59  ;;  %vm969_vm1 = vcmp.eq.f32.partialorder %v2544_v21, 2.0  ;;  %vm1125_vm2 = vcmp.eq.f32.partialorder %v2520_v51, 10.0 }
 0x18b   :  { %1344 = vmatpush.msra.mxu1 %v2743_v39  ;;  %3248 = vst [vmem:[#allocation18_spill] sm:$0xff] %v2775_v16  ;;  %1325 = vmatpush.msra.mxu0 %v2779_v19  ;;  %v956_v33 = vperm.slane %v954_v47, 0  ;;  %v1114_v42 = vadd.f32 %v1112_v48, %v1108_v15  ;;  %v971_v11 = vsel %vm969_vm1, %v2531_v25, 0.0  ;;  %vm1129_vm3 = vcmp.eq.f32.partialorder %v2544_v21, 10.0 }
 0x18c   :  { %1385 = vmatpush.msra.mxu3 %v2724_v3  ;;  %1368 = vmatpush.msra.mxu2 %v2764_v63  ;;  %3249 = vst [vmem:[#allocation23_spill] sm:$0xff] %v2783_v46  ;;  %v973_v47 = vadd.f32 %v971_v11, %v967_v2  ;;  %v1127_v63 = vsel %vm1125_vm2, %v2552_v56, 0.0  ;;  %vm930_vm5 = vcmp.eq.f32.partialorder %v2468_v6, 0.0  ;;  %vm1090_vm7 = vcmp.eq.f32.partialorder %v2468_v6, 8.0 }
 0x18d   :  { %3250 = vst [vmem:[#allocation22_spill] sm:$0xff] %v2788_v18  ;;  %1345 = vmatpush.msra.mxu1 %v2788_v18  ;;  %1326 = vmatpush.msra.mxu0 %v2783_v46  ;;  %v2806_v4 = vmul.f32 %v956_v33, %v2501_v53  ;;  %v2812_v48 = vmul.f32 %v956_v33, %v2503_v57  ;;  %v928_v18 = vsel %vm924_vm4, %v2476_v20, 0.0  ;;  %vm945_vm8 = vcmp.eq.f32.partialorder %v2520_v51, 1.0 }
 0x18e   :  { %1386 = vmatpush.msra.mxu3 %v2727_v40  ;;  %v975_v46 = vperm.slane %v973_v47, 0  ;;  %vm949_vm9 = vcmp.eq.f32.partialorder %v2544_v21, 1.0  ;;  %vm1105_vm10 = vcmp.eq.f32.partialorder %v2520_v51, 9.0  ;;  %vm1109_vm11 = vcmp.eq.f32.partialorder %v2544_v21, 9.0 }
 0x18f   :  { %3251 = vst [vmem:[#allocation20_spill] sm:$0xff] %v2806_v4  ;;  %1346 = vmatpush.msra.mxu1 %v2791_v44  ;;  %1369 = vmatpush.msra.mxu2 %v2806_v4  ;;  %vm923_vm12 = vcmp.eq.f32.partialorder %v2520_v51, 0.0  ;;  %vm929_vm13 = vcmp.eq.f32.partialorder %v2544_v21, 0.0  ;;  %vm1085_vm14 = vcmp.eq.f32.partialorder %v2520_v51, 8.0  ;;  %vm1089_vm15 = vcmp.eq.f32.partialorder %v2544_v21, 8.0 }
 0x190   :  { %1387 = vmatpush.msra.mxu3 %v2772_v24  ;;  %v1131_v24 = vsel %vm1129_vm3, %v2531_v25, 0.0  ;;  %3252 = vst [vmem:[#allocation25_spill] sm:$0xff] %v2812_v48  ;;  %v2827_v33 = vmul.f32 %v975_v46, %v2573_v45  ;;  %v931_v51 = vsel %vm929_vm13, %v2531_v25, 0.0  ;;  %vm849_vm0 = vcmask 1043456  }
 0x191   :  { %v1133_v15 = vadd.f32 %v1131_v24, %v1127_v63  ;;  %v932_v24 = vsel %vm930_vm5, %v2462_v29, 0.0  ;;  %1370 = vmatpush.msra.mxu2 %v2812_v48 }
 0x192   :  { %1388 = vmatpush.msra.mxu3 %v2775_v16  ;;  %v1116_v16 = vperm.slane %v1114_v42, 0  ;;  %3255 = vst [vmem:[#allocation29_spill] sm:$0xff] %v2827_v33  ;;  %v2831_v42 = vmul.f32 %v975_v46, %v2600_v59  ;;  %v934_v47 = vadd.f32 %v932_v24, %v928_v18  ;;  %1327 = vmatpush.msra.mxu0 %v2827_v33  ;;  %v1092_v46 = vsel %vm1090_vm7, %v2462_v29, 0.0 }
 0x193   :  { %v1135_v11 = vperm.slane %v1133_v15, 0  ;;  %v947_v18 = vsel %vm945_vm8, %v2552_v56, 0.0  ;;  %v1094_v20 = vadd.f32 %v1092_v46, %v1088_v35 }
 0x194   :  { %v2820_v2 = vmul.f32 %v1116_v16, %v2501_v53  ;;  %v2823_v63 = vmul.f32 %v1116_v16, %v2503_v57  ;;  %v936_v48 = vperm.slane %v934_v47, 0  ;;  %1328 = vmatpush.msra.mxu0 %v2831_v42 }
 0x195   :  { %v2836_v15 = vmul.f32 %v1135_v11, %v2573_v45  ;;  %v2839_v16 = vmul.f32 %v1135_v11, %v2600_v59  ;;  %v951_v11 = vsel %vm949_vm9, %v2531_v25, 0.0  ;;  %v1096_v35 = vperm.slane %v1094_v20, 0 }
 0x196   :  { %3253 = vst [vmem:[#allocation24_spill] sm:$0xff] %v2820_v2  ;;  %1389 = vmatpush.msra.mxu3 %v2820_v2  ;;  %v2854_v29 = vmul.f32 %v936_v48, %v2501_v53  ;;  %v953_v47 = vadd.f32 %v951_v11, %v947_v18  ;;  %v1107_v2 = vsel %vm1105_vm10, %v2552_v56, 0.0  ;;  %v2860_v33 = vmul.f32 %v936_v48, %v2503_v57 }
 0x197   :  { %3254 = vst [vmem:[#allocation28_spill] sm:$0xff] %v2823_v63  ;;  %1347 = vmatpush.msra.mxu1 %v2836_v15  ;;  %v2867_v18 = vmul.f32 %v1096_v35, %v2501_v53  ;;  %v927_v48 = vsel %vm923_vm12, %v2552_v56, 0.0 }
 0x198   :  { %3256 = vst [vmem:[#allocation27_spill] sm:$0xff] %v2836_v15  ;;  %1390 = vmatpush.msra.mxu3 %v2823_v63  ;;  %v1111_v15 = vsel %vm1109_vm11, %v2531_v25, 0.0  ;;  %1371 = vmatpush.msra.mxu2 %v2854_v29  ;;  %v955_v4 = vperm.slane %v953_v47, 0  ;;  %v1091_v47 = vsel %vm1089_vm15, %v2531_v25, 0.0 }
 0x199   :  { %3257 = vst [vmem:[#allocation32_spill] sm:$0xff] %v2839_v16  ;;  %1348 = vmatpush.msra.mxu1 %v2839_v16  ;;  %v1113_v46 = vadd.f32 %v1111_v15, %v1107_v2  ;;  %v2870_v2 = vmul.f32 %v1096_v35, %v2503_v57  ;;  %v933_v57 = vadd.f32 %v931_v51, %v927_v48  ;;  %v1313_v48 = vld.sshfl [vmem:[#allocation1] sm:$0xff pattern:$0x75316420] }
 0x19a   :  { %3258 = vst [vmem:[#allocation26_spill] sm:$0xff] %v2854_v29  ;;  %v2874_v15 = vmul.f32 %v955_v4, %v2573_v45  ;;  %1372 = vmatpush.msra.mxu2 %v2860_v33  ;;  %v2878_v20 = vmul.f32 %v955_v4, %v2600_v59  ;;  %1391 = vmatpush.msra.mxu3 %v2867_v18 }
 0x19b   :  { %3259 = vst [vmem:[#allocation33_spill] sm:$0xff] %v2860_v33  ;;  %v1115_v11 = vperm.slane %v1113_v46, 0  ;;  %v935_v35 = vperm.slane %v933_v57, 0  ;;  %v1314_v57 = vld.sshfl [vmem:[#allocation1 + $0x8] sm:$0xff pattern:$0x75316420] }
 0x19c   :  { %3260 = vst [vmem:[#allocation30_spill] sm:$0xff] %v2867_v18  ;;  %1329 = vmatpush.msra.mxu0 %v2874_v15  ;;  %1392 = vmatpush.msra.mxu3 %v2870_v2 }
 0x19d   :  { %3261 = vst [vmem:[#allocation31_spill] sm:$0xff] %v2870_v2  ;;  %v2884_v53 = vmul.f32 %v1115_v11, %v2573_v45  ;;  %v2890_v4 = vmul.f32 %v1115_v11, %v2600_v59  ;;  %v2898_v21 = vmul.f32 %v935_v35, %v2573_v45  ;;  %v2901_v25 = vmul.f32 %v935_v35, %v2600_v59  ;;  %v3272_v35 = vld [vmem:[#allocation29_spill] sm:$0xff] }
 0x19e   :  { %1330 = vmatpush.msra.mxu0 %v2878_v20 }
 0x19f   :  { %3262 = vst [vmem:[#allocation13_spill] sm:$0xff] %v2884_v53  ;;  %1349 = vmatpush.msra.mxu1 %v2884_v53 }
 0x1a0   :  { %3263 = vst [vmem:[#allocation15_spill] sm:$0xff] %v2890_v4  ;;  %1331 = vmatpush.msra.mxu0 %v2898_v21 }
 0x1a1   :  { %3264 = vst [vmem:[#allocation12_spill] sm:$0xff] %v2898_v21  ;;  %1350 = vmatpush.msra.mxu1 %v2890_v4 }
 0x1a2   :  { %1332 = vmatpush.msra.mxu0 %v2901_v25 }
 0x1f2   :  { %v703_v6 = vpop.f32.mrf.mxu0 }
 0x1f8   :  { %v723_v24 = vpop.f32.mrf.mxu1 }
 0x1f9   :  { %v724_v63 = vadd.f32 %v723_v24, %v703_v6  ;;  %v743_v6 = vpop.f32.mrf.mxu2 }
 0x1fb   :  { %782 = vmatmul.f32.vlgmr.msrb.gmra.mxu0 %v724_v63  ;;  %822 = vmatmul.f32.vlgmr.msrb.gmra.mxu2 %v724_v63  ;;  %v1087_v63 = vsel %vm1085_vm14, %v2552_v56, 0.0 }
 0x1fc   :  { %1437 = vmatpush.msrb.mxu2 %v2511_v27  ;;  %v1093_v46 = vadd.f32 %v1091_v47, %v1087_v63  ;;  %1397 = vmatpush.msrb.mxu0 %v2580_v49  ;;  %v3270_v47 = vld [vmem:[#allocation18_spill] sm:$0xff] }
 0x1fe   :  { %v763_v24 = vpop.f32.mrf.mxu3  ;;  %1438 = vmatpush.msrb.mxu2 %v2516_v36  ;;  %v1095_v11 = vperm.slane %v1093_v46, 0  ;;  %1398 = vmatpush.msrb.mxu0 %v2608_v12  ;;  %v3273_v46 = vld [vmem:[#allocation27_spill] sm:$0xff] }
 0x1ff   :  { %v764_v56 = vadd.f32 %v763_v24, %v743_v6  ;;  %v3268_v6 = vld [vmem:[#allocation21_spill] sm:$0xff]  ;;  %v3269_v24 = vld [vmem:[#allocation23_spill] sm:$0xff] }
 0x200   :  { %v2907_v51 = vmul.f32 %v1095_v11, %v2573_v45  ;;  %v2910_v63 = vmul.f32 %v1095_v11, %v2600_v59  ;;  %1439 = vmatpush.msrb.mxu2 %v2535_v30  ;;  %1399 = vmatpush.msrb.mxu0 %v2639_v43  ;;  %v3266_v45 = vld [vmem:[#allocation22_spill] sm:$0xff]  ;;  %v3267_v59 = vld [vmem:[#allocation19_spill] sm:$0xff]  ;;  %v3275_v11 = vld [vmem:[#allocation25_spill] sm:$0xff] }
 0x201   :  { %802 = vmatmul.f32.vlgmr.msrb.gmra.mxu1 %v764_v56  ;;  %842 = vmatmul.f32.vlgmr.msrb.gmra.mxu3 %v764_v56  ;;  %v3271_v56 = vld [vmem:[#allocation20_spill] sm:$0xff] }
 0x202   :  { %1457 = vmatpush.msrb.mxu3 %v2523_v32  ;;  %3265 = vst [vmem:[#allocation14_spill] sm:$0xff] %v2910_v63  ;;  %1351 = vmatpush.msra.mxu1 %v2907_v51 }
 0x203   :  { %1373 = vmatmul.f32.vlgmr.msra.gmra.mxu2 %v1313_v48  ;;  %1333 = vmatmul.f32.vlgmr.msra.gmra.mxu0 %v1313_v48  ;;  %v3274_v48 = vld [vmem:[#allocation24_spill] sm:$0xff] }
 0x204   :  { %1458 = vmatpush.msrb.mxu3 %v2526_v0  ;;  %1352 = vmatpush.msra.mxu1 %v2910_v63 }
 0x205   :  { %1440 = vmatpush.msrb.mxu2 %v2557_v52  ;;  %1400 = vmatpush.msrb.mxu0 %v2644_v9 }
 0x206   :  { %1459 = vmatpush.msrb.mxu3 %v2542_v58  ;;  %1417 = vmatpush.msrb.mxu1 %v2583_v54 }
 0x207   :  { %1441 = vmatpush.msrb.mxu2 %v2614_v34  ;;  %1401 = vmatpush.msrb.mxu0 %v2688_v28 }
 0x208   :  { %1418 = vmatpush.msrb.mxu1 %v2611_v31  ;;  %1460 = vmatpush.msrb.mxu3 %v2576_v14 }
 0x209   :  { %1393 = vmatmul.f32.vlgmr.msra.gmra.mxu3 %v1314_v57  ;;  %1353 = vmatmul.f32.vlgmr.msra.gmra.mxu1 %v1314_v57  ;;  %v3276_v57 = vld [vmem:[#allocation28_spill] sm:$0xff] }
 0x20a   :  { %1419 = vmatpush.msrb.mxu1 %v2648_v55  ;;  %1461 = vmatpush.msrb.mxu3 %v2617_v41 }
 0x20b   :  { %1442 = vmatpush.msrb.mxu2 %v2625_v26  ;;  %1402 = vmatpush.msrb.mxu0 %v2695_v50 }
 0x20c   :  { %1420 = vmatpush.msrb.mxu1 %v2651_v5  ;;  %1462 = vmatpush.msrb.mxu3 %v2628_v38 }
 0x20d   :  { %1443 = vmatpush.msrb.mxu2 %v2660_v17  ;;  %1403 = vmatpush.msrb.mxu0 %v2731_v10 }
 0x20e   :  { %1421 = vmatpush.msrb.mxu1 %v2691_v37  ;;  %1463 = vmatpush.msrb.mxu3 %v2667_v22 }
 0x20f   :  { %1444 = vmatpush.msrb.mxu2 %v2670_v60  ;;  %1404 = vmatpush.msrb.mxu0 %v2735_v61 }
 0x210   :  { %1422 = vmatpush.msrb.mxu1 %v2698_v1  ;;  %1464 = vmatpush.msrb.mxu3 %v2675_v62 }
 0x211   :  { %1445 = vmatpush.msrb.mxu2 %v2709_v7  ;;  %1405 = vmatpush.msrb.mxu0 %v2779_v19 }
 0x212   :  { %1423 = vmatpush.msrb.mxu1 %v2740_v8  ;;  %1465 = vmatpush.msrb.mxu3 %v2724_v3 }
 0x213   :  { %1446 = vmatpush.msrb.mxu2 %v2716_v23  ;;  %1406 = vmatpush.msrb.mxu0 %v3269_v24 }
 0x214   :  { %1424 = vmatpush.msrb.mxu1 %v2743_v39  ;;  %1466 = vmatpush.msrb.mxu3 %v2727_v40 }
 0x215   :  { %1447 = vmatpush.msrb.mxu2 %v2758_v13  ;;  %1407 = vmatpush.msrb.mxu0 %v3272_v35 }
 0x216   :  { %1425 = vmatpush.msrb.mxu1 %v3266_v45  ;;  %1467 = vmatpush.msrb.mxu3 %v3267_v59 }
 0x217   :  { %1448 = vmatpush.msrb.mxu2 %v3268_v6  ;;  %1408 = vmatpush.msrb.mxu0 %v2831_v42 }
 0x218   :  { %1426 = vmatpush.msrb.mxu1 %v2791_v44  ;;  %1468 = vmatpush.msrb.mxu3 %v3270_v47 }
 0x219   :  { %1449 = vmatpush.msrb.mxu2 %v3271_v56  ;;  %1409 = vmatpush.msrb.mxu0 %v2874_v15 }
 0x21a   :  { %1427 = vmatpush.msrb.mxu1 %v3273_v46  ;;  %1469 = vmatpush.msrb.mxu3 %v3274_v48 }
 0x21b   :  { %1450 = vmatpush.msrb.mxu2 %v3275_v11  ;;  %1410 = vmatpush.msrb.mxu0 %v2878_v20 }
 0x21c   :  { %1428 = vmatpush.msrb.mxu1 %v2839_v16  ;;  %1470 = vmatpush.msrb.mxu3 %v3276_v57 }
 0x21d   :  { %1451 = vmatpush.msrb.mxu2 %v2854_v29  ;;  %1411 = vmatpush.msrb.mxu0 %v2898_v21 }
 0x21e   :  { %1429 = vmatpush.msrb.mxu1 %v2884_v53  ;;  %1471 = vmatpush.msrb.mxu3 %v2867_v18 }
 0x21f   :  { %1452 = vmatpush.msrb.mxu2 %v2860_v33  ;;  %1412 = vmatpush.msrb.mxu0 %v2901_v25 }
 0x220   :  { %1430 = vmatpush.msrb.mxu1 %v2890_v4  ;;  %1472 = vmatpush.msrb.mxu3 %v2870_v2 }
 0x221   :  { %1517 = vmatpush.msra.mxu2 %v2511_v27  ;;  %1477 = vmatpush.msra.mxu0 %v2580_v49 }
 0x222   :  { %1431 = vmatpush.msrb.mxu1 %v2907_v51  ;;  %1537 = vmatpush.msra.mxu3 %v2523_v32 }
 0x223   :  { %1518 = vmatpush.msra.mxu2 %v2516_v36  ;;  %1478 = vmatpush.msra.mxu0 %v2608_v12 }
 0x224   :  { %1432 = vmatpush.msrb.mxu1 %v2910_v63  ;;  %1538 = vmatpush.msra.mxu3 %v2526_v0 }
 0x225   :  { %1519 = vmatpush.msra.mxu2 %v2535_v30  ;;  %1479 = vmatpush.msra.mxu0 %v2639_v43 }
 0x226   :  { %1497 = vmatpush.msra.mxu1 %v2583_v54  ;;  %1539 = vmatpush.msra.mxu3 %v2542_v58 }
 0x227   :  { %1520 = vmatpush.msra.mxu2 %v2557_v52  ;;  %1480 = vmatpush.msra.mxu0 %v2644_v9 }
 0x228   :  { %1498 = vmatpush.msra.mxu1 %v2611_v31  ;;  %1540 = vmatpush.msra.mxu3 %v2576_v14 }
 0x229   :  { %1521 = vmatpush.msra.mxu2 %v2614_v34  ;;  %1481 = vmatpush.msra.mxu0 %v2688_v28 }
 0x22a   :  { %1499 = vmatpush.msra.mxu1 %v2648_v55  ;;  %1541 = vmatpush.msra.mxu3 %v2617_v41 }
 0x22b   :  { %1522 = vmatpush.msra.mxu2 %v2625_v26  ;;  %1482 = vmatpush.msra.mxu0 %v2695_v50 }
 0x22c   :  { %1500 = vmatpush.msra.mxu1 %v2651_v5  ;;  %1542 = vmatpush.msra.mxu3 %v2628_v38 }
 0x22d   :  { %1523 = vmatpush.msra.mxu2 %v2660_v17  ;;  %1483 = vmatpush.msra.mxu0 %v2731_v10 }
 0x22e   :  { %1501 = vmatpush.msra.mxu1 %v2691_v37  ;;  %1543 = vmatpush.msra.mxu3 %v2667_v22 }
 0x22f   :  { %1524 = vmatpush.msra.mxu2 %v2670_v60  ;;  %1484 = vmatpush.msra.mxu0 %v2735_v61 }
 0x230   :  { %1502 = vmatpush.msra.mxu1 %v2698_v1  ;;  %1544 = vmatpush.msra.mxu3 %v2675_v62 }
 0x231   :  { %1525 = vmatpush.msra.mxu2 %v2709_v7  ;;  %1485 = vmatpush.msra.mxu0 %v2779_v19 }
 0x232   :  { %1503 = vmatpush.msra.mxu1 %v2740_v8  ;;  %1545 = vmatpush.msra.mxu3 %v2724_v3 }
 0x233   :  { %1526 = vmatpush.msra.mxu2 %v2716_v23  ;;  %1486 = vmatpush.msra.mxu0 %v3269_v24 }
 0x234   :  { %1504 = vmatpush.msra.mxu1 %v2743_v39  ;;  %1546 = vmatpush.msra.mxu3 %v2727_v40 }
 0x235   :  { %1527 = vmatpush.msra.mxu2 %v2758_v13  ;;  %1487 = vmatpush.msra.mxu0 %v3272_v35 }
 0x236   :  { %1505 = vmatpush.msra.mxu1 %v3266_v45  ;;  %1547 = vmatpush.msra.mxu3 %v3267_v59 }
 0x237   :  { %1528 = vmatpush.msra.mxu2 %v3268_v6  ;;  %1488 = vmatpush.msra.mxu0 %v2831_v42 }
 0x238   :  { %1506 = vmatpush.msra.mxu1 %v2791_v44  ;;  %1548 = vmatpush.msra.mxu3 %v3270_v47 }
 0x239   :  { %1529 = vmatpush.msra.mxu2 %v3271_v56  ;;  %1489 = vmatpush.msra.mxu0 %v2874_v15 }
 0x23a   :  { %1507 = vmatpush.msra.mxu1 %v3273_v46  ;;  %1549 = vmatpush.msra.mxu3 %v3274_v48 }
 0x23b   :  { %1530 = vmatpush.msra.mxu2 %v3275_v11  ;;  %1490 = vmatpush.msra.mxu0 %v2878_v20 }
 0x23c   :  { %1508 = vmatpush.msra.mxu1 %v2839_v16  ;;  %1550 = vmatpush.msra.mxu3 %v3276_v57 }
 0x23d   :  { %1531 = vmatpush.msra.mxu2 %v2854_v29  ;;  %1491 = vmatpush.msra.mxu0 %v2898_v21 }
 0x23e   :  { %1509 = vmatpush.msra.mxu1 %v2884_v53  ;;  %1551 = vmatpush.msra.mxu3 %v2867_v18 }
 0x23f   :  { %1532 = vmatpush.msra.mxu2 %v2860_v33  ;;  %1492 = vmatpush.msra.mxu0 %v2901_v25 }
 0x240   :  { %1510 = vmatpush.msra.mxu1 %v2890_v4  ;;  %1552 = vmatpush.msra.mxu3 %v2870_v2 }
 0x242   :  { %1511 = vmatpush.msra.mxu1 %v2907_v51 }
 0x244   :  { %1512 = vmatpush.msra.mxu1 %v2910_v63 }
 0x278   :  { %v783_v48 = vpop.f32.mrf.mxu0 }
 0x27e   :  { %v803_v57 = vpop.f32.mrf.mxu1  ;;  %v823_v53 = vpop.f32.mrf.mxu2 }
 0x27f   :  { %v804_v16 = vadd.f32 %v803_v57, %v783_v48 }
 0x280   :  { %v1334_v29 = vpop.f32.mrf.mxu0 }
 0x284   :  { %v843_v47 = vpop.f32.mrf.mxu3 }
 0x285   :  { %v844_v33 = vadd.f32 %v843_v47, %v823_v53 }
 0x286   :  { %v1354_v4 = vpop.f32.mrf.mxu1  ;;  %v1374_v2 = vpop.f32.mrf.mxu2 }
 0x287   :  { %v848_v18 = vrot.slane %v844_v33, 4  ;;  %v1355_v59 = vadd.f32 %v1354_v4, %v1334_v29 }
 0x289   :  { %v850_v21 = vsel %vm849_vm0, %v804_v16, %v848_v18  ;;  %1413 = vmatmul.f32.vlgmr.msrb.gmra.mxu0 %v1355_v59  ;;  %1453 = vmatmul.f32.vlgmr.msrb.gmra.mxu2 %v1355_v59 }
 0x28a   :  { %852 = vst [vmem:[#allocation8] sm:$0xff] %v850_v21  ;;  %1557 = vmatpush.msrb.mxu0 %v2580_v49  ;;  %1597 = vmatpush.msrb.mxu2 %v2511_v27  ;;  %v3277_v27 = vld [vmem:[#allocation19_spill] sm:$0xff] }
 0x28b   :  { %v3285_v49 = vld [vmem:[#allocation15_spill] sm:$0xff] }
 0x28c   :  { %v1394_v63 = vpop.f32.mrf.mxu3  ;;  %1558 = vmatpush.msrb.mxu0 %v2608_v12  ;;  %1598 = vmatpush.msrb.mxu2 %v2516_v36  ;;  %v3278_v36 = vld [vmem:[#allocation12_spill] sm:$0xff]  ;;  %v3287_v12 = vld [vmem:[#allocation30_spill] sm:$0xff] }
 0x28d   :  { %v1395_v53 = vadd.f32 %v1394_v63, %v1374_v2 }
 0x28e   :  { %1559 = vmatpush.msrb.mxu0 %v2639_v43  ;;  %1599 = vmatpush.msrb.mxu2 %v2535_v30  ;;  %v3281_v30 = vld [vmem:[#allocation18_spill] sm:$0xff] }
 0x28f   :  { %1433 = vmatmul.f32.vlgmr.msrb.gmra.mxu1 %v1395_v53  ;;  %1473 = vmatmul.f32.vlgmr.msrb.gmra.mxu3 %v1395_v53 }
 0x290   :  { %1560 = vmatpush.msrb.mxu0 %v2644_v9  ;;  %1577 = vmatpush.msrb.mxu1 %v2583_v54  ;;  %v3286_v54 = vld [vmem:[#allocation28_spill] sm:$0xff] }
 0x291   :  { %1600 = vmatpush.msrb.mxu2 %v2557_v52  ;;  %1617 = vmatpush.msrb.mxu3 %v2523_v32  ;;  %v3279_v32 = vld [vmem:[#allocation32_spill] sm:$0xff]  ;;  %v3283_v52 = vld [vmem:[#allocation33_spill] sm:$0xff] }
 0x292   :  { %1561 = vmatpush.msrb.mxu0 %v2688_v28  ;;  %1578 = vmatpush.msrb.mxu1 %v2611_v31  ;;  %v3288_v31 = vld [vmem:[#allocation14_spill] sm:$0xff] }
 0x293   :  { %1601 = vmatpush.msrb.mxu2 %v2614_v34  ;;  %1618 = vmatpush.msrb.mxu3 %v2526_v0  ;;  %v3280_v0 = vld [vmem:[#allocation26_spill] sm:$0xff]  ;;  %v3289_v34 = vld [vmem:[#allocation31_spill] sm:$0xff] }
 0x294   :  { %1562 = vmatpush.msrb.mxu0 %v2695_v50  ;;  %1579 = vmatpush.msrb.mxu1 %v2648_v55 }
 0x295   :  { %1602 = vmatpush.msrb.mxu2 %v2625_v26  ;;  %1619 = vmatpush.msrb.mxu3 %v2542_v58  ;;  %v3282_v58 = vld [vmem:[#allocation13_spill] sm:$0xff] }
 0x296   :  { %1563 = vmatpush.msrb.mxu0 %v2731_v10  ;;  %1580 = vmatpush.msrb.mxu1 %v2651_v5 }
 0x297   :  { %1603 = vmatpush.msrb.mxu2 %v2660_v17  ;;  %1620 = vmatpush.msrb.mxu3 %v2576_v14  ;;  %v3284_v14 = vld [vmem:[#allocation24_spill] sm:$0xff] }
 0x298   :  { %1564 = vmatpush.msrb.mxu0 %v2735_v61  ;;  %1581 = vmatpush.msrb.mxu1 %v2691_v37 }
 0x299   :  { %1604 = vmatpush.msrb.mxu2 %v2670_v60  ;;  %1621 = vmatpush.msrb.mxu3 %v2617_v41 }
 0x29a   :  { %1565 = vmatpush.msrb.mxu0 %v2779_v19  ;;  %1582 = vmatpush.msrb.mxu1 %v2698_v1 }
 0x29b   :  { %1605 = vmatpush.msrb.mxu2 %v2709_v7  ;;  %1622 = vmatpush.msrb.mxu3 %v2628_v38 }
 0x29c   :  { %1566 = vmatpush.msrb.mxu0 %v3269_v24  ;;  %1583 = vmatpush.msrb.mxu1 %v2740_v8 }
 0x29d   :  { %1606 = vmatpush.msrb.mxu2 %v2716_v23  ;;  %1623 = vmatpush.msrb.mxu3 %v2667_v22 }
 0x29e   :  { %1567 = vmatpush.msrb.mxu0 %v3272_v35  ;;  %1584 = vmatpush.msrb.mxu1 %v2743_v39 }
 0x29f   :  { %1607 = vmatpush.msrb.mxu2 %v2758_v13  ;;  %1624 = vmatpush.msrb.mxu3 %v2675_v62 }
 0x2a0   :  { %1568 = vmatpush.msrb.mxu0 %v2831_v42  ;;  %1585 = vmatpush.msrb.mxu1 %v3266_v45 }
 0x2a1   :  { %1608 = vmatpush.msrb.mxu2 %v3268_v6  ;;  %1625 = vmatpush.msrb.mxu3 %v2724_v3 }
 0x2a2   :  { %1569 = vmatpush.msrb.mxu0 %v2874_v15  ;;  %1586 = vmatpush.msrb.mxu1 %v2791_v44 }
 0x2a3   :  { %1609 = vmatpush.msrb.mxu2 %v3271_v56  ;;  %1626 = vmatpush.msrb.mxu3 %v2727_v40 }
 0x2a4   :  { %1570 = vmatpush.msrb.mxu0 %v2878_v20  ;;  %1587 = vmatpush.msrb.mxu1 %v3273_v46 }
 0x2a5   :  { %1610 = vmatpush.msrb.mxu2 %v3275_v11  ;;  %1627 = vmatpush.msrb.mxu3 %v3277_v27 }
 0x2a6   :  { %1571 = vmatpush.msrb.mxu0 %v3278_v36  ;;  %1588 = vmatpush.msrb.mxu1 %v3279_v32 }
 0x2a7   :  { %1611 = vmatpush.msrb.mxu2 %v3280_v0  ;;  %1628 = vmatpush.msrb.mxu3 %v3281_v30 }
 0x2a8   :  { %1572 = vmatpush.msrb.mxu0 %v2901_v25  ;;  %1589 = vmatpush.msrb.mxu1 %v3282_v58 }
 0x2a9   :  { %1612 = vmatpush.msrb.mxu2 %v3283_v52  ;;  %1629 = vmatpush.msrb.mxu3 %v3284_v14 }
 0x2aa   :  { %1590 = vmatpush.msrb.mxu1 %v3285_v49 }
 0x2ab   :  { %1630 = vmatpush.msrb.mxu3 %v3286_v54 }
 0x2ac   :  { %1591 = vmatpush.msrb.mxu1 %v2907_v51 }
 0x2ad   :  { %1631 = vmatpush.msrb.mxu3 %v3287_v12 }
 0x2ae   :  { %1592 = vmatpush.msrb.mxu1 %v3288_v31 }
 0x2af   :  { %1632 = vmatpush.msrb.mxu3 %v3289_v34 }
 0x306   :  { %v1414_v41 = vpop.f32.mrf.mxu0 }
 0x30c   :  { %v1434_v26 = vpop.f32.mrf.mxu1  ;;  %v1454_v43 = vpop.f32.mrf.mxu2 }
 0x30d   :  { %v1435_v38 = vadd.f32 %v1434_v26, %v1414_v41 }
 0x30f   :  { %1493 = vmatmul.f32.vlgmr.msra.gmra.mxu0 %v1435_v38  ;;  %1533 = vmatmul.f32.vlgmr.msra.gmra.mxu2 %v1435_v38 }
 0x312   :  { %v1474_v9 = vpop.f32.mrf.mxu3 }
 0x313   :  { %v1475_v55 = vadd.f32 %v1474_v9, %v1454_v43 }
 0x315   :  { %1513 = vmatmul.f32.vlgmr.msra.gmra.mxu1 %v1475_v55  ;;  %1553 = vmatmul.f32.vlgmr.msra.gmra.mxu3 %v1475_v55 }
 0x38c   :  { %v1494_v5 = vpop.f32.mrf.mxu0 }
 0x392   :  { %v1514_v17 = vpop.f32.mrf.mxu1  ;;  %v1534_v60 = vpop.f32.mrf.mxu2 }
 0x393   :  { %v1515_v22 = vadd.f32 %v1514_v17, %v1494_v5 }
 0x395   :  { %1573 = vmatmul.f32.vlgmr.msrb.gmra.mxu0 %v1515_v22  ;;  %1613 = vmatmul.f32.vlgmr.msrb.gmra.mxu2 %v1515_v22 }
 0x398   :  { %v1554_v62 = vpop.f32.mrf.mxu3 }
 0x399   :  { %v1555_v28 = vadd.f32 %v1554_v62, %v1534_v60 }
 0x39b   :  { %1593 = vmatmul.f32.vlgmr.msrb.gmra.mxu1 %v1555_v28  ;;  %1633 = vmatmul.f32.vlgmr.msrb.gmra.mxu3 %v1555_v28 }
 0x412   :  { %v1574_v23 = vpop.f32.mrf.mxu0 }
 0x418   :  { %v1594_v37 = vpop.f32.mrf.mxu1  ;;  %v1614_v50 = vpop.f32.mrf.mxu2 }
 0x419   :  { %v1595_v3 = vadd.f32 %v1594_v37, %v1574_v23 }
 0x41e   :  { %v1634_v1 = vpop.f32.mrf.mxu3 }
 0x41f   :  { %v1635_v7 = vadd.f32 %v1634_v1, %v1614_v50 }
 0x421   :  { %v1639_v40 = vrot.slane %v1635_v7, 4 }
 0x423   :  { %v1640_v10 = vsel %vm849_vm0, %v1595_v3, %v1639_v40 }
 0x424   :  { %1643 = vst [vmem:[#allocation8 + $0x8] sm:$0xff] %v1640_v10 }
 0x425   :  { %1656 = dma.vmem_to_hbm [thread:$0]  %s1649_s22, 256, %s1651_s25, [#allocation5], %s1750_s17, %s1750_s17, %s1751_s18  }
 0x426   :  { %1747 = dma.done.wait [#allocation5], 256  }
 0x427   :  { %1748 = vsyncadd [#allocation5], 4294967040 }
 0x428   :  { %1661 = vsyncpa [#allocation4], 1 }
 0x429   :  { %1662 = vsyncpa [#allocation7], 1 }
 0x42a   :  { %1663 = vsyncpa [#allocation5], 1 }

</bundles_post_ra>
